<compile_context>
chip_gen: v7x
topology: tpu7x:2x2x1
jax: 0.10.0
libtpu: 0.0.40
codegen_flags: <defaults>
</compile_context>

<pallas_src>
import functools

import jax
import jax.numpy as jnp
from jax.experimental import pallas as pl
from jax.experimental.pallas import tpu as pltpu

_MIB = 1024 * 1024


def _round_up(n, m):
    return ((n + m - 1) // m) * m


def _apply_f(pre, f_name):
    if f_name == "relu":
        return jax.nn.relu(pre)
    if f_name == "tanh":
        return jnp.tanh(pre)
    raise ValueError(f"unsupported activation: {f_name!r}")


def _precision_for(dot_dtype):
    # Full f32 matmul when the caller asks for exact f32; default for bf16.
    return jax.lax.Precision.HIGHEST if dot_dtype == jnp.float32 else None


def _highway_layer(h_f32, w_slab, b_slab, *, size, f_name, dot_dtype):
    """One highway layer on a (TB, S_pad) f32 activation tile."""
    z = jnp.dot(h_f32.astype(dot_dtype), w_slab,
                preferred_element_type=jnp.float32,
                precision=_precision_for(dot_dtype)) + b_slab
    gate = jax.nn.sigmoid(z[:, 0 * size:1 * size])
    nonlinear = _apply_f(z[:, 1 * size:2 * size], f_name)
    linear = z[:, 2 * size:3 * size]
    # h = gate*nonlinear + (1-gate)*linear, rewritten to save one mul + one sub.
    return linear + gate * (nonlinear - linear)


def _highway_resident_kernel(x_ref, w_ref, b_ref, o_ref, *,
                             num_layers, size, f_name, dot_dtype):
    """All layers unrolled; weights fully resident in VMEM.

    x_ref: (TB, S_pad) f32        w_ref: (L, S_pad, 3*S_pad) dot_dtype
    b_ref: (L, 1, 3*S_pad) f32    o_ref: (TB, S_pad) f32
    """
    h = x_ref[...].astype(jnp.float32)
    for layer in range(num_layers):  # small L only (large L -> streaming path)
        h = _highway_layer(h, w_ref[layer], b_ref[layer],
                           size=size, f_name=f_name, dot_dtype=dot_dtype)
    o_ref[...] = h.astype(o_ref.dtype)


def _highway_stream_kernel(x_ref, w_ref, b_ref, o_ref, h_ref, *,
                           size, f_name, dot_dtype):
    """Layer axis on the grid; activation carried in VMEM scratch.

    x_ref: (TB, S_pad) f32        w_ref: (1, S_pad, 3*S_pad) dot_dtype
    b_ref: (1, 1, 3*S_pad) f32    o_ref: (TB, S_pad) f32
    h_ref: (TB, S_pad) f32 scratch (carried across the layer axis)
    """
    layer = pl.program_id(1)

    @pl.when(layer == 0)
    def _():
        h_ref[...] = x_ref[...].astype(jnp.float32)

    h_ref[...] = _highway_layer(h_ref[...], w_ref[0], b_ref[0],
                                size=size, f_name=f_name, dot_dtype=dot_dtype)

    @pl.when(layer == pl.num_programs(1) - 1)
    def _():
        o_ref[...] = h_ref[...].astype(o_ref.dtype)


def _clamp_vmem(need_bytes, phys_bytes):
    # Request at least 32 MiB of scoped VMEM, never above physical capacity.
    return int(min(max(int(need_bytes), 32 * _MIB), phys_bytes - 2 * _MIB))


def highway_forward(x, w_gate, b_gate, w_nonlin, b_nonlin, w_lin, b_lin, *,
                    f_name="relu", block_b=512, dot_dtype=jnp.bfloat16,
                    force_layer_stream=False):
    """Highway forward.

    x:   (B, S) float32
    w_*: (L, S, S)  PyTorch nn.Linear weights (y = x @ W.T + b)
    b_*: (L, S)
    returns: (B, S) float32
    """
    if f_name not in ("relu", "tanh"):
        raise ValueError(f"unsupported activation: {f_name!r}")

    B, S = x.shape
    L = w_gate.shape[0]
    dot_dtype = jnp.dtype(dot_dtype)
    dot_bytes = dot_dtype.itemsize

    # Lane/sublane-aligned padded sizes.
    S_pad = _round_up(max(S, 128), 128)
    TB = min(_round_up(block_b, 8), _round_up(B, 8))
    B_pad = _round_up(B, TB)

    x_p = jnp.zeros((B_pad, S_pad), jnp.float32).at[:B, :S].set(x.astype(jnp.float32))

    def pad_w(w):
        # (L, S, S) torch layout -> (L, S_pad, S_pad) in x@W layout, zero padded.
        wt = jnp.transpose(w.astype(jnp.float32), (0, 2, 1))
        return jnp.zeros((L, S_pad, S_pad), jnp.float32).at[:, :S, :S].set(wt)

    def pad_b(b):
        return jnp.zeros((L, 1, S_pad), jnp.float32).at[:, 0, :S].set(b.astype(jnp.float32))

    # Fused [gate | nonlinear | linear] weights (dot dtype) and biases (f32).
    w_cat = jnp.concatenate([pad_w(w_gate), pad_w(w_nonlin), pad_w(w_lin)],
                            axis=2).astype(dot_dtype)
    b_cat = jnp.concatenate([pad_b(b_gate), pad_b(b_nonlin), pad_b(b_lin)], axis=2)

    # ---- VMEM budgeting ----------------------------------------------------
    try:
        phys_vmem = int(pltpu.get_tpu_info().vmem_capacity_bytes)
    except Exception:
        phys_vmem = 64 * _MIB  # conservative: v7x per-TensorCore capacity

    w_bytes = L * S_pad * 3 * S_pad * dot_bytes
    b_bytes = L * 3 * S_pad * 4
    act_bytes = 2 * 2 * TB * S_pad * 4          # x + out tiles, double-buffered
    z_bytes = TB * 3 * S_pad * 4                # per-layer matmul result (f32)
    h_bytes = TB * S_pad * 4
    slack = 4 * _MIB

    resident_need_2buf = 2 * (w_bytes + b_bytes) + act_bytes + z_bytes + h_bytes + slack
    resident_need_1buf = (w_bytes + b_bytes) + act_bytes + z_bytes + h_bytes + slack
    stream_need = 2 * (w_bytes + b_bytes) // L + act_bytes + z_bytes + h_bytes + slack

    use_stream = (force_layer_stream or L > 8
                  or resident_need_1buf > int(0.75 * phys_vmem))

    cost = pl.CostEstimate(
        flops=2 * L * B_pad * S_pad * 3 * S_pad,
        transcendentals=2 * L * B_pad * S_pad,
        bytes_accessed=int(w_bytes + b_bytes + 2 * B_pad * S_pad * 4),
    )

    # ---- resident-weights path ----------------------------------------------
    def resident_call(single_buffer_weights):
        def const_spec(shape):
            idx = lambda i: (0,) * len(shape)
            if single_buffer_weights:
                # Constant block index -> a second pipeline buffer is pure waste.
                return pl.BlockSpec(shape, idx, pipeline_mode=pl.Buffered(1))
            return pl.BlockSpec(shape, idx)

        kernel = functools.partial(
            _highway_resident_kernel, num_layers=L, size=S_pad,
            f_name=f_name, dot_dtype=dot_dtype)
        need = resident_need_1buf if single_buffer_weights else resident_need_2buf
        return pl.pallas_call(
            kernel,
            out_shape=jax.ShapeDtypeStruct((B_pad, S_pad), jnp.float32),
            grid_spec=pltpu.PrefetchScalarGridSpec(
                num_scalar_prefetch=0,
                grid=(B_pad // TB,),
                in_specs=[
                    pl.BlockSpec((TB, S_pad), lambda i: (i, 0)),      # batch tile
                    const_spec((L, S_pad, 3 * S_pad)),                # resident weights
                    const_spec((L, 1, 3 * S_pad)),                    # resident biases
                ],
                out_specs=pl.BlockSpec((TB, S_pad), lambda i: (i, 0)),
            ),
            compiler_params=pltpu.CompilerParams(
                dimension_semantics=("parallel",),
                vmem_limit_bytes=_clamp_vmem(need, phys_vmem),
            ),
            cost_estimate=cost,
        )(x_p, w_cat, b_cat)

    # ---- layer-streaming path ------------------------------------------------
    def stream_call():
        kernel = functools.partial(
            _highway_stream_kernel, size=S_pad, f_name=f_name, dot_dtype=dot_dtype)
        return pl.pallas_call(
            kernel,
            out_shape=jax.ShapeDtypeStruct((B_pad, S_pad), jnp.float32),
            grid_spec=pltpu.PrefetchScalarGridSpec(
                num_scalar_prefetch=0,
                grid=(B_pad // TB, L),
                in_specs=[
                    pl.BlockSpec((TB, S_pad), lambda i, l: (i, 0)),
                    pl.BlockSpec((1, S_pad, 3 * S_pad), lambda i, l: (l, 0, 0)),
                    pl.BlockSpec((1, 1, 3 * S_pad), lambda i, l: (l, 0, 0)),
                ],
                out_specs=pl.BlockSpec((TB, S_pad), lambda i, l: (i, 0)),
                scratch_shapes=[pltpu.VMEM((TB, S_pad), jnp.float32)],
            ),
            compiler_params=pltpu.CompilerParams(
                dimension_semantics=("parallel", "arbitrary"),
                vmem_limit_bytes=_clamp_vmem(stream_need, phys_vmem),
            ),
            cost_estimate=cost,
        )(x_p, w_cat, b_cat)

    if use_stream:
        out = stream_call()
    else:
        try:
            out = resident_call(True)
        except Exception:
            # Fallback if this JAX build rejects single-buffered BlockSpecs.
            out = resident_call(False)

    return out[:B, :S]


def highway_reference(x, w_gate, b_gate, w_nonlin, b_nonlin, w_lin, b_lin, f=jax.nn.relu):
    """Pure-JAX reference matching the PyTorch Highway forward (full f32 matmuls)."""
    hp = lambda a, b: jnp.dot(a, b, precision=jax.lax.Precision.HIGHEST)
    h = x
    for layer in range(w_gate.shape[0]):
        gate = jax.nn.sigmoid(hp(h, w_gate[layer].T) + b_gate[layer])
        nonlinear = f(hp(h, w_nonlin[layer].T) + b_nonlin[layer])
        linear = hp(h, w_lin[layer].T) + b_lin[layer]
        h = gate * nonlinear + (1.0 - gate) * linear
    return h


if __name__ == "__main__":
    # Small shapes consistent with Highway(size=64, num_layers=2, f=relu).
    BATCH, SIZE, NUM_LAYERS = 2, 64, 2

    key = jax.random.PRNGKey(0)
    keys = jax.random.split(key, 7)

    # nn.Linear default init: uniform(+-1/sqrt(in_features)).
    bound = 1.0 / jnp.sqrt(jnp.float32(SIZE))
    w_gate = jax.random.uniform(keys[0], (NUM_LAYERS, SIZE, SIZE), jnp.float32, -bound, bound)
    b_gate = jax.random.uniform(keys[1], (NUM_LAYERS, SIZE), jnp.float32, -bound, bound)
    w_nonlin = jax.random.uniform(keys[2], (NUM_LAYERS, SIZE, SIZE), jnp.float32, -bound, bound)
    b_nonlin = jax.random.uniform(keys[3], (NUM_LAYERS, SIZE), jnp.float32, -bound, bound)
    w_lin = jax.random.uniform(keys[4], (NUM_LAYERS, SIZE, SIZE), jnp.float32, -bound, bound)
    b_lin = jax.random.uniform(keys[5], (NUM_LAYERS, SIZE), jnp.float32, -bound, bound)
    x = jax.random.normal(keys[6], (BATCH, SIZE), jnp.float32)

    args = (x, w_gate, b_gate, w_nonlin, b_nonlin, w_lin, b_lin)
    ref = jax.block_until_ready(highway_reference(*args))

    # 1) Exact f32-operand path (resident weights) -- tight tolerance.
    out_f32 = jax.block_until_ready(highway_forward(*args, dot_dtype=jnp.float32))
    assert out_f32.shape == (BATCH, SIZE)
    assert jnp.allclose(out_f32, ref, atol=1e-5, rtol=1e-5)

    # 2) Default bf16-operand / f32-accumulate path (production config).
    out_bf16 = jax.block_until_ready(highway_forward(*args))
    assert out_bf16.shape == (BATCH, SIZE)
    assert jnp.allclose(out_bf16, ref, atol=5e-2, rtol=5e-2)

    # 3) Layer-streaming path (v7x / large-model config), forced at demo shape.
    out_stream = jax.block_until_ready(highway_forward(*args, force_layer_stream=True))
    assert out_stream.shape == (BATCH, SIZE)
    assert jnp.allclose(out_stream, ref, atol=5e-2, rtol=5e-2)

    print("KERNEL_OK")
</pallas_src>

<mosaic_0001>
module attributes {stable_mosaic.version = 11 : i64} {
  func.func @_highway_resident_kernel(%arg0: i32, %arg1: memref<8x128xf32, #tpu.memory_space<vmem>>, %arg2: memref<2x128x384xf32, #tpu.memory_space<vmem>>, %arg3: memref<2x1x384xf32, #tpu.memory_space<vmem>>, %arg4: memref<8x128xf32, #tpu.memory_space<vmem>>) attributes {dimension_semantics = [#tpu.dimension_semantics<parallel>], iteration_bounds = array<i64: 1>, scalar_prefetch = 0 : i64, scratch_operands = 0 : i64, tpu.core_type = #tpu.core_type<tc>, window_params = [{transform_indices = @transform_0, window_bounds = array<i64: 8, 128>}, {pipeline_mode = #tpu.pipeline_mode<synchronous>, transform_indices = @transform_1, window_bounds = array<i64: 2, 128, 384>}, {pipeline_mode = #tpu.pipeline_mode<synchronous>, transform_indices = @transform_2, window_bounds = array<i64: 2, 1, 384>}, {transform_indices = @transform_3, window_bounds = array<i64: 8, 128>}]} {
    %c0 = arith.constant 0 : index
    %c0_0 = arith.constant 0 : index
    %0 = vector.load %arg1[%c0, %c0_0] : memref<8x128xf32, #tpu.memory_space<vmem>>, vector<8x128xf32>
    %c0_1 = arith.constant 0 : index
    %c0_2 = arith.constant 0 : index
    %c0_3 = arith.constant 0 : index
    %1 = vector.load %arg2[%c0_1, %c0_2, %c0_3] : memref<2x128x384xf32, #tpu.memory_space<vmem>>, vector<1x128x384xf32>
    %2 = vector.shape_cast %1 : vector<1x128x384xf32> to vector<128x384xf32>
    %c0_4 = arith.constant 0 : index
    %c0_5 = arith.constant 0 : index
    %c0_6 = arith.constant 0 : index
    %3 = vector.load %arg3[%c0_4, %c0_5, %c0_6] : memref<2x1x384xf32, #tpu.memory_space<vmem>>, vector<1x1x384xf32>
    %4 = vector.shape_cast %3 : vector<1x1x384xf32> to vector<1x384xf32>
    %cst = arith.constant dense<0.000000e+00> : vector<8x384xf32>
    %5 = tpu.matmul %0, %2, %cst {dimension_numbers = #tpu.dot_dimension_numbers<[1], [0], [0], [1], [0, 0, 1, 1], [], []>, precision = #tpu.contract_precision<fp32>} : vector<8x128xf32>, vector<128x384xf32>, vector<8x384xf32> -> vector<8x384xf32>
    %6 = vector.broadcast %4 : vector<1x384xf32> to vector<8x384xf32>
    %7 = arith.addf %5, %6 : vector<8x384xf32>
    %8 = vector.extract_strided_slice %7 {offsets = [0, 0], sizes = [8, 128], strides = [1, 1]} : vector<8x384xf32> to vector<8x128xf32>
    %9 = arith.negf %8 : vector<8x128xf32>
    %10 = math.exp %9 : vector<8x128xf32>
    %cst_7 = arith.constant 1.000000e+00 : f32
    %11 = vector.broadcast %cst_7 : f32 to vector<8x128xf32>
    %12 = arith.addf %11, %10 : vector<8x128xf32>
    %13 = arith.divf %11, %12 : vector<8x128xf32>
    %14 = vector.extract_strided_slice %7 {offsets = [0, 128], sizes = [8, 128], strides = [1, 1]} : vector<8x384xf32> to vector<8x128xf32>
    %cst_8 = arith.constant 0.000000e+00 : f32
    %15 = vector.broadcast %cst_8 : f32 to vector<8x128xf32>
    %16 = arith.maximumf %14, %15 : vector<8x128xf32>
    %17 = vector.extract_strided_slice %7 {offsets = [0, 256], sizes = [8, 128], strides = [1, 1]} : vector<8x384xf32> to vector<8x128xf32>
    %18 = arith.subf %16, %17 : vector<8x128xf32>
    %19 = arith.mulf %13, %18 : vector<8x128xf32>
    %20 = arith.addf %17, %19 : vector<8x128xf32>
    %c1 = arith.constant 1 : index
    %c0_9 = arith.constant 0 : index
    %c0_10 = arith.constant 0 : index
    %21 = vector.load %arg2[%c1, %c0_9, %c0_10] : memref<2x128x384xf32, #tpu.memory_space<vmem>>, vector<1x128x384xf32>
    %22 = vector.shape_cast %21 : vector<1x128x384xf32> to vector<128x384xf32>
    %c1_11 = arith.constant 1 : index
    %c0_12 = arith.constant 0 : index
    %c0_13 = arith.constant 0 : index
    %23 = vector.load %arg3[%c1_11, %c0_12, %c0_13] : memref<2x1x384xf32, #tpu.memory_space<vmem>>, vector<1x1x384xf32>
    %24 = vector.shape_cast %23 : vector<1x1x384xf32> to vector<1x384xf32>
    %cst_14 = arith.constant dense<0.000000e+00> : vector<8x384xf32>
    %25 = tpu.matmul %20, %22, %cst_14 {dimension_numbers = #tpu.dot_dimension_numbers<[1], [0], [0], [1], [0, 0, 1, 1], [], []>, precision = #tpu.contract_precision<fp32>} : vector<8x128xf32>, vector<128x384xf32>, vector<8x384xf32> -> vector<8x384xf32>
    %26 = vector.broadcast %24 : vector<1x384xf32> to vector<8x384xf32>
    %27 = arith.addf %25, %26 : vector<8x384xf32>
    %28 = vector.extract_strided_slice %27 {offsets = [0, 0], sizes = [8, 128], strides = [1, 1]} : vector<8x384xf32> to vector<8x128xf32>
    %29 = arith.negf %28 : vector<8x128xf32>
    %30 = math.exp %29 : vector<8x128xf32>
    %cst_15 = arith.constant 1.000000e+00 : f32
    %31 = vector.broadcast %cst_15 : f32 to vector<8x128xf32>
    %32 = arith.addf %31, %30 : vector<8x128xf32>
    %33 = arith.divf %31, %32 : vector<8x128xf32>
    %34 = vector.extract_strided_slice %27 {offsets = [0, 128], sizes = [8, 128], strides = [1, 1]} : vector<8x384xf32> to vector<8x128xf32>
    %cst_16 = arith.constant 0.000000e+00 : f32
    %35 = vector.broadcast %cst_16 : f32 to vector<8x128xf32>
    %36 = arith.maximumf %34, %35 : vector<8x128xf32>
    %37 = vector.extract_strided_slice %27 {offsets = [0, 256], sizes = [8, 128], strides = [1, 1]} : vector<8x384xf32> to vector<8x128xf32>
    %38 = arith.subf %36, %37 : vector<8x128xf32>
    %39 = arith.mulf %33, %38 : vector<8x128xf32>
    %40 = arith.addf %37, %39 : vector<8x128xf32>
    %c0_17 = arith.constant 0 : index
    %c0_18 = arith.constant 0 : index
    %41 = vector.load %arg4[%c0_17, %c0_18] : memref<8x128xf32, #tpu.memory_space<vmem>>, vector<8x128xf32>
    tpu.vector_store %arg4[%c0_17, %c0_18], %40 {strides = array<i32>} : memref<8x128xf32, #tpu.memory_space<vmem>>, vector<8x128xf32>,
    return
  }
  func.func @transform_0(%arg0: i32) -> (i32, i32) {
    %c0_i32 = arith.constant 0 : i32
    %c0_i32_0 = arith.constant 0 : i32
    return %arg0, %c0_i32 : i32, i32
  }
  func.func @transform_1(%arg0: i32) -> (i32, i32, i32) {
    %c0_i32 = arith.constant 0 : i32
    %c0_i32_0 = arith.constant 0 : i32
    %c0_i32_1 = arith.constant 0 : i32
    %c0_i32_2 = arith.constant 0 : i32
    return %c0_i32, %c0_i32_0, %c0_i32_1 : i32, i32, i32
  }
  func.func @transform_2(%arg0: i32) -> (i32, i32, i32) {
    %c0_i32 = arith.constant 0 : i32
    %c0_i32_0 = arith.constant 0 : i32
    %c0_i32_1 = arith.constant 0 : i32
    %c0_i32_2 = arith.constant 0 : i32
    return %c0_i32, %c0_i32_0, %c0_i32_1 : i32, i32, i32
  }
  func.func @transform_3(%arg0: i32) -> (i32, i32) {
    %c0_i32 = arith.constant 0 : i32
    %c0_i32_0 = arith.constant 0 : i32
    return %arg0, %c0_i32 : i32, i32
  }
}

module attributes {stable_mosaic.version = 11 : i64} {
  func.func @_highway_resident_kernel(%arg0: i32, %arg1: memref<8x128xf32, #tpu.memory_space<vmem>>, %arg2: memref<2x128x384xf32, #tpu.memory_space<vmem>>, %arg3: memref<2x1x384xf32, #tpu.memory_space<vmem>>, %arg4: memref<8x128xf32, #tpu.memory_space<vmem>>) attributes {dimension_semantics = [#tpu.dimension_semantics<parallel>], iteration_bounds = array<i64: 1>, scalar_prefetch = 0 : i64, scratch_operands = 0 : i64, tpu.core_type = #tpu.core_type<tc>, window_params = [{transform_indices = @transform_0, window_bounds = array<i64: 8, 128>}, {pipeline_mode = #tpu.pipeline_mode<synchronous>, transform_indices = @transform_1, window_bounds = array<i64: 2, 128, 384>}, {pipeline_mode = #tpu.pipeline_mode<synchronous>, transform_indices = @transform_2, window_bounds = array<i64: 2, 1, 384>}, {transform_indices = @transform_3, window_bounds = array<i64: 8, 128>}]} {
    %c0 = arith.constant 0 : index
    %c0_0 = arith.constant 0 : index
    %0 = vector.load %arg1[%c0, %c0_0] : memref<8x128xf32, #tpu.memory_space<vmem>>, vector<8x128xf32>
    %c0_1 = arith.constant 0 : index
    %c0_2 = arith.constant 0 : index
    %c0_3 = arith.constant 0 : index
    %1 = vector.load %arg2[%c0_1, %c0_2, %c0_3] : memref<2x128x384xf32, #tpu.memory_space<vmem>>, vector<1x128x384xf32>
    %2 = vector.shape_cast %1 : vector<1x128x384xf32> to vector<128x384xf32>
    %c0_4 = arith.constant 0 : index
    %c0_5 = arith.constant 0 : index
    %c0_6 = arith.constant 0 : index
    %3 = vector.load %arg3[%c0_4, %c0_5, %c0_6] : memref<2x1x384xf32, #tpu.memory_space<vmem>>, vector<1x1x384xf32>
    %4 = vector.shape_cast %3 : vector<1x1x384xf32> to vector<1x384xf32>
    %cst = arith.constant dense<0.000000e+00> : vector<8x384xf32>
    %5 = tpu.matmul %0, %2, %cst {dimension_numbers = #tpu.dot_dimension_numbers<[1], [0], [0], [1], [0, 0, 1, 1], [], []>, precision = #tpu.contract_precision<fp32>} : vector<8x128xf32>, vector<128x384xf32>, vector<8x384xf32> -> vector<8x384xf32>
    %6 = vector.broadcast %4 : vector<1x384xf32> to vector<8x384xf32>
    %7 = arith.addf %5, %6 : vector<8x384xf32>
    %8 = vector.extract_strided_slice %7 {offsets = [0, 0], sizes = [8, 128], strides = [1, 1]} : vector<8x384xf32> to vector<8x128xf32>
    %9 = arith.negf %8 : vector<8x128xf32>
    %10 = math.exp %9 : vector<8x128xf32>
    %cst_7 = arith.constant 1.000000e+00 : f32
    %11 = vector.broadcast %cst_7 : f32 to vector<8x128xf32>
    %12 = arith.addf %11, %10 : vector<8x128xf32>
    %13 = arith.divf %11, %12 : vector<8x128xf32>
    %14 = vector.extract_strided_slice %7 {offsets = [0, 128], sizes = [8, 128], strides = [1, 1]} : vector<8x384xf32> to vector<8x128xf32>
    %cst_8 = arith.constant 0.000000e+00 : f32
    %15 = vector.broadcast %cst_8 : f32 to vector<8x128xf32>
    %16 = arith.maximumf %14, %15 : vector<8x128xf32>
    %17 = vector.extract_strided_slice %7 {offsets = [0, 256], sizes = [8, 128], strides = [1, 1]} : vector<8x384xf32> to vector<8x128xf32>
    %18 = arith.subf %16, %17 : vector<8x128xf32>
    %19 = arith.mulf %13, %18 : vector<8x128xf32>
    %20 = arith.addf %17, %19 : vector<8x128xf32>
    %c1 = arith.constant 1 : index
    %c0_9 = arith.constant 0 : index
    %c0_10 = arith.constant 0 : index
    %21 = vector.load %arg2[%c1, %c0_9, %c0_10] : memref<2x128x384xf32, #tpu.memory_space<vmem>>, vector<1x128x384xf32>
    %22 = vector.shape_cast %21 : vector<1x128x384xf32> to vector<128x384xf32>
    %c1_11 = arith.constant 1 : index
    %c0_12 = arith.constant 0 : index
    %c0_13 = arith.constant 0 : index
    %23 = vector.load %arg3[%c1_11, %c0_12, %c0_13] : memref<2x1x384xf32, #tpu.memory_space<vmem>>, vector<1x1x384xf32>
    %24 = vector.shape_cast %23 : vector<1x1x384xf32> to vector<1x384xf32>
    %cst_14 = arith.constant dense<0.000000e+00> : vector<8x384xf32>
    %25 = tpu.matmul %20, %22, %cst_14 {dimension_numbers = #tpu.dot_dimension_numbers<[1], [0], [0], [1], [0, 0, 1, 1], [], []>, precision = #tpu.contract_precision<fp32>} : vector<8x128xf32>, vector<128x384xf32>, vector<8x384xf32> -> vector<8x384xf32>
    %26 = vector.broadcast %24 : vector<1x384xf32> to vector<8x384xf32>
    %27 = arith.addf %25, %26 : vector<8x384xf32>
    %28 = vector.extract_strided_slice %27 {offsets = [0, 0], sizes = [8, 128], strides = [1, 1]} : vector<8x384xf32> to vector<8x128xf32>
    %29 = arith.negf %28 : vector<8x128xf32>
    %30 = math.exp %29 : vector<8x128xf32>
    %cst_15 = arith.constant 1.000000e+00 : f32
    %31 = vector.broadcast %cst_15 : f32 to vector<8x128xf32>
    %32 = arith.addf %31, %30 : vector<8x128xf32>
    %33 = arith.divf %31, %32 : vector<8x128xf32>
    %34 = vector.extract_strided_slice %27 {offsets = [0, 128], sizes = [8, 128], strides = [1, 1]} : vector<8x384xf32> to vector<8x128xf32>
    %cst_16 = arith.constant 0.000000e+00 : f32
    %35 = vector.broadcast %cst_16 : f32 to vector<8x128xf32>
    %36 = arith.maximumf %34, %35 : vector<8x128xf32>
    %37 = vector.extract_strided_slice %27 {offsets = [0, 256], sizes = [8, 128], strides = [1, 1]} : vector<8x384xf32> to vector<8x128xf32>
    %38 = arith.subf %36, %37 : vector<8x128xf32>
    %39 = arith.mulf %33, %38 : vector<8x128xf32>
    %40 = arith.addf %37, %39 : vector<8x128xf32>
    %c0_17 = arith.constant 0 : index
    %c0_18 = arith.constant 0 : index
    %41 = vector.load %arg4[%c0_17, %c0_18] : memref<8x128xf32, #tpu.memory_space<vmem>>, vector<8x128xf32>
    tpu.vector_store %arg4[%c0_17, %c0_18], %40 {strides = array<i32>} : memref<8x128xf32, #tpu.memory_space<vmem>>, vector<8x128xf32>,
    return
  }
  func.func @transform_0(%arg0: i32) -> (i32, i32) {
    %c0_i32 = arith.constant 0 : i32
    %c0_i32_0 = arith.constant 0 : i32
    return %arg0, %c0_i32 : i32, i32
  }
  func.func @transform_1(%arg0: i32) -> (i32, i32, i32) {
    %c0_i32 = arith.constant 0 : i32
    %c0_i32_0 = arith.constant 0 : i32
    %c0_i32_1 = arith.constant 0 : i32
    %c0_i32_2 = arith.constant 0 : i32
    return %c0_i32, %c0_i32_0, %c0_i32_1 : i32, i32, i32
  }
  func.func @transform_2(%arg0: i32) -> (i32, i32, i32) {
    %c0_i32 = arith.constant 0 : i32
    %c0_i32_0 = arith.constant 0 : i32
    %c0_i32_1 = arith.constant 0 : i32
    %c0_i32_2 = arith.constant 0 : i32
    return %c0_i32, %c0_i32_0, %c0_i32_1 : i32, i32, i32
  }
  func.func @transform_3(%arg0: i32) -> (i32, i32) {
    %c0_i32 = arith.constant 0 : i32
    %c0_i32_0 = arith.constant 0 : i32
    return %arg0, %c0_i32 : i32, i32
  }
}

</mosaic_0001>

<bundles_post_ra>
// kernel: tpu_custom_call.1
= control target key start
LH: loop header
LB: loop body
LE: loop exit
PB: predicated region body
PF: predicated region fallthrough
CT: control target
= control target key end

     0   :  { %8 = vsyncpa [#allocation3], 0  ;;  %s6523_s0 = inlined_call_operand.hbm [shape: f32[8,128], index: 0, kind: input, shape index: {}]   ;;  %s6524_s1 = inlined_call_operand.hbm [shape: f32[2,128,384], index: 1, kind: input, shape index: {}]   ;;  %s6525_s2 = inlined_call_operand.vmem [shape: f32[2,1,384], index: 2, kind: input, shape index: {}]   ;;  %s6526_s3 = inlined_call_operand.hbm [shape: f32[8,128], index: 3, kind: output, shape index: {}]  }
   0x1   :  { %9 = vsyncpa [#allocation6], 0 }
   0x2   :  { %10 = vsyncpa [#allocation4], 0  ;;  %s4636_s12 = smov [#allocation2]   ;;  %s4637_s14 = smov [#allocation5]  }
   0x3   :  { %s17_s13 = sshll.u32 %s4636_s12, 4  ;;  %s26_s15 = sshll.u32 %s4637_s14, 4  ;;  %s18_s13 = int_to_ptr.vmem [resolvable:$true] %s17_s13  ;;  %s4664_s15 = int_to_ptr.vmem [resolvable:$true] %s26_s15 }
   0x4   :  { %s4564_s18 = scalar_lea.hbm %s6523_s0, 128 }
   0x5   :  { %p4565_p0 = scmp.ne.s32.totalorder %s6523_s0, %s4564_s18  ;;  %p4568_p1 = scmp.lt.u32.totalorder %s4564_s18, %s6523_s0 }
   0x7   :  { %p4570_p2 = pnand %p4568_p1, %p4565_p0 }
   0x9   :  { %4573 = shalt.err (!%p4570_p2)
}
   0xa   :  { %s4574_s23 = scalar_lea.vmem %s18_s13, 128  ;;  %p4579_p4 = scmp.lt.s32.totalorder %s18_s13, %s18_s13 }
   0xb   :  { %p4575_p3 = scmp.ne.s32.totalorder %s18_s13, %s4574_s23  ;;  %p4580_p5 = scmp.lt.s32.totalorder %s4574_s23, %s4574_s23 }
   0xd   :  { %p4581_p6 = por %p4580_p5, %p4579_p4 }
   0xf   :  { %p4582_p7 = pnand %p4581_p6, %p4575_p3 }
  0x11   :  { %4585 = shalt.err (!%p4582_p7)
}
  0x12   :  { %20 = dma.hbm_to_vmem [thread:$0]  %s6523_s0, 128, %s18_s13, [#allocation3]  }
  0x13   :  { %s4586_s28 = scalar_lea.hbm %s6524_s1, 12288 }
  0x14   :  { %p4587_p8 = scmp.ne.s32.totalorder %s6524_s1, %s4586_s28  ;;  %p4590_p9 = scmp.lt.u32.totalorder %s4586_s28, %s6524_s1 }
  0x16   :  { %p4592_p10 = pnand %p4590_p9, %p4587_p8 }
  0x18   :  { %4595 = shalt.err (!%p4592_p10)
}
  0x19   :  { %s4596_s6 = scalar_lea.vmem %s4664_s15, 12288  ;;  %p4601_p12 = scmp.lt.s32.totalorder %s4664_s15, %s4664_s15 }
  0x1a   :  { %p4597_p11 = scmp.ne.s32.totalorder %s4664_s15, %s4596_s6  ;;  %p4602_p13 = scmp.lt.s32.totalorder %s4596_s6, %s4596_s6 }
  0x1c   :  { %p4603_p0 = por %p4602_p13, %p4601_p12 }
  0x1e   :  { %p4604_p1 = pnand %p4603_p0, %p4597_p11 }
  0x20   :  { %4607 = shalt.err (!%p4604_p1)
}
  0x21   :  { %s4638_s0 = smov 384   ;;  %s4639_s7 = smov 24  }
  0x22   :  { %32 = dma.hbm_to_vmem [thread:$0]  %s6524_s1, 12288, %s4664_s15, [#allocation6], %s4638_s0, %s4638_s0, %s4639_s7  }
  0x23   :  { %4630 = dma.done.wait [#allocation3], 128  }
  0x24   :  { %4631 = vsyncadd [#allocation3], 4294967168 }
  0x25   :  { %4632 = dma.done.wait [#allocation6], 12288  }
  0x26   :  { %4633 = vsyncadd [#allocation6], 4294955008  ;;  %v6533_v0 = vmov 0.0|0.0   ;;  %vm4641_vm0 = vmmov 0   ;;  %v6527_v1 = vmov 0.0   ;;  %v43_v2 = vld [vmem:[#allocation5 + $0x8] sm:$0xff] }
  0x27   :  { %4022 = vmatprep.subr.bf16.mxu1 %v6533_v0  ;;  %3442 = vmatprep.mubr.msk.f32.mxu1 %vm4641_vm0, %v6527_v1  ;;  %v46_v3 = vld [vmem:[#allocation5 + $0x20] sm:$0xff]  ;;  %v44_v4 = vld [vmem:[#allocation5 + $0x10] sm:$0xff]  ;;  %v107_v5 = vand.u32 4294901760, %v43_v2  ;;  %v47_v7 = vld [vmem:[#allocation5 + $0x28] sm:$0xff] }
  0x28   :  { %203 = vmatprep.mubr.f32.mxu0 %v6527_v1  ;;  %v111_v6 = vand.u32 4294901760, %v46_v3  ;;  %v963_v8 = vand.u32 4294901760, %v44_v4  ;;  %v42_v9 = vld [vmem:[#allocation5] sm:$0xff]  ;;  %v45_v10 = vld [vmem:[#allocation5 + $0x18] sm:$0xff]  ;;  %v966_v11 = vand.u32 4294901760, %v47_v7  ;;  %v52_v15 = vld [vmem:[#allocation5 + $0x50] sm:$0xff] }
  0x29   :  { %v109_v12 = vand.u32 4294901760, %v42_v9  ;;  %v113_v13 = vand.u32 4294901760, %v45_v10  ;;  %v49_v14 = vld [vmem:[#allocation5 + $0x38] sm:$0xff]  ;;  %v50_v16 = vld [vmem:[#allocation5 + $0x40] sm:$0xff]  ;;  %v4701_v18 = vsub.f32 %v43_v2, %v107_v5  ;;  %v48_v22 = vld [vmem:[#allocation5 + $0x30] sm:$0xff]  ;;  %v119_v31 = vand.u32 4294901760, %v52_v15 }
  0x2a   :  { %v4699_v17 = vpack.c.bf16 %v111_v6, %v107_v5  ;;  %v4703_v19 = vsub.f32 %v46_v3, %v111_v6  ;;  %v4705_v20 = vsub.f32 %v44_v4, %v963_v8  ;;  %v53_v21 = vld [vmem:[#allocation5 + $0x58] sm:$0xff]  ;;  %v51_v23 = vld [vmem:[#allocation5 + $0x48] sm:$0xff]  ;;  %v4707_v24 = vpack.c.bf16 %v966_v11, %v963_v8  ;;  %v58_v33 = vld [vmem:[#allocation5 + $0x80] sm:$0xff] }
  0x2b   :  { %v4709_v25 = vsub.f32 %v47_v7, %v966_v11  ;;  %v4711_v26 = vpack.c.bf16 %v113_v13, %v109_v12  ;;  %v4713_v27 = vsub.f32 %v42_v9, %v109_v12  ;;  %v55_v28 = vld [vmem:[#allocation5 + $0x68] sm:$0xff]  ;;  %v4716_v29 = vsub.f32 %v45_v10, %v113_v13  ;;  %v56_v38 = vld [vmem:[#allocation5 + $0x70] sm:$0xff]  ;;  %v54_v44 = vld [vmem:[#allocation5 + $0x60] sm:$0xff] }
  0x2c   :  { %6817 = vst [vmem:[#allocation11_spill] sm:$0xff] %v4699_v17  ;;  %6818 = vst [vmem:[#allocation12_spill] sm:$0xff] %v4705_v20  ;;  %3831 = vmatprep.subr.bf16.mxu0 %v4699_v17  ;;  %v115_v30 = vand.u32 4294901760, %v49_v14  ;;  %v969_v32 = vand.u32 4294901760, %v50_v16  ;;  %4024 = vmatpush3.bf16.msra.mxu1 %v4707_v24  ;;  %v972_v34 = vand.u32 4294901760, %v53_v21  ;;  %v117_v35 = vand.u32 4294901760, %v48_v22 }
  0x2d   :  { %6819 = vst [vmem:[#allocation13_spill] sm:$0xff] %v4707_v24  ;;  %6820 = vst [vmem:[#allocation14_spill] sm:$0xff] %v4709_v25  ;;  %3833 = vmatpush1.bf16.msra.mxu0 %v4711_v26  ;;  %v121_v36 = vand.u32 4294901760, %v51_v23  ;;  %v123_v37 = vand.u32 4294901760, %v55_v28  ;;  %v59_v39 = vld [vmem:[#allocation5 + $0x88] sm:$0xff]  ;;  %4025 = vmatprep.subr.bf16.mxu1 %v6533_v0  ;;  %v4725_v42 = vsub.f32 %v52_v15, %v119_v31  ;;  %v57_v45 = vld [vmem:[#allocation5 + $0x78] sm:$0xff] }
  0x2e   :  { %6821 = vst [vmem:[#allocation15_spill] sm:$0xff] %v4711_v26  ;;  %6822 = vst [vmem:[#allocation16_spill] sm:$0xff] %v4713_v27  ;;  %v4721_v40 = vpack.c.bf16 %v119_v31, %v115_v30  ;;  %v4723_v41 = vsub.f32 %v49_v14, %v115_v30  ;;  %v4727_v43 = vsub.f32 %v50_v16, %v969_v32  ;;  %v61_v46 = vld [vmem:[#allocation5 + $0x98] sm:$0xff]  ;;  %v64_v51 = vld [vmem:[#allocation5 + $0xb0] sm:$0xff]  ;;  %v127_v53 = vand.u32 4294901760, %v58_v33 }
  0x2f   :  { %6823 = vst [vmem:[#allocation17_spill] sm:$0xff] %v4716_v29  ;;  %v4729_v47 = vpack.c.bf16 %v972_v34, %v969_v32  ;;  %v4731_v48 = vsub.f32 %v53_v21, %v972_v34  ;;  %v4733_v49 = vpack.c.bf16 %v121_v36, %v117_v35  ;;  %v4735_v50 = vsub.f32 %v48_v22, %v117_v35  ;;  %v62_v60 = vld [vmem:[#allocation5 + $0xa0] sm:$0xff]  ;;  %v65_v61 = vld [vmem:[#allocation5 + $0xb8] sm:$0xff]  ;;  %v60_v4 = vld [vmem:[#allocation5 + $0x90] sm:$0xff] }
  0x30   :  { %6824 = vst [vmem:[#allocation18_spill] sm:$0xff] %v4721_v40  ;;  %6825 = vst [vmem:[#allocation19_spill] sm:$0xff] %v4723_v41  ;;  %3835 = vmatprep.subr.bf16.mxu0 %v4721_v40  ;;  %v4738_v52 = vsub.f32 %v51_v23, %v121_v36  ;;  %v4740_v54 = vsub.f32 %v55_v28, %v123_v37  ;;  %v975_v55 = vand.u32 4294901760, %v56_v38  ;;  %v978_v56 = vand.u32 4294901760, %v59_v39  ;;  %v63_v5 = vld [vmem:[#allocation5 + $0xa8] sm:$0xff]  ;;  %v70_v11 = vld [vmem:[#allocation5 + $0xe0] sm:$0xff] }
  0x31   :  { %6826 = vst [vmem:[#allocation20_spill] sm:$0xff] %v4729_v47  ;;  %6827 = vst [vmem:[#allocation21_spill] sm:$0xff] %v4733_v49  ;;  %4027 = vmatpush3.bf16.msra.mxu1 %v4729_v47  ;;  %3837 = vmatpush1.bf16.msra.mxu0 %v4733_v49  ;;  %v125_v57 = vand.u32 4294901760, %v54_v44  ;;  %v129_v58 = vand.u32 4294901760, %v57_v45  ;;  %v131_v59 = vand.u32 4294901760, %v61_v46  ;;  %v4745_v62 = vpack.c.bf16 %v127_v53, %v123_v37  ;;  %v67_v6 = vld [vmem:[#allocation5 + $0xc8] sm:$0xff] }
  0x32   :  { %4028 = vmatprep.subr.bf16.mxu1 %v6533_v0  ;;  %v4747_v63 = vsub.f32 %v58_v33, %v127_v53  ;;  %v4749_v2 = vsub.f32 %v56_v38, %v975_v55  ;;  %v135_v3 = vand.u32 4294901760, %v64_v51  ;;  %v4751_v7 = vpack.c.bf16 %v978_v56, %v975_v55  ;;  %v68_v12 = vld [vmem:[#allocation5 + $0xd0] sm:$0xff]  ;;  %v71_v13 = vld [vmem:[#allocation5 + $0xe8] sm:$0xff]  ;;  %v66_v35 = vld [vmem:[#allocation5 + $0xc0] sm:$0xff] }
  0x33   :  { %6828 = vst [vmem:[#allocation22_spill] sm:$0xff] %v4745_v62  ;;  %v4753_v8 = vsub.f32 %v59_v39, %v978_v56  ;;  %v4755_v9 = vpack.c.bf16 %v129_v58, %v125_v57  ;;  %v4757_v10 = vsub.f32 %v54_v44, %v125_v57  ;;  %3839 = vmatprep.subr.bf16.mxu0 %v4745_v62  ;;  %v981_v22 = vand.u32 4294901760, %v62_v60  ;;  %v69_v44 = vld [vmem:[#allocation5 + $0xd8] sm:$0xff]  ;;  %v74_v57 = vld [vmem:[#allocation5 + $0x100] sm:$0xff]  ;;  %v79_v1 = vld [vmem:[#allocation5 + $0x128] sm:$0xff] }
  0x34   :  { %6829 = vst [vmem:[#allocation23_spill] sm:$0xff] %v4751_v7  ;;  %v4760_v14 = vsub.f32 %v57_v45, %v129_v58  ;;  %v4762_v15 = vpack.c.bf16 %v135_v3, %v131_v59  ;;  %v4764_v16 = vsub.f32 %v61_v46, %v131_v59  ;;  %v4766_v21 = vsub.f32 %v64_v51, %v135_v3  ;;  %v73_v45 = vld [vmem:[#allocation5 + $0xf8] sm:$0xff]  ;;  %v76_v46 = vld [vmem:[#allocation5 + $0x110] sm:$0xff] }
  0x35   :  { %6830 = vst [vmem:[#allocation24_spill] sm:$0xff] %v4755_v9  ;;  %4030 = vmatpush3.bf16.msra.mxu1 %v4751_v7  ;;  %3841 = vmatpush1.bf16.msra.mxu0 %v4755_v9  ;;  %v984_v23 = vand.u32 4294901760, %v65_v61  ;;  %v133_v28 = vand.u32 4294901760, %v60_v4  ;;  %v137_v30 = vand.u32 4294901760, %v63_v5  ;;  %v139_v31 = vand.u32 4294901760, %v67_v6  ;;  %v77_v58 = vld [vmem:[#allocation5 + $0x118] sm:$0xff] }
  0x36   :  { %6831 = vst [vmem:[#allocation25_spill] sm:$0xff] %v4762_v15  ;;  %4031 = vmatprep.subr.bf16.mxu1 %v6533_v0  ;;  %3843 = vmatprep.subr.bf16.mxu0 %v4762_v15  ;;  %v143_v32 = vand.u32 4294901760, %v70_v11  ;;  %v987_v33 = vand.u32 4294901760, %v68_v12  ;;  %v990_v34 = vand.u32 4294901760, %v71_v13  ;;  %v4774_v37 = vsub.f32 %v62_v60, %v981_v22  ;;  %v72_v59 = vld [vmem:[#allocation5 + $0xf0] sm:$0xff]  ;;  %v81_v15 = vld [vmem:[#allocation5 + $0x138] sm:$0xff] }
  0x37   :  { %v4772_v36 = vpack.c.bf16 %v984_v23, %v981_v22  ;;  %v4776_v38 = vsub.f32 %v65_v61, %v984_v23  ;;  %v4778_v39 = vpack.c.bf16 %v137_v30, %v133_v28  ;;  %v4780_v51 = vsub.f32 %v60_v4, %v133_v28  ;;  %v75_v28 = vld [vmem:[#allocation5 + $0x108] sm:$0xff]  ;;  %v85_v47 = vld [vmem:[#allocation5 + $0x158] sm:$0xff]  ;;  %v84_v26 = vld [vmem:[#allocation5 + $0x150] sm:$0xff] }
  0x38   :  { %v4782_v53 = vsub.f32 %v63_v5, %v137_v30  ;;  %v4784_v55 = vpack.c.bf16 %v143_v32, %v139_v31  ;;  %v4786_v56 = vsub.f32 %v67_v6, %v139_v31  ;;  %v4790_v60 = vsub.f32 %v70_v11, %v143_v32  ;;  %v89_v40 = vld [vmem:[#allocation5 + $0x178] sm:$0xff] }
  0x39   :  { %6832 = vst [vmem:[#allocation26_spill] sm:$0xff] %v4772_v36  ;;  %6833 = vst [vmem:[#allocation27_spill] sm:$0xff] %v4778_v39  ;;  %4033 = vmatpush3.bf16.msra.mxu1 %v4772_v36  ;;  %3845 = vmatpush1.bf16.msra.mxu0 %v4778_v39  ;;  %v4792_v61 = vpack.c.bf16 %v990_v34, %v987_v33  ;;  %v4794_v3 = vsub.f32 %v68_v12, %v987_v33  ;;  %v141_v4 = vand.u32 4294901760, %v66_v35  ;;  %v82_v39 = vld [vmem:[#allocation5 + $0x140] sm:$0xff]  ;;  %v80_v12 = vld [vmem:[#allocation5 + $0x130] sm:$0xff] }
  0x3a   :  { %6834 = vst [vmem:[#allocation28_spill] sm:$0xff] %v4784_v55  ;;  %4034 = vmatprep.subr.bf16.mxu1 %v6533_v0  ;;  %3847 = vmatprep.subr.bf16.mxu0 %v4784_v55  ;;  %v4798_v5 = vsub.f32 %v71_v13, %v990_v34  ;;  %v145_v6 = vand.u32 4294901760, %v69_v44  ;;  %v147_v22 = vand.u32 4294901760, %v73_v45  ;;  %v151_v23 = vand.u32 4294901760, %v76_v46  ;;  %v83_v34 = vld [vmem:[#allocation5 + $0x148] sm:$0xff]  ;;  %v78_v55 = vld [vmem:[#allocation5 + $0x120] sm:$0xff] }
  0x3b   :  { %6835 = vst [vmem:[#allocation29_spill] sm:$0xff] %v4792_v61  ;;  %v4800_v30 = vsub.f32 %v66_v35, %v141_v4  ;;  %v993_v31 = vand.u32 4294901760, %v74_v57  ;;  %v996_v11 = vand.u32 4294901760, %v77_v58  ;;  %v149_v32 = vand.u32 4294901760, %v72_v59 }
  0x3c   :  { %v4802_v33 = vpack.c.bf16 %v145_v6, %v141_v4  ;;  %v4804_v36 = vsub.f32 %v69_v44, %v145_v6  ;;  %v4806_v0 = vpack.c.bf16 %v151_v23, %v147_v22  ;;  %v4808_v13 = vsub.f32 %v73_v45, %v147_v22 }
  0x3d   :  { %4036 = vmatpush3.bf16.msra.mxu1 %v4792_v61  ;;  %v4811_v35 = vsub.f32 %v76_v46, %v151_v23  ;;  %v4813_v9 = vpack.c.bf16 %v996_v11, %v993_v31  ;;  %v4815_v7 = vsub.f32 %v74_v57, %v993_v31  ;;  %v4817_v62 = vsub.f32 %v77_v58, %v996_v11  ;;  %v88_v57 = vld [vmem:[#allocation5 + $0x170] sm:$0xff] }
  0x3e   :  { %6836 = vst [vmem:[#allocation30_spill] sm:$0xff] %v4802_v33  ;;  %6837 = vst [vmem:[#allocation31_spill] sm:$0xff] %v4806_v0  ;;  %3849 = vmatpush1.bf16.msra.mxu0 %v4802_v33  ;;  %v6839_v44 = vmov 0.0|0.0   ;;  %v153_v4 = vand.u32 4294901760, %v75_v28  ;;  %v4821_v45 = vsub.f32 %v72_v59, %v149_v32  ;;  %v155_v6 = vand.u32 4294901760, %v79_v1  ;;  %v86_v59 = vld [vmem:[#allocation5 + $0x160] sm:$0xff] }
  0x3f   :  { %6838 = vst [vmem:[#allocation32_spill] sm:$0xff] %v4813_v9  ;;  %4037 = vmatprep.subr.bf16.mxu1 %v6839_v44  ;;  %v159_v22 = vand.u32 4294901760, %v82_v39  ;;  %3851 = vmatprep.subr.bf16.mxu0 %v4806_v0  ;;  %v999_v61 = vand.u32 4294901760, %v80_v12  ;;  %v1002_v46 = vand.u32 4294901760, %v83_v34  ;;  %v157_v23 = vand.u32 4294901760, %v78_v55 }
  0x40   :  { %6840 = vst [vmem:[#allocation33_spill] sm:$0xff] %v4821_v45  ;;  %v161_v49 = vand.u32 4294901760, %v81_v15  ;;  %v4824_v31 = vpack.c.bf16 %v153_v4, %v149_v32  ;;  %v4826_v58 = vsub.f32 %v75_v28, %v153_v4  ;;  %v4830_v33 = vsub.f32 %v79_v1, %v155_v6  ;;  %v87_v32 = vld [vmem:[#allocation5 + $0x168] sm:$0xff] }
  0x41   :  { %v4828_v11 = vpack.c.bf16 %v159_v22, %v155_v6  ;;  %4039 = vmatpush3.bf16.msra.mxu1 %v4813_v9  ;;  %v4833_v0 = vsub.f32 %v82_v39, %v159_v22  ;;  %v4835_v24 = vpack.c.bf16 %v1002_v46, %v999_v61  ;;  %v4837_v17 = vsub.f32 %v80_v12, %v999_v61 }
  0x42   :  { %6841 = vst [vmem:[#allocation34_spill] sm:$0xff] %v4824_v31  ;;  %v4839_v45 = vsub.f32 %v83_v34, %v1002_v46  ;;  %3853 = vmatpush1.bf16.msra.mxu0 %v4824_v31  ;;  %4040 = vmatprep.subr.bf16.mxu1 %v6839_v44  ;;  %v4843_v1 = vpack.c.bf16 %v161_v49, %v157_v23  ;;  %v163_v6 = vand.u32 4294901760, %v85_v47  ;;  %v167_v39 = vand.u32 4294901760, %v88_v57  ;;  %v41_v34 = vld [vmem:[#allocation2] sm:$0xff] }
  0x43   :  { %6842 = vst [vmem:[#allocation35_spill] sm:$0xff] %v4828_v11  ;;  %6843 = vst [vmem:[#allocation36_spill] sm:$0xff] %v4835_v24  ;;  %v4845_v28 = vsub.f32 %v78_v55, %v157_v23  ;;  %v4847_v4 = vsub.f32 %v81_v15, %v161_v49  ;;  %3855 = vmatprep.subr.bf16.mxu0 %v4828_v11  ;;  %v1005_v22 = vand.u32 4294901760, %v86_v59  ;;  %v1008_v61 = vand.u32 4294901760, %v89_v40 }
  0x44   :  { %6844 = vst [vmem:[#allocation37_spill] sm:$0xff] %v4839_v45  ;;  %6845 = vst [vmem:[#allocation38_spill] sm:$0xff] %v4843_v1  ;;  %v165_v12 = vand.u32 4294901760, %v84_v26  ;;  %v4850_v46 = vsub.f32 %v85_v47, %v163_v6  ;;  %v169_v9 = vand.u32 4294901760, %v87_v32  ;;  %v4855_v55 = vpack.c.bf16 %v167_v39, %v163_v6 }
  0x45   :  { %4042 = vmatpush3.bf16.msra.mxu1 %v4835_v24  ;;  %v4857_v49 = vsub.f32 %v88_v57, %v167_v39  ;;  %v4859_v15 = vpack.c.bf16 %v1008_v61, %v1005_v22  ;;  %v4861_v23 = vsub.f32 %v86_v59, %v1005_v22  ;;  %v4865_v47 = vsub.f32 %v89_v40, %v1008_v61 }
  0x46   :  { %6846 = vst [vmem:[#allocation39_spill] sm:$0xff] %v4855_v55  ;;  %3857 = vmatpush1.bf16.msra.mxu0 %v4843_v1  ;;  %4043 = vmatprep.subr.bf16.mxu1 %v6839_v44  ;;  %v4867_v11 = vpack.c.bf16 %v169_v9, %v165_v12  ;;  %v4869_v31 = vsub.f32 %v84_v26, %v165_v12  ;;  %v4871_v45 = vand.u32 4294901760, %v41_v34  ;;  %v6855_v6 = vand.u32 4294901760, %v4701_v18 }
  0x47   :  { %6847 = vst [vmem:[#allocation40_spill] sm:$0xff] %v4857_v49  ;;  %6848 = vst [vmem:[#allocation41_spill] sm:$0xff] %v4859_v15  ;;  %3859 = vmatprep.subr.bf16.mxu0 %v4855_v55  ;;  %v4874_v57 = vsub.f32 %v87_v32, %v169_v9  ;;  %v6856_v39 = vand.u32 4294901760, %v4703_v19  ;;  %v6573_v40 = vand.u32 4294901760, %v4705_v20  ;;  %v6584_v26 = vand.u32 4294901760, %v4709_v25 }
  0x48   :  { %6849 = vst [vmem:[#allocation42_spill] sm:$0xff] %v4861_v23  ;;  %6850 = vst [vmem:[#allocation43_spill] sm:$0xff] %v4865_v47  ;;  %v218_v59 = vsub.f32 %v4701_v18, %v6855_v6  ;;  %v4884_v61 = vsub.f32 %v41_v34, %v4871_v45  ;;  %v6589_v12 = vand.u32 4294901760, %v4713_v27  ;;  %v6608_v24 = vand.u32 4294901760, %v4725_v42 }
  0x49   :  { %6851 = vst [vmem:[#allocation44_spill] sm:$0xff] %v4867_v11  ;;  %6852 = vst [vmem:[#allocation45_spill] sm:$0xff] %v4869_v31  ;;  %v230_v22 = vsub.f32 %v4703_v19, %v6856_v39  ;;  %4045 = vmatpush3.bf16.msra.mxu1 %v4859_v15  ;;  %v1057_v6 = vsub.f32 %v4705_v20, %v6573_v40  ;;  %v1064_v9 = vsub.f32 %v4709_v25, %v6584_v26 }
  0x4a   :  { %6853 = vst [vmem:[#allocation46_spill] sm:$0xff] %v4871_v45  ;;  %6854 = vst [vmem:[#allocation47_spill] sm:$0xff] %v4874_v57  ;;  %v219_v32 = vand.u32 4294901760, %v218_v59  ;;  %3861 = vmatpush1.bf16.msra.mxu0 %v4867_v11  ;;  %4046 = vmatprep.subr.bf16.mxu1 %v6839_v44  ;;  %v4897_v34 = vand.u32 4294901760, %v4884_v61  ;;  %v224_v59 = vsub.f32 %v4713_v27, %v6589_v12  ;;  %v6860_v11 = vand.u32 4294901760, %v4723_v41 }
  0x4b   :  { %6857 = vst [vmem:[#allocation48_spill] sm:$0xff] %v4884_v61  ;;  %v231_v55 = vand.u32 4294901760, %v230_v22  ;;  %v6859_v22 = vand.u32 4294901760, %v4716_v29  ;;  %v1058_v15 = vand.u32 4294901760, %v1057_v6  ;;  %v1065_v26 = vand.u32 4294901760, %v1064_v9 }
  0x4c   :  { %6858 = vst [vmem:[#allocation49_spill] sm:$0xff] %v4897_v34  ;;  %v242_v1 = vsub.f32 %v4723_v41, %v6860_v11  ;;  %v207_v45 = vsub.f32 %v4884_v61, %v4897_v34  ;;  %v225_v25 = vand.u32 4294901760, %v224_v59  ;;  %v6599_v9 = vand.u32 4294901760, %v4738_v52 }
  0x4d   :  { %v236_v40 = vsub.f32 %v4716_v29, %v6859_v22  ;;  %v3862_v39 = vpack.c.bf16 %v231_v55, %v219_v32  ;;  %v254_v22 = vsub.f32 %v4725_v42, %v6608_v24  ;;  %v6601_v55 = vand.u32 4294901760, %v4727_v43 }
  0x4e   :  { %v243_v12 = vand.u32 4294901760, %v242_v1  ;;  %v6597_v32 = vand.u32 4294901760, %v4731_v48  ;;  %v208_v6 = vand.u32 4294901760, %v207_v45  ;;  %v4047_v11 = vpack.c.bf16 %v1065_v26, %v1058_v15 }
  0x4f   :  { %v237_v20 = vand.u32 4294901760, %v236_v40  ;;  %3863 = vmatprep.subr.bf16.mxu0 %v3862_v39  ;;  %v6596_v29 = vand.u32 4294901760, %v4735_v50  ;;  %v255_v27 = vand.u32 4294901760, %v254_v22  ;;  %v1071_v40 = vsub.f32 %v4727_v43, %v6601_v55 }
  0x50   :  { %v1078_v1 = vsub.f32 %v4731_v48, %v6597_v32  ;;  %3443 = vmatmul.mubr.f32.vlgmr.msra.gmra.mrb[0].mxu1 %v208_v6  ;;  %209 = vmatmul.mubr.f32.vlgmr.msra.gmra.mrb[0].mxu0 %v208_v6  ;;  %v6602_v15 = vand.u32 4294901760, %v4749_v2  ;;  %v260_v22 = vsub.f32 %v4738_v52, %v6599_v9 }
  0x51   :  { %v3864_v41 = vpack.c.bf16 %v237_v20, %v225_v25  ;;  %v248_v45 = vsub.f32 %v4735_v50, %v6596_v29  ;;  %v6598_v20 = vand.u32 4294901760, %v4740_v54  ;;  %v6600_v25 = vand.u32 4294901760, %v4747_v63  ;;  %4048 = vmatpush3.bf16.msra.mxu1 %v4047_v11 }
  0x52   :  { %v3866_v26 = vpack.c.bf16 %v255_v27, %v243_v12  ;;  %v1072_v39 = vand.u32 4294901760, %v1071_v40  ;;  %v1079_v59 = vand.u32 4294901760, %v1078_v1  ;;  %4049 = vmatprep.subr.bf16.mxu1 %v6839_v44  ;;  %v1085_v27 = vsub.f32 %v4749_v2, %v6602_v15 }
  0x53   :  { %3865 = vmatpush1.bf16.msra.mxu0 %v3864_v41  ;;  %v249_v6 = vand.u32 4294901760, %v248_v45  ;;  %v266_v29 = vsub.f32 %v4740_v54, %v6598_v20  ;;  %v278_v32 = vsub.f32 %v4747_v63, %v6600_v25  ;;  %v6861_v41 = vmov 0.0  }
  0x54   :  { %3477 = vmatprep.mubr.msk.f32.mxu1 %vm4641_vm0, %v6861_v41  ;;  %3867 = vmatprep.subr.bf16.mxu0 %v3866_v26  ;;  %v4050_v12 = vpack.c.bf16 %v1079_v59, %v1072_v39  ;;  %v261_v11 = vand.u32 4294901760, %v260_v22  ;;  %v6606_v40 = vand.u32 4294901760, %v4753_v8  ;;  %v6603_v1 = vand.u32 4294901760, %v4757_v10 }
  0x55   :  { %439 = vmatprep.mubr.f32.mxu0 %v6861_v41  ;;  %v267_v45 = vand.u32 4294901760, %v266_v29  ;;  %v279_v20 = vand.u32 4294901760, %v278_v32  ;;  %v1086_v9 = vand.u32 4294901760, %v1085_v27  ;;  %v6605_v25 = vand.u32 4294901760, %v4760_v14 }
  0x56   :  { %4051 = vmatpush3.bf16.msra.mxu1 %v4050_v12  ;;  %v3868_v55 = vpack.c.bf16 %v261_v11, %v249_v6  ;;  %v1092_v15 = vsub.f32 %v4753_v8, %v6606_v40  ;;  %v272_v26 = vsub.f32 %v4757_v10, %v6603_v1  ;;  %v6604_v39 = vand.u32 4294901760, %v4764_v16 }
  0x57   :  { %4052 = vmatprep.subr.bf16.mxu1 %v6839_v44  ;;  %v3870_v59 = vpack.c.bf16 %v279_v20, %v267_v45  ;;  %v284_v29 = vsub.f32 %v4760_v14, %v6605_v25  ;;  %v6607_v32 = vand.u32 4294901760, %v4766_v21  ;;  %v6623_v22 = vand.u32 4294901760, %v4774_v37 }
  0x58   :  { %3869 = vmatpush1.bf16.msra.mxu0 %v3868_v55  ;;  %v1093_v6 = vand.u32 4294901760, %v1092_v15  ;;  %v273_v27 = vand.u32 4294901760, %v272_v26  ;;  %v290_v12 = vsub.f32 %v4764_v16, %v6604_v39  ;;  %v6615_v11 = vand.u32 4294901760, %v4776_v38 }
  0x59   :  { %3871 = vmatprep.subr.bf16.mxu0 %v3870_v59  ;;  %v285_v1 = vand.u32 4294901760, %v284_v29  ;;  %v302_v20 = vsub.f32 %v4766_v21, %v6607_v32  ;;  %v1099_v45 = vsub.f32 %v4774_v37, %v6623_v22  ;;  %v6609_v55 = vand.u32 4294901760, %v4780_v51 }
  0x5a   :  { %v4053_v15 = vpack.c.bf16 %v1093_v6, %v1086_v9  ;;  %v291_v26 = vand.u32 4294901760, %v290_v12  ;;  %v1106_v39 = vsub.f32 %v4776_v38, %v6615_v11  ;;  %v6610_v25 = vand.u32 4294901760, %v4782_v53 }
  0x5b   :  { %v3872_v59 = vpack.c.bf16 %v285_v1, %v273_v27  ;;  %v303_v29 = vand.u32 4294901760, %v302_v20  ;;  %v1100_v40 = vand.u32 4294901760, %v1099_v45  ;;  %v296_v32 = vsub.f32 %v4780_v51, %v6609_v55 }
  0x5c   :  { %4054 = vmatpush3.bf16.msra.mxu1 %v4053_v15  ;;  %v1107_v24 = vand.u32 4294901760, %v1106_v39  ;;  %v308_v9 = vsub.f32 %v4782_v53, %v6610_v25  ;;  %v6611_v6 = vand.u32 4294901760, %v4786_v56  ;;  %v6612_v12 = vand.u32 4294901760, %v4790_v60 }
  0x5d   :  { %3873 = vmatpush1.bf16.msra.mxu0 %v3872_v59  ;;  %4055 = vmatprep.subr.bf16.mxu1 %v6839_v44  ;;  %v3874_v1 = vpack.c.bf16 %v303_v29, %v291_v26  ;;  %v297_v27 = vand.u32 4294901760, %v296_v32  ;;  %v6613_v20 = vand.u32 4294901760, %v4794_v3  ;;  %v6614_v45 = vand.u32 4294901760, %v4798_v5 }
  0x5e   :  { %v4056_v55 = vpack.c.bf16 %v1107_v24, %v1100_v40  ;;  %v309_v15 = vand.u32 4294901760, %v308_v9  ;;  %v314_v39 = vsub.f32 %v4786_v56, %v6611_v6  ;;  %v326_v25 = vsub.f32 %v4790_v60, %v6612_v12 }
  0x5f   :  { %3875 = vmatprep.subr.bf16.mxu0 %v3874_v1  ;;  %v1113_v26 = vsub.f32 %v4794_v3, %v6613_v20  ;;  %v1120_v32 = vsub.f32 %v4798_v5, %v6614_v45  ;;  %v6616_v24 = vand.u32 4294901760, %v4800_v30  ;;  %v6618_v40 = vand.u32 4294901760, %v4804_v36 }
  0x60   :  { %4057 = vmatpush3.bf16.msra.mxu1 %v4056_v55  ;;  %v3876_v59 = vpack.c.bf16 %v309_v15, %v297_v27  ;;  %v315_v29 = vand.u32 4294901760, %v314_v39  ;;  %v327_v9 = vand.u32 4294901760, %v326_v25  ;;  %v6617_v6 = vand.u32 4294901760, %v4808_v13 }
  0x61   :  { %4058 = vmatprep.subr.bf16.mxu1 %v6839_v44  ;;  %v1114_v1 = vand.u32 4294901760, %v1113_v26  ;;  %v1121_v12 = vand.u32 4294901760, %v1120_v32  ;;  %v320_v20 = vsub.f32 %v4800_v30, %v6616_v24  ;;  %v332_v45 = vsub.f32 %v4804_v36, %v6618_v40 }
  0x62   :  { %3877 = vmatpush1.bf16.msra.mxu0 %v3876_v59  ;;  %v3878_v11 = vpack.c.bf16 %v327_v9, %v315_v29  ;;  %v338_v25 = vsub.f32 %v4808_v13, %v6617_v6  ;;  %v6622_v55 = vand.u32 4294901760, %v4811_v35  ;;  %v6619_v27 = vand.u32 4294901760, %v4815_v7  ;;  %v6862_v9 = vld [vmem:[#allocation33_spill] sm:$0xff] }
  0x63   :  { %v4059_v15 = vpack.c.bf16 %v1121_v12, %v1114_v1  ;;  %v321_v39 = vand.u32 4294901760, %v320_v20  ;;  %v333_v26 = vand.u32 4294901760, %v332_v45  ;;  %v6620_v32 = vand.u32 4294901760, %v4817_v62 }
  0x64   :  { %3879 = vmatprep.subr.bf16.mxu0 %v3878_v11  ;;  %v339_v24 = vand.u32 4294901760, %v338_v25  ;;  %v350_v59 = vsub.f32 %v4811_v35, %v6622_v55  ;;  %v1127_v29 = vsub.f32 %v4815_v7, %v6619_v27  ;;  %v6621_v6 = vand.u32 4294901760, %v6862_v9  ;;  %v6863_v55 = vld [vmem:[#allocation37_spill] sm:$0xff] }
  0x65   :  { %4060 = vmatpush3.bf16.msra.mxu1 %v4059_v15  ;;  %v3880_v40 = vpack.c.bf16 %v333_v26, %v321_v39  ;;  %v1134_v12 = vsub.f32 %v4817_v62, %v6620_v32  ;;  %v6626_v20 = vand.u32 4294901760, %v4826_v58  ;;  %v6630_v11 = vand.u32 4294901760, %v4830_v33 }
  0x66   :  { %4061 = vmatprep.subr.bf16.mxu1 %v6839_v44  ;;  %v351_v45 = vand.u32 4294901760, %v350_v59  ;;  %v1128_v1 = vand.u32 4294901760, %v1127_v29  ;;  %v344_v25 = vsub.f32 %v6862_v9, %v6621_v6  ;;  %v6629_v27 = vand.u32 4294901760, %v4833_v0 }
  0x67   :  { %3881 = vmatpush1.bf16.msra.mxu0 %v3880_v40  ;;  %v1135_v15 = vand.u32 4294901760, %v1134_v12  ;;  %v356_v39 = vsub.f32 %v4826_v58, %v6626_v20  ;;  %v362_v26 = vsub.f32 %v4830_v33, %v6630_v11  ;;  %v6639_v32 = vand.u32 4294901760, %v4837_v17 }
  0x68   :  { %v3882_v59 = vpack.c.bf16 %v351_v45, %v339_v24  ;;  %v345_v29 = vand.u32 4294901760, %v344_v25  ;;  %v374_v6 = vsub.f32 %v4833_v0, %v6629_v27  ;;  %v6635_v22 = vand.u32 4294901760, %v6863_v55 }
  0x69   :  { %v4062_v40 = vpack.c.bf16 %v1135_v15, %v1128_v1  ;;  %v357_v12 = vand.u32 4294901760, %v356_v39  ;;  %v363_v34 = vand.u32 4294901760, %v362_v26  ;;  %v1141_v20 = vsub.f32 %v4837_v17, %v6639_v32 }
  0x6a   :  { %3883 = vmatprep.subr.bf16.mxu0 %v3882_v59  ;;  %v375_v61 = vand.u32 4294901760, %v374_v6  ;;  %v1148_v24 = vsub.f32 %v6863_v55, %v6635_v22  ;;  %v6631_v45 = vand.u32 4294901760, %v4845_v28  ;;  %v6632_v25 = vand.u32 4294901760, %v4847_v4 }
  0x6b   :  { %4063 = vmatpush3.bf16.msra.mxu1 %v4062_v40  ;;  %v3884_v27 = vpack.c.bf16 %v357_v12, %v345_v29  ;;  %v1142_v11 = vand.u32 4294901760, %v1141_v20  ;;  %v6633_v1 = vand.u32 4294901760, %v4850_v46  ;;  %v6634_v15 = vand.u32 4294901760, %v4857_v49 }
  0x6c   :  { %4064 = vmatprep.subr.bf16.mxu1 %v6839_v44  ;;  %v3886_v39 = vpack.c.bf16 %v375_v61, %v363_v34  ;;  %v1149_v26 = vand.u32 4294901760, %v1148_v24  ;;  %v368_v6 = vsub.f32 %v4845_v28, %v6631_v45  ;;  %v380_v59 = vsub.f32 %v4847_v4, %v6632_v25 }
  0x6d   :  { %3885 = vmatpush1.bf16.msra.mxu0 %v3884_v27  ;;  %v386_v20 = vsub.f32 %v4850_v46, %v6633_v1  ;;  %v398_v29 = vsub.f32 %v4857_v49, %v6634_v15  ;;  %v6636_v61 = vand.u32 4294901760, %v4861_v23  ;;  %v6637_v34 = vand.u32 4294901760, %v4865_v47 }
  0x6e   :  { %3887 = vmatprep.subr.bf16.mxu0 %v3886_v39  ;;  %v4065_v40 = vpack.c.bf16 %v1149_v26, %v1142_v11  ;;  %v369_v12 = vand.u32 4294901760, %v368_v6  ;;  %v381_v24 = vand.u32 4294901760, %v380_v59  ;;  %v6638_v45 = vand.u32 4294901760, %v4869_v31 }
  0x6f   :  { %v387_v25 = vand.u32 4294901760, %v386_v20  ;;  %v399_v27 = vand.u32 4294901760, %v398_v29  ;;  %v1155_v1 = vsub.f32 %v4861_v23, %v6636_v61  ;;  %v1162_v15 = vsub.f32 %v4865_v47, %v6637_v34 }
  0x70   :  { %4066 = vmatpush3.bf16.msra.mxu1 %v4065_v40  ;;  %v3888_v22 = vpack.c.bf16 %v381_v24, %v369_v12  ;;  %v392_v11 = vsub.f32 %v4869_v31, %v6638_v45  ;;  %v403_v39 = vand.u32 4294901760, %v4874_v57  ;;  %v3894_v40 = vpack.c.bf16 %v4703_v19, %v4701_v18  ;;  %v6864_v12 = vld [vmem:[#allocation12_spill] sm:$0xff]  ;;  %v6865_v24 = vld [vmem:[#allocation14_spill] sm:$0xff] }
  0x71   :  { %4067 = vmatprep.subr.bf16.mxu1 %v6839_v44  ;;  %v3890_v26 = vpack.c.bf16 %v399_v27, %v387_v25  ;;  %v1156_v6 = vand.u32 4294901760, %v1155_v1  ;;  %v1163_v59 = vand.u32 4294901760, %v1162_v15  ;;  %v4071_v45 = vpack.c.bf16 %v6865_v24, %v6864_v12  ;;  %v6866_v25 = vld [vmem:[#allocation16_spill] sm:$0xff]  ;;  %v6867_v1 = vld [vmem:[#allocation17_spill] sm:$0xff] }
  0x72   :  { %3889 = vmatpush1.bf16.msra.mxu0 %v3888_v22  ;;  %v393_v20 = vand.u32 4294901760, %v392_v11  ;;  %v404_v29 = vsub.f32 %v4874_v57, %v403_v39  ;;  %v3896_v15 = vpack.c.bf16 %v6867_v1, %v6866_v25  ;;  %v6868_v22 = vld [vmem:[#allocation19_spill] sm:$0xff]  ;;  %v4074_v11 = vpack.c.bf16 %v4731_v48, %v4727_v43 }
  0x73   :  { %3891 = vmatprep.subr.bf16.mxu0 %v3890_v26  ;;  %v4068_v61 = vpack.c.bf16 %v1163_v59, %v1156_v6  ;;  %v3898_v27 = vpack.c.bf16 %v4725_v42, %v6868_v22  ;;  %v3900_v26 = vpack.c.bf16 %v4738_v52, %v4735_v50  ;;  %v4077_v6 = vpack.c.bf16 %v4753_v8, %v4749_v2 }
  0x74   :  { %v405_v34 = vand.u32 4294901760, %v404_v29  ;;  %v6870_v59 = vand.u32 4294901760, %v4701_v18  ;;  %v6873_v57 = vand.u32 4294901760, %v6865_v24  ;;  %v6874_v47 = vand.u32 4294901760, %v6866_v25 }
  0x75   :  { %4069 = vmatpush3.bf16.msra.mxu1 %v4068_v61  ;;  %v6869_v61 = vld [vmem:[#allocation46_spill] sm:$0xff]  ;;  %v6875_v23 = vand.u32 4294901760, %v6867_v1  ;;  %v6876_v18 = vand.u32 4294901760, %v6868_v22  ;;  %v6882_v25 = vand.u32 4294901760, %v4740_v54 }
  0x76   :  { %v3892_v32 = vpack.c.bf16 %v405_v34, %v393_v20  ;;  %4070 = vmatprep.subr.bf16.mxu1 %v6839_v44  ;;  %v3902_v34 = vpack.c.bf16 %v4747_v63, %v4740_v54  ;;  %v6871_v20 = vand.u32 4294901760, %v4703_v19  ;;  %v6877_v19 = vand.u32 4294901760, %v4725_v42 }
  0x77   :  { %v5119_v49 = vpack.c.bf16 %v6875_v23, %v6874_v47  ;;  %v6880_v23 = vand.u32 4294901760, %v4735_v50  ;;  %v6881_v47 = vand.u32 4294901760, %v4738_v52  ;;  %v6883_v42 = vand.u32 4294901760, %v4747_v63 }
  0x78   :  { %3893 = vmatpush1.bf16.msra.mxu0 %v3892_v32  ;;  %3478 = vmatmul.mubr.f32.vlgmr.msra.gmra.mrb[0].mxu1 %v6869_v61  ;;  %v5107_v29 = vpack.c.bf16 %v6871_v20, %v6870_v59  ;;  %v6872_v32 = vand.u32 4294901760, %v6864_v12  ;;  %v6886_v50 = vand.u32 4294901760, %v4757_v10  ;;  %v6887_v52 = vand.u32 4294901760, %v4760_v14 }
  0x79   :  { %3895 = vmatprep.subr.bf16.mxu0 %v3894_v40  ;;  %4072 = vmatpush3.bf16.msra.mxu1 %v4071_v45  ;;  %v5128_v45 = vpack.c.bf16 %v6877_v19, %v6876_v18  ;;  %v6879_v40 = vand.u32 4294901760, %v4731_v48  ;;  %v5140_v24 = vpack.c.bf16 %v6881_v47, %v6880_v23  ;;  %v5147_v1 = vpack.c.bf16 %v6883_v42, %v6882_v25 }
  0x7a   :  { %v5113_v31 = vpack.c.bf16 %v6873_v57, %v6872_v32  ;;  %4073 = vmatprep.subr.bf16.mxu1 %v6839_v44  ;;  %3512 = vmatprep.mubr.msk.f32.mxu1 %vm4641_vm0, %v6861_v41  ;;  %v6878_v57 = vand.u32 4294901760, %v4727_v43  ;;  %v6884_v43 = vand.u32 4294901760, %v4749_v2  ;;  %v6885_v48 = vand.u32 4294901760, %v4753_v8 }
  0x7b   :  { %441 = vmatmul.mubr.f32.vlgmr.msra.gmra.mrb[0].mxu0 %v6869_v61  ;;  %v5159_v59 = vpack.c.bf16 %v6887_v52, %v6886_v50  ;;  %v6888_v20 = vand.u32 4294901760, %v4764_v16  ;;  %v6889_v54 = vand.u32 4294901760, %v4766_v21  ;;  %v6890_v63 = vand.u32 4294901760, %v4774_v37 }
  0x7c   :  { %v5134_v12 = vpack.c.bf16 %v6879_v40, %v6878_v57  ;;  %v5153_v22 = vpack.c.bf16 %v6885_v48, %v6884_v43  ;;  %3897 = vmatpush1.bf16.msra.mxu0 %v3896_v15  ;;  %575 = vmatprep.mubr.f32.mxu0 %v6861_v41  ;;  %v6891_v2 = vand.u32 4294901760, %v4776_v38  ;;  %v6892_v18 = vand.u32 4294901760, %v4780_v51 }
  0x7d   :  { %v5165_v32 = vpack.c.bf16 %v6889_v54, %v6888_v20  ;;  %v6893_v19 = vand.u32 4294901760, %v4782_v53  ;;  %v6894_v40 = vand.u32 4294901760, %v4786_v56  ;;  %v6895_v23 = vand.u32 4294901760, %v4790_v60  ;;  %3899 = vmatprep.subr.bf16.mxu0 %v3898_v27  ;;  %4075 = vmatpush3.bf16.msra.mxu1 %v4074_v11 }
  0x7e   :  { %v5172_v8 = vpack.c.bf16 %v6891_v2, %v6890_v63  ;;  %v6896_v15 = vand.u32 4294901760, %v4794_v3  ;;  %v6897_v25 = vand.u32 4294901760, %v4798_v5  ;;  %v6898_v43 = vand.u32 4294901760, %v4800_v30  ;;  %4076 = vmatprep.subr.bf16.mxu1 %v6839_v44 }
  0x7f   :  { %v5178_v57 = vpack.c.bf16 %v6893_v19, %v6892_v18  ;;  %v5184_v47 = vpack.c.bf16 %v6895_v23, %v6894_v40  ;;  %v6899_v48 = vand.u32 4294901760, %v4804_v36  ;;  %v6900_v52 = vand.u32 4294901760, %v4808_v13 }
  0x80   :  { %v5190_v42 = vpack.c.bf16 %v6897_v25, %v6896_v15  ;;  %v6901_v20 = vand.u32 4294901760, %v4811_v35  ;;  %v6902_v27 = vand.u32 4294901760, %v4815_v7  ;;  %v6903_v11 = vand.u32 4294901760, %v4817_v62  ;;  %3901 = vmatpush1.bf16.msra.mxu0 %v3900_v26  ;;  %v6941_v26 = vld [vmem:[#allocation30_spill] sm:$0xff] }
  0x81   :  { %v5196_v50 = vpack.c.bf16 %v6899_v48, %v6898_v43  ;;  %v6905_v2 = vand.u32 4294901760, %v6862_v9  ;;  %v6906_v18 = vand.u32 4294901760, %v4826_v58  ;;  %v6908_v40 = vand.u32 4294901760, %v4830_v33  ;;  %3903 = vmatprep.subr.bf16.mxu0 %v3902_v34  ;;  %4078 = vmatpush3.bf16.msra.mxu1 %v4077_v6  ;;  %v6942_v34 = vld [vmem:[#allocation31_spill] sm:$0xff]  ;;  %v6943_v6 = vld [vmem:[#allocation32_spill] sm:$0xff] }
  0x82   :  { %v5202_v54 = vpack.c.bf16 %v6901_v20, %v6900_v52  ;;  %v5209_v63 = vpack.c.bf16 %v6903_v11, %v6902_v27  ;;  %v6909_v23 = vand.u32 4294901760, %v4833_v0  ;;  %v6911_v25 = vand.u32 4294901760, %v4837_v17  ;;  %4079 = vmatprep.subr.bf16.mxu1 %v6839_v44 }
  0x83   :  { %v5215_v19 = vpack.c.bf16 %v6906_v18, %v6905_v2  ;;  %v6912_v43 = vand.u32 4294901760, %v6863_v55  ;;  %v6914_v52 = vand.u32 4294901760, %v4845_v28  ;;  %v6915_v20 = vand.u32 4294901760, %v4847_v4  ;;  %v6917_v2 = vld [vmem:[#allocation40_spill] sm:$0xff] }
  0x84   :  { %6904 = vst [vmem:[#allocation33_spill] sm:$0xff] %v5209_v63  ;;  %v5221_v15 = vpack.c.bf16 %v6909_v23, %v6908_v40  ;;  %v6916_v11 = vand.u32 4294901760, %v4850_v46  ;;  %v6918_v18 = vand.u32 4294901760, %v6917_v2  ;;  %v6919_v40 = vld [vmem:[#allocation42_spill] sm:$0xff] }
  0x85   :  { %6907 = vst [vmem:[#allocation37_spill] sm:$0xff] %v5215_v19  ;;  %v5227_v48 = vpack.c.bf16 %v6912_v43, %v6911_v25  ;;  %v5233_v27 = vpack.c.bf16 %v6915_v20, %v6914_v52  ;;  %v6920_v23 = vand.u32 4294901760, %v6919_v40  ;;  %v6923_v25 = vld [vmem:[#allocation45_spill] sm:$0xff]  ;;  %v3904_v52 = vpack.c.bf16 %v4760_v14, %v4757_v10 }
  0x86   :  { %6910 = vst [vmem:[#allocation12_spill] sm:$0xff] %v5221_v15  ;;  %v5239_v61 = vpack.c.bf16 %v6918_v18, %v6916_v11  ;;  %v6921_v15 = vld [vmem:[#allocation43_spill] sm:$0xff]  ;;  %v6924_v43 = vand.u32 4294901760, %v6923_v25  ;;  %v3906_v20 = vpack.c.bf16 %v4766_v21, %v4764_v16  ;;  %v4080_v11 = vpack.c.bf16 %v4776_v38, %v4774_v37  ;;  %v6946_v18 = vld [vmem:[#allocation36_spill] sm:$0xff] }
  0x87   :  { %6913 = vst [vmem:[#allocation14_spill] sm:$0xff] %v5227_v48  ;;  %v6922_v19 = vand.u32 4294901760, %v6921_v15  ;;  %3905 = vmatpush1.bf16.msra.mxu0 %v3904_v52  ;;  %v4083_v10 = vpack.c.bf16 %v4798_v5, %v4794_v3  ;;  %v3912_v14 = vpack.c.bf16 %v4804_v36, %v4800_v30  ;;  %v3914_v16 = vpack.c.bf16 %v4811_v35, %v4808_v13  ;;  %v6929_v3 = vld [vmem:[#allocation15_spill] sm:$0xff]  ;;  %v6930_v5 = vld [vmem:[#allocation18_spill] sm:$0xff]  ;;  %v6931_v30 = vld [vmem:[#allocation20_spill] sm:$0xff] }
  0x88   :  { %v5249_v48 = vpack.c.bf16 %v403_v39, %v6924_v43  ;;  %3907 = vmatprep.subr.bf16.mxu0 %v3906_v20  ;;  %4081 = vmatpush3.bf16.msra.mxu1 %v4080_v11  ;;  %v3910_v39 = vpack.c.bf16 %v4790_v60, %v4786_v56  ;;  %v4086_v21 = vpack.c.bf16 %v4817_v62, %v4815_v7  ;;  %v6927_v56 = vld [vmem:[#allocation11_spill] sm:$0xff]  ;;  %v6928_v60 = vld [vmem:[#allocation13_spill] sm:$0xff]  ;;  %v6933_v13 = vld [vmem:[#allocation22_spill] sm:$0xff] }
  0x89   :  { %v5245_v63 = vpack.c.bf16 %v6922_v19, %v6920_v23  ;;  %v3908_v19 = vpack.c.bf16 %v4782_v53, %v4780_v51  ;;  %4082 = vmatprep.subr.bf16.mxu1 %v6839_v44  ;;  %v3916_v37 = vpack.c.bf16 %v4826_v58, %v6862_v9  ;;  %v3918_v38 = vpack.c.bf16 %v4833_v0, %v4830_v33  ;;  %v6925_v0 = vld [vmem:[#allocation47_spill] sm:$0xff]  ;;  %v6926_v53 = vld [vmem:[#allocation48_spill] sm:$0xff]  ;;  %v6932_v33 = vld [vmem:[#allocation21_spill] sm:$0xff] }
  0x8a   :  { %v4089_v36 = vpack.c.bf16 %v6863_v55, %v4837_v17  ;;  %v3920_v62 = vpack.c.bf16 %v4847_v4, %v4845_v28  ;;  %v3922_v7 = vpack.c.bf16 %v6917_v2, %v4850_v46  ;;  %v4092_v51 = vpack.c.bf16 %v6921_v15, %v6919_v40  ;;  %v6934_v35 = vld [vmem:[#allocation23_spill] sm:$0xff]  ;;  %v6935_v58 = vld [vmem:[#allocation24_spill] sm:$0xff]  ;;  %v6936_v28 = vld [vmem:[#allocation25_spill] sm:$0xff] }
  0x8b   :  { %3909 = vmatpush1.bf16.msra.mxu0 %v3908_v19  ;;  %v3924_v17 = vpack.c.bf16 %v6925_v0, %v6923_v25  ;;  %v6937_v4 = vld [vmem:[#allocation26_spill] sm:$0xff]  ;;  %v6938_v46 = vld [vmem:[#allocation27_spill] sm:$0xff]  ;;  %v6939_v55 = vld [vmem:[#allocation28_spill] sm:$0xff] }
  0x8c   :  { %3911 = vmatprep.subr.bf16.mxu0 %v3910_v39  ;;  %4084 = vmatpush3.bf16.msra.mxu1 %v4083_v10  ;;  %v6940_v9 = vld [vmem:[#allocation29_spill] sm:$0xff]  ;;  %v6944_v15 = vld [vmem:[#allocation34_spill] sm:$0xff]  ;;  %v6945_v2 = vld [vmem:[#allocation35_spill] sm:$0xff] }
  0x8d   :  { %4085 = vmatprep.subr.bf16.mxu1 %v6839_v44  ;;  %v6947_v40 = vld [vmem:[#allocation38_spill] sm:$0xff]  ;;  %v6948_v23 = vld [vmem:[#allocation39_spill] sm:$0xff]  ;;  %v6949_v25 = vld [vmem:[#allocation41_spill] sm:$0xff] }
  0x8e   :  { %v6950_v43 = vld [vmem:[#allocation44_spill] sm:$0xff]  ;;  %v6951_v52 = vld [vmem:[#allocation49_spill] sm:$0xff]  ;;  %v5475_v0 = vld [vmem:[#allocation5 + $0x1e8] sm:$0xff] }
  0x8f   :  { %3913 = vmatpush1.bf16.msra.mxu0 %v3912_v14  ;;  %v5437_v20 = vld [vmem:[#allocation5 + $0x1d0] sm:$0xff]  ;;  %v5450_v14 = vld [vmem:[#allocation5 + $0x1c8] sm:$0xff] }
  0x90   :  { %3915 = vmatprep.subr.bf16.mxu0 %v3914_v16  ;;  %4087 = vmatpush3.bf16.msra.mxu1 %v4086_v21  ;;  %v6670_v39 = vand.u32 4294901760, %v5437_v20  ;;  %v5448_v10 = vld [vmem:[#allocation5 + $0x1b0] sm:$0xff]  ;;  %v5452_v16 = vld [vmem:[#allocation5 + $0x1c0] sm:$0xff] }
  0x91   :  { %4088 = vmatprep.subr.bf16.mxu1 %v6839_v44  ;;  %v6667_v21 = vand.u32 4294901760, %v5448_v10 }
  0x93   :  { %3917 = vmatpush1.bf16.msra.mxu0 %v3916_v37  ;;  %v6666_v37 = vand.u32 4294901760, %v5450_v14 }
  0x94   :  { %3919 = vmatprep.subr.bf16.mxu0 %v3918_v38  ;;  %4090 = vmatpush3.bf16.msra.mxu1 %v4089_v36  ;;  %v5457_v38 = vld [vmem:[#allocation5 + $0x1d8] sm:$0xff]  ;;  %v6663_v36 = vand.u32 4294901760, %v5452_v16 }
  0x95   :  { %4091 = vmatprep.subr.bf16.mxu1 %v6839_v44 }
  0x97   :  { %3921 = vmatpush1.bf16.msra.mxu0 %v3920_v62 }
  0x98   :  { %3923 = vmatprep.subr.bf16.mxu0 %v3922_v7  ;;  %4093 = vmatpush3.bf16.msra.mxu1 %v4092_v51  ;;  %v6662_v7 = vand.u32 4294901760, %v5457_v38  ;;  %v5473_v51 = vpack.c.bf16 %v6666_v37, %v6667_v21  ;;  %v5608_v21 = vld [vmem:[#allocation5 + $0x270] sm:$0xff] }
  0x99   :  { %4094 = vmatprep.subr.bf16.mxu1 %v6839_v44 }
  0x9a   :  { %6961 = vst [vmem:[#allocation42_spill] sm:$0xff] %v5473_v51 }
  0x9b   :  { %3925 = vmatpush1.bf16.msra.mxu0 %v3924_v17  ;;  %3513 = vmatmul.mubr.f32.vlgmr.msra.gmra.mrb[0].mxu1 %v6926_v53  ;;  %v5477_v17 = vld [vmem:[#allocation5 + $0x200] sm:$0xff] }
  0x9c   :  { %3927 = vmatprep.subr.bf16.mxu0 %v6927_v56  ;;  %4096 = vmatpush3.bf16.msra.mxu1 %v6928_v60 }
  0x9d   :  { %4097 = vmatprep.subr.bf16.mxu1 %v6839_v44  ;;  %3547 = vmatprep.mubr.msk.f32.mxu1 %vm4641_vm0, %v6861_v41 }
  0x9e   :  { %578 = vmatmul.mubr.f32.vlgmr.msra.gmra.mrb[0].mxu0 %v6926_v53  ;;  %v5484_v53 = vpack.c.bf16 %v6662_v7, %v6663_v36  ;;  %v5595_v7 = vld [vmem:[#allocation5 + $0x278] sm:$0xff]  ;;  %v5597_v36 = vld [vmem:[#allocation5 + $0x290] sm:$0xff] }
  0x9f   :  { %3929 = vmatpush1.bf16.msra.mxu0 %v6929_v3  ;;  %680 = vmatprep.mubr.f32.mxu0 %v6861_v41  ;;  %v6679_v37 = vand.u32 4294901760, %v5597_v36 }
  0xa0   :  { %3931 = vmatprep.subr.bf16.mxu0 %v6930_v5  ;;  %4099 = vmatpush3.bf16.msra.mxu1 %v6931_v30  ;;  %6962 = vst [vmem:[#allocation43_spill] sm:$0xff] %v5484_v53 }
  0xa1   :  { %4100 = vmatprep.subr.bf16.mxu1 %v6839_v44 }
  0xa3   :  { %3933 = vmatpush1.bf16.msra.mxu0 %v6932_v33 }
  0xa4   :  { %3935 = vmatprep.subr.bf16.mxu0 %v6933_v13  ;;  %4102 = vmatpush3.bf16.msra.mxu1 %v6934_v35 }
  0xa5   :  { %4103 = vmatprep.subr.bf16.mxu1 %v6839_v44 }
  0xa7   :  { %3937 = vmatpush1.bf16.msra.mxu0 %v6935_v58 }
  0xa8   :  { %3939 = vmatprep.subr.bf16.mxu0 %v6936_v28  ;;  %4105 = vmatpush3.bf16.msra.mxu1 %v6937_v4 }
  0xa9   :  { %4106 = vmatprep.subr.bf16.mxu1 %v6839_v44 }
  0xab   :  { %3941 = vmatpush1.bf16.msra.mxu0 %v6938_v46 }
  0xac   :  { %3943 = vmatprep.subr.bf16.mxu0 %v6939_v55  ;;  %4108 = vmatpush3.bf16.msra.mxu1 %v6940_v9 }
  0xad   :  { %4109 = vmatprep.subr.bf16.mxu1 %v6839_v44 }
  0xaf   :  { %3945 = vmatpush1.bf16.msra.mxu0 %v6941_v26 }
  0xb0   :  { %3947 = vmatprep.subr.bf16.mxu0 %v6942_v34  ;;  %4111 = vmatpush3.bf16.msra.mxu1 %v6943_v6 }
  0xb1   :  { %4112 = vmatprep.subr.bf16.mxu1 %v6839_v44 }
  0xb3   :  { %3949 = vmatpush1.bf16.msra.mxu0 %v6944_v15 }
  0xb4   :  { %3951 = vmatprep.subr.bf16.mxu0 %v6945_v2  ;;  %4114 = vmatpush3.bf16.msra.mxu1 %v6946_v18 }
  0xb5   :  { %4115 = vmatprep.subr.bf16.mxu1 %v6839_v44 }
  0xb7   :  { %3953 = vmatpush1.bf16.msra.mxu0 %v6947_v40 }
  0xb8   :  { %3955 = vmatprep.subr.bf16.mxu0 %v6948_v23  ;;  %4117 = vmatpush3.bf16.msra.mxu1 %v6949_v25 }
  0xb9   :  { %4118 = vmatprep.subr.bf16.mxu1 %v6839_v44 }
  0xbb   :  { %3957 = vmatpush1.bf16.msra.mxu0 %v6950_v43  ;;  %3548 = vmatmul.mubr.f32.vlgmr.msra.gmra.mrb[0].mxu1 %v6951_v52 }
  0xbc   :  { %3959 = vmatprep.subr.bf16.mxu0 %v5107_v29  ;;  %4120 = vmatpush3.bf16.msra.mxu1 %v5113_v31  ;;  %v6952_v31 = vld [vmem:[#allocation33_spill] sm:$0xff]  ;;  %v6954_v29 = vld [vmem:[#allocation12_spill] sm:$0xff] }
  0xbd   :  { %4121 = vmatprep.subr.bf16.mxu1 %v6839_v44  ;;  %3582 = vmatprep.mubr.msk.f32.mxu1 %vm4641_vm0, %v6861_v41 }
  0xbe   :  { %684 = vmatmul.mubr.f32.vlgmr.msra.gmra.mrb[0].mxu0 %v6951_v52 }
  0xbf   :  { %3961 = vmatpush1.bf16.msra.mxu0 %v5119_v49  ;;  %850 = vmatprep.mubr.f32.mxu0 %v6861_v41  ;;  %v6953_v49 = vld [vmem:[#allocation37_spill] sm:$0xff] }
  0xc0   :  { %3963 = vmatprep.subr.bf16.mxu0 %v5128_v45  ;;  %4123 = vmatpush3.bf16.msra.mxu1 %v5134_v12  ;;  %v6955_v45 = vld [vmem:[#allocation14_spill] sm:$0xff] }
  0xc1   :  { %4124 = vmatprep.subr.bf16.mxu1 %v6839_v44  ;;  %v6956_v12 = vld [vmem:[#allocation46_spill] sm:$0xff] }
  0xc3   :  { %3965 = vmatpush1.bf16.msra.mxu0 %v5140_v24  ;;  %v5407_v24 = vld [vmem:[#allocation5 + $0x1a0] sm:$0xff] }
  0xc4   :  { %3967 = vmatprep.subr.bf16.mxu0 %v5147_v1  ;;  %4126 = vmatpush3.bf16.msra.mxu1 %v5153_v22  ;;  %v6678_v22 = vand.u32 4294901760, %v5407_v24 }
  0xc5   :  { %4127 = vmatprep.subr.bf16.mxu1 %v6839_v44 }
  0xc7   :  { %3969 = vmatpush1.bf16.msra.mxu0 %v5159_v59  ;;  %v5411_v59 = vld [vmem:[#allocation5 + $0x180] sm:$0xff] }
  0xc8   :  { %3971 = vmatprep.subr.bf16.mxu0 %v5165_v32  ;;  %4129 = vmatpush3.bf16.msra.mxu1 %v5172_v8  ;;  %v5413_v32 = vld [vmem:[#allocation5 + $0x198] sm:$0xff]  ;;  %v5415_v8 = vld [vmem:[#allocation5 + $0x190] sm:$0xff] }
  0xc9   :  { %4130 = vmatprep.subr.bf16.mxu1 %v6839_v44 }
  0xcb   :  { %3973 = vmatpush1.bf16.msra.mxu0 %v5178_v57  ;;  %v6677_v57 = vand.u32 4294901760, %v5411_v59 }
  0xcc   :  { %3975 = vmatprep.subr.bf16.mxu0 %v5184_v47  ;;  %4132 = vmatpush3.bf16.msra.mxu1 %v5190_v42  ;;  %v6676_v47 = vand.u32 4294901760, %v5413_v32  ;;  %v5419_v42 = vld [vmem:[#allocation5 + $0x1a8] sm:$0xff] }
  0xcd   :  { %4133 = vmatprep.subr.bf16.mxu1 %v6839_v44 }
  0xcf   :  { %3977 = vmatpush1.bf16.msra.mxu0 %v5196_v50  ;;  %v6675_v50 = vand.u32 4294901760, %v5415_v8 }
  0xd0   :  { %3979 = vmatprep.subr.bf16.mxu0 %v5202_v54  ;;  %4135 = vmatpush3.bf16.msra.mxu1 %v6952_v31 }
  0xd1   :  { %4136 = vmatprep.subr.bf16.mxu1 %v6839_v44 }
  0xd3   :  { %3981 = vmatpush1.bf16.msra.mxu0 %v6953_v49 }
  0xd4   :  { %3983 = vmatprep.subr.bf16.mxu0 %v6954_v29  ;;  %4138 = vmatpush3.bf16.msra.mxu1 %v6955_v45  ;;  %v5555_v29 = vld [vmem:[#allocation5 + $0x248] sm:$0xff]  ;;  %v5557_v45 = vld [vmem:[#allocation5 + $0x260] sm:$0xff] }
  0xd5   :  { %4139 = vmatprep.subr.bf16.mxu1 %v6839_v44 }
  0xd7   :  { %3985 = vmatpush1.bf16.msra.mxu0 %v5233_v27  ;;  %v5435_v27 = vld [vmem:[#allocation5 + $0x1b8] sm:$0xff] }
  0xd8   :  { %3987 = vmatprep.subr.bf16.mxu0 %v5239_v61  ;;  %4141 = vmatpush3.bf16.msra.mxu1 %v5245_v63  ;;  %v5405_v61 = vld [vmem:[#allocation5 + $0x188] sm:$0xff]  ;;  %v6672_v63 = vand.u32 4294901760, %v5419_v42  ;;  %v6671_v19 = vand.u32 4294901760, %v5435_v27 }
  0xd9   :  { %4142 = vmatprep.subr.bf16.mxu1 %v6839_v44  ;;  %v6681_v1 = vand.u32 4294901760, %v5405_v61 }
  0xda   :  { %v5444_v11 = vpack.c.bf16 %v6672_v63, %v6675_v50  ;;  %v5465_v62 = vpack.c.bf16 %v6670_v39, %v6671_v19  ;;  %v6685_v39 = vand.u32 4294901760, %v5608_v21  ;;  %v5617_v63 = vld [vmem:[#allocation5 + $0x298] sm:$0xff] }
  0xdb   :  { %3989 = vmatpush1.bf16.msra.mxu0 %v5249_v48  ;;  %3583 = vmatmul.mubr.f32.vlgmr.msra.gmra.mrb[0].mxu1 %v6956_v12  ;;  %v5426_v54 = vpack.c.bf16 %v6678_v22, %v6681_v1  ;;  %v5433_v48 = vpack.c.bf16 %v6676_v47, %v6677_v57  ;;  %v6692_v50 = vand.u32 4294901760, %v5617_v63  ;;  %v5635_v57 = vld [vmem:[#allocation5 + $0x2a8] sm:$0xff]  ;;  %v5637_v22 = vld [vmem:[#allocation5 + $0x2c0] sm:$0xff] }
  0xdc   :  { %3991 = vmatprep.subr.bf16.mxu0 %v6927_v56  ;;  %4144 = vmatpush3.bf16.msra.mxu1 %v6928_v60  ;;  %6959 = vst [vmem:[#allocation19_spill] sm:$0xff] %v5444_v11  ;;  %6960 = vst [vmem:[#allocation40_spill] sm:$0xff] %v5465_v62  ;;  %v6661_v56 = vand.u32 4294901760, %v5475_v0  ;;  %v6660_v60 = vand.u32 4294901760, %v5477_v17  ;;  %v1732_v1 = vand.u32 4294901760, %v5637_v22 }
  0xdd   :  { %4145 = vmatprep.subr.bf16.mxu1 %v6839_v44  ;;  %3617 = vmatprep.mubr.msk.f32.mxu1 %vm4641_vm0, %v6861_v41  ;;  %6957 = vst [vmem:[#allocation16_spill] sm:$0xff] %v5426_v54  ;;  %6958 = vst [vmem:[#allocation17_spill] sm:$0xff] %v5433_v48 }
  0xde   :  { %852 = vmatmul.mubr.f32.vlgmr.msra.gmra.mrb[0].mxu0 %v6956_v12 }
  0xdf   :  { %3993 = vmatpush1.bf16.msra.mxu0 %v6929_v3  ;;  %954 = vmatprep.mubr.f32.mxu0 %v6861_v41  ;;  %v5488_v3 = vld [vmem:[#allocation5 + $0x1e0] sm:$0xff] }
  0xe0   :  { %3995 = vmatprep.subr.bf16.mxu0 %v6930_v5  ;;  %4147 = vmatpush3.bf16.msra.mxu1 %v6931_v30  ;;  %v5490_v5 = vld [vmem:[#allocation5 + $0x1f8] sm:$0xff]  ;;  %v5492_v30 = vld [vmem:[#allocation5 + $0x1f0] sm:$0xff] }
  0xe1   :  { %4148 = vmatprep.subr.bf16.mxu1 %v6839_v44 }
  0xe3   :  { %3997 = vmatpush1.bf16.msra.mxu0 %v6932_v33  ;;  %v6657_v33 = vand.u32 4294901760, %v5488_v3 }
  0xe4   :  { %3999 = vmatprep.subr.bf16.mxu0 %v6933_v13  ;;  %4150 = vmatpush3.bf16.msra.mxu1 %v6934_v35  ;;  %v6656_v13 = vand.u32 4294901760, %v5490_v5  ;;  %v5497_v35 = vld [vmem:[#allocation5 + $0x208] sm:$0xff] }
  0xe5   :  { %4151 = vmatprep.subr.bf16.mxu1 %v6839_v44 }
  0xe7   :  { %4001 = vmatpush1.bf16.msra.mxu0 %v6935_v58  ;;  %v6655_v58 = vand.u32 4294901760, %v5492_v30 }
  0xe8   :  { %4003 = vmatprep.subr.bf16.mxu0 %v6936_v28  ;;  %4153 = vmatpush3.bf16.msra.mxu1 %v6937_v4  ;;  %v5505_v28 = vpack.c.bf16 %v6660_v60, %v6661_v56  ;;  %v6652_v4 = vand.u32 4294901760, %v5497_v35 }
  0xe9   :  { %4154 = vmatprep.subr.bf16.mxu1 %v6839_v44 }
  0xea   :  { %6963 = vst [vmem:[#allocation45_spill] sm:$0xff] %v5505_v28 }
  0xeb   :  { %4005 = vmatpush1.bf16.msra.mxu0 %v6938_v46  ;;  %v5513_v46 = vpack.c.bf16 %v6656_v13, %v6657_v33  ;;  %v5577_v33 = vld [vmem:[#allocation5 + $0x268] sm:$0xff] }
  0xec   :  { %4007 = vmatprep.subr.bf16.mxu0 %v6939_v55  ;;  %4156 = vmatpush3.bf16.msra.mxu1 %v6940_v9  ;;  %v5515_v55 = vld [vmem:[#allocation5 + $0x218] sm:$0xff]  ;;  %v5517_v9 = vld [vmem:[#allocation5 + $0x230] sm:$0xff]  ;;  %v6673_v60 = vand.u32 4294901760, %v5577_v33 }
  0xed   :  { %4157 = vmatprep.subr.bf16.mxu1 %v6839_v44  ;;  %6964 = vst [vmem:[#allocation47_spill] sm:$0xff] %v5513_v46 }
  0xef   :  { %4009 = vmatpush1.bf16.msra.mxu0 %v6941_v26  ;;  %v5524_v26 = vpack.c.bf16 %v6652_v4, %v6655_v58  ;;  %v5568_v4 = vld [vmem:[#allocation5 + $0x240] sm:$0xff] }
  0xf0   :  { %4011 = vmatprep.subr.bf16.mxu0 %v6942_v34  ;;  %4159 = vmatpush3.bf16.msra.mxu1 %v6943_v6  ;;  %v6651_v34 = vand.u32 4294901760, %v5515_v55  ;;  %v6650_v6 = vand.u32 4294901760, %v5517_v9  ;;  %v6669_v58 = vand.u32 4294901760, %v5568_v4 }
  0xf1   :  { %4160 = vmatprep.subr.bf16.mxu1 %v6839_v44  ;;  %6965 = vst [vmem:[#allocation48_spill] sm:$0xff] %v5524_v26 }
  0xf2   :  { %v5545_v52 = vpack.c.bf16 %v6650_v6, %v6651_v34  ;;  %v6665_v6 = vand.u32 4294901760, %v5555_v29  ;;  %v6664_v34 = vand.u32 4294901760, %v5557_v45 }
  0xf3   :  { %4013 = vmatpush1.bf16.msra.mxu0 %v6944_v15  ;;  %v5528_v15 = vld [vmem:[#allocation5 + $0x210] sm:$0xff] }
  0xf4   :  { %4015 = vmatprep.subr.bf16.mxu0 %v6945_v2  ;;  %4162 = vmatpush3.bf16.msra.mxu1 %v6946_v18  ;;  %v5530_v2 = vld [vmem:[#allocation5 + $0x228] sm:$0xff]  ;;  %v5532_v18 = vld [vmem:[#allocation5 + $0x220] sm:$0xff]  ;;  %6966 = vst [vmem:[#allocation11_spill] sm:$0xff] %v5545_v52 }
  0xf5   :  { %4163 = vmatprep.subr.bf16.mxu1 %v6839_v44 }
  0xf7   :  { %4017 = vmatpush1.bf16.msra.mxu0 %v6947_v40  ;;  %v6654_v40 = vand.u32 4294901760, %v5528_v15 }
  0xf8   :  { %4019 = vmatprep.subr.bf16.mxu0 %v6948_v23  ;;  %4165 = vmatpush3.bf16.msra.mxu1 %v6949_v25  ;;  %v6653_v23 = vand.u32 4294901760, %v5530_v2  ;;  %v5537_v25 = vld [vmem:[#allocation5 + $0x238] sm:$0xff] }
  0xf9   :  { %4358 = vmatprep.subr.bf16.mxu1 %v6839_v44  ;;  %v6658_v31 = vand.u32 4294901760, %v5537_v25 }
  0xfa   :  { %v5553_v49 = vpack.c.bf16 %v6653_v23, %v6654_v40  ;;  %v5570_v23 = vld [vmem:[#allocation5 + $0x258] sm:$0xff]  ;;  %v5572_v40 = vld [vmem:[#allocation5 + $0x250] sm:$0xff] }
  0xfb   :  { %4021 = vmatpush1.bf16.msra.mxu0 %v6950_v43  ;;  %3618 = vmatmul.mubr.f32.vlgmr.msra.gmra.mrb[0].mxu1 %v6956_v12  ;;  %v6659_v43 = vand.u32 4294901760, %v5532_v18  ;;  %v6668_v13 = vand.u32 4294901760, %v5570_v23 }
  0xfc   :  { %3652 = vmatprep.mubr.msk.f32.mxu1 %vm4641_vm0, %v6861_v41  ;;  %4167 = vmatprep.subr.bf16.mxu0 %v5426_v54  ;;  %6967 = vst [vmem:[#allocation13_spill] sm:$0xff] %v5553_v49 }
  0xfd   :  { %4360 = vmatpush3.bf16.msra.mxu1 %v5444_v11  ;;  %v5593_v56 = vpack.c.bf16 %v6668_v13, %v6669_v58  ;;  %v5610_v13 = vld [vmem:[#allocation5 + $0x288] sm:$0xff]  ;;  %v5612_v58 = vld [vmem:[#allocation5 + $0x280] sm:$0xff]  ;;  %v6986_v11 = vand.u32 4294901760, %v5448_v10 }
  0xfe   :  { %956 = vmatmul.mubr.f32.vlgmr.msra.gmra.mrb[0].mxu0 %v6956_v12  ;;  %4361 = vmatprep.subr.bf16.mxu1 %v6839_v44  ;;  %v5564_v12 = vpack.c.bf16 %v6658_v31, %v6659_v43  ;;  %v6674_v31 = vand.u32 4294901760, %v5572_v40  ;;  %v5585_v43 = vpack.c.bf16 %v6664_v34, %v6665_v6  ;;  %v6680_v6 = vand.u32 4294901760, %v5595_v7 }
  0xff   :  { %1776 = vmatprep.mubr.f32.mxu0 %v6861_v41  ;;  %4169 = vmatpush1.bf16.msra.mxu0 %v5433_v48  ;;  %6970 = vst [vmem:[#allocation20_spill] sm:$0xff] %v5593_v56  ;;  %v6684_v19 = vand.u32 4294901760, %v5610_v13  ;;  %v6987_v48 = vand.u32 4294901760, %v5450_v14  ;;  %v6988_v41 = vand.u32 4294901760, %v5452_v16 }
 0x100   :  { %4171 = vmatprep.subr.bf16.mxu0 %v5465_v62  ;;  %6968 = vst [vmem:[#allocation15_spill] sm:$0xff] %v5564_v12  ;;  %6969 = vst [vmem:[#allocation18_spill] sm:$0xff] %v5585_v43  ;;  %v5604_v34 = vpack.c.bf16 %v6673_v60, %v6674_v31  ;;  %v6693_v60 = vand.u32 4294901760, %v5612_v58  ;;  %v5625_v31 = vpack.c.bf16 %v6679_v37, %v6680_v6  ;;  %v1728_v6 = vand.u32 4294901760, %v5635_v57 }
 0x101   :  { %4363 = vmatpush3.bf16.msra.mxu1 %v5484_v53  ;;  %v5633_v47 = vpack.c.bf16 %v6684_v19, %v6685_v39  ;;  %v5650_v19 = vld [vmem:[#allocation5 + $0x2b8] sm:$0xff]  ;;  %v5652_v39 = vld [vmem:[#allocation5 + $0x2b0] sm:$0xff]  ;;  %v6979_v53 = vand.u32 4294901760, %v5413_v32  ;;  %v5715_v54 = vsub.f32 %v5450_v14, %v6987_v48 }
 0x102   :  { %4364 = vmatprep.subr.bf16.mxu1 %v6839_v44  ;;  %6971 = vst [vmem:[#allocation21_spill] sm:$0xff] %v5604_v34  ;;  %6972 = vst [vmem:[#allocation22_spill] sm:$0xff] %v5625_v31  ;;  %v5644_v37 = vpack.c.bf16 %v6692_v50, %v6693_v60  ;;  %v2572_v50 = vand.u32 4294901760, %v5652_v39  ;;  %v6975_v60 = vand.u32 4294901760, %v5405_v61 }
 0x103   :  { %4173 = vmatpush1.bf16.msra.mxu0 %v5473_v51  ;;  %6973 = vst [vmem:[#allocation23_spill] sm:$0xff] %v5633_v47  ;;  %v1657_v51 = vld [vmem:[#allocation5 + $0x2d8] sm:$0xff] }
 0x104   :  { %4175 = vmatprep.subr.bf16.mxu0 %v5505_v28  ;;  %6974 = vst [vmem:[#allocation24_spill] sm:$0xff] %v5644_v37 }
 0x105   :  { %4366 = vmatpush3.bf16.msra.mxu1 %v5524_v26 }
 0x106   :  { %4367 = vmatprep.subr.bf16.mxu1 %v6839_v44 }
 0x107   :  { %4177 = vmatpush1.bf16.msra.mxu0 %v5513_v46  ;;  %v6978_v46 = vand.u32 4294901760, %v5411_v59 }
 0x108   :  { %4179 = vmatprep.subr.bf16.mxu0 %v5545_v52 }
 0x109   :  { %4369 = vmatpush3.bf16.msra.mxu1 %v5564_v12  ;;  %v5661_v12 = vsub.f32 %v5405_v61, %v6975_v60  ;;  %v5674_v28 = vsub.f32 %v5411_v59, %v6978_v46  ;;  %v5679_v61 = vsub.f32 %v5413_v32, %v6979_v53  ;;  %v6980_v60 = vand.u32 4294901760, %v5415_v8  ;;  %v1660_v59 = vld [vmem:[#allocation5 + $0x2f0] sm:$0xff] }
 0x10a   :  { %4370 = vmatprep.subr.bf16.mxu1 %v6839_v44  ;;  %v1736_v53 = vand.u32 4294901760, %v1657_v51  ;;  %v1740_v62 = vand.u32 4294901760, %v1660_v59 }
 0x10b   :  { %4181 = vmatpush1.bf16.msra.mxu0 %v5553_v49  ;;  %v6976_v49 = vand.u32 4294901760, %v5407_v24 }
 0x10c   :  { %4183 = vmatprep.subr.bf16.mxu0 %v5585_v43  ;;  %v1655_v43 = vld [vmem:[#allocation5 + $0x2c8] sm:$0xff] }
 0x10d   :  { %4372 = vmatpush3.bf16.msra.mxu1 %v5604_v34  ;;  %v5648_v34 = vld [vmem:[#allocation5 + $0x2a0] sm:$0xff]  ;;  %v5666_v52 = vsub.f32 %v5407_v24, %v6976_v49  ;;  %v2575_v26 = vand.u32 4294901760, %v1655_v43  ;;  %v5684_v24 = vsub.f32 %v5415_v8, %v6980_v60  ;;  %v6981_v49 = vand.u32 4294901760, %v5419_v42 }
 0x10e   :  { %4373 = vmatprep.subr.bf16.mxu1 %v6839_v44  ;;  %v6984_v8 = vand.u32 4294901760, %v5435_v27 }
 0x10f   :  { %4185 = vmatpush1.bf16.msra.mxu0 %v5593_v56  ;;  %v1734_v56 = vand.u32 4294901760, %v5650_v19  ;;  %v5695_v32 = vpack.c.bf16 %v2575_v26, %v2572_v50 }
 0x110   :  { %4187 = vmatprep.subr.bf16.mxu0 %v5625_v31  ;;  %v1730_v31 = vand.u32 4294901760, %v5648_v34  ;;  %v5700_v60 = vsub.f32 %v5435_v27, %v6984_v8  ;;  %v5720_v27 = vsub.f32 %v5452_v16, %v6988_v41  ;;  %v6989_v8 = vand.u32 4294901760, %v5457_v38 }
 0x111   :  { %4375 = vmatpush3.bf16.msra.mxu1 %v5644_v37  ;;  %v5689_v37 = vsub.f32 %v5419_v42, %v6981_v49  ;;  %6983 = vst [vmem:[#allocation27_spill] sm:$0xff] %v5695_v32  ;;  %v6985_v42 = vand.u32 4294901760, %v5437_v20  ;;  %v6992_v41 = vand.u32 4294901760, %v5488_v3  ;;  %v6993_v16 = vand.u32 4294901760, %v5490_v5 }
 0x112   :  { %4376 = vmatprep.subr.bf16.mxu1 %v6839_v44  ;;  %v5693_v46 = vpack.c.bf16 %v1734_v56, %v1730_v31 }
 0x113   :  { %4189 = vmatpush1.bf16.msra.mxu0 %v5633_v47  ;;  %v5669_v47 = vpack.c.bf16 %v1732_v1, %v1728_v6  ;;  %v5705_v49 = vsub.f32 %v5437_v20, %v6985_v42  ;;  %v5725_v20 = vsub.f32 %v5457_v38, %v6989_v8  ;;  %v6990_v42 = vand.u32 4294901760, %v5475_v0 }
 0x114   :  { %6982 = vst [vmem:[#allocation26_spill] sm:$0xff] %v5693_v46  ;;  %v5741_v14 = vsub.f32 %v5488_v3, %v6992_v41  ;;  %v5746_v38 = vsub.f32 %v5490_v5, %v6993_v16  ;;  %v6996_v3 = vand.u32 4294901760, %v5515_v55  ;;  %v6997_v5 = vand.u32 4294901760, %v5517_v9 }
 0x115   :  { %6977 = vst [vmem:[#allocation25_spill] sm:$0xff] %v5669_v47  ;;  %4191 = vmatprep.subr.bf16.mxu0 %v5669_v47  ;;  %v5710_v47 = vsub.f32 %v5448_v10, %v6986_v11  ;;  %v5730_v11 = vsub.f32 %v5475_v0, %v6990_v42  ;;  %v6991_v10 = vand.u32 4294901760, %v5477_v17  ;;  %v6994_v0 = vand.u32 4294901760, %v5492_v30  ;;  %4378 = vmatpush3.bf16.msra.mxu1 %v5695_v32 }
 0x116   :  { %v5767_v41 = vsub.f32 %v5517_v9, %v6997_v5  ;;  %4379 = vmatprep.subr.bf16.mxu1 %v6839_v44  ;;  %v7001_v9 = vand.u32 4294901760, %v5537_v25  ;;  %v7012_v32 = vand.u32 4294901760, %v5612_v58 }
 0x117   :  { %v5735_v48 = vsub.f32 %v5477_v17, %v6991_v10  ;;  %4193 = vmatpush1.bf16.msra.mxu0 %v5693_v46  ;;  %v5751_v8 = vsub.f32 %v5492_v30, %v6994_v0  ;;  %v6995_v17 = vand.u32 4294901760, %v5497_v35  ;;  %v5762_v10 = vsub.f32 %v5515_v55, %v6996_v3 }
 0x118   :  { %v6998_v30 = vand.u32 4294901760, %v5528_v15  ;;  %v7000_v55 = vand.u32 4294901760, %v5532_v18  ;;  %v5788_v3 = vsub.f32 %v5537_v25, %v7001_v9  ;;  %v7006_v9 = vand.u32 4294901760, %v5572_v40 }
 0x119   :  { %v5756_v42 = vsub.f32 %v5497_v35, %v6995_v17  ;;  %v6999_v35 = vand.u32 4294901760, %v5530_v2  ;;  %v5857_v46 = vsub.f32 %v5648_v34, %v1730_v31  ;;  %v6733_v34 = vand.u32 4294901760, %v5661_v12 }
 0x11a   :  { %v5772_v16 = vsub.f32 %v5528_v15, %v6998_v30  ;;  %v5783_v17 = vsub.f32 %v5532_v18, %v7000_v55  ;;  %v7002_v15 = vand.u32 4294901760, %v5555_v29  ;;  %v7005_v55 = vand.u32 4294901760, %v5570_v23 }
 0x11b   :  { %v5777_v0 = vsub.f32 %v5530_v2, %v6999_v35  ;;  %v7003_v2 = vand.u32 4294901760, %v5557_v45  ;;  %v7004_v35 = vand.u32 4294901760, %v5568_v4  ;;  %7018 = vst [vmem:[#allocation32_spill] sm:$0xff] %v5857_v46 }
 0x11c   :  { %v5793_v5 = vsub.f32 %v5555_v29, %v7002_v15  ;;  %v5808_v25 = vsub.f32 %v5570_v23, %v7005_v55  ;;  %v5813_v29 = vsub.f32 %v5572_v40, %v7006_v9  ;;  %v7007_v15 = vand.u32 4294901760, %v5577_v33 }
 0x11d   :  { %v5798_v30 = vsub.f32 %v5557_v45, %v7003_v2  ;;  %v5803_v18 = vsub.f32 %v5568_v4, %v7004_v35  ;;  %v7008_v2 = vand.u32 4294901760, %v5595_v7  ;;  %v7009_v35 = vand.u32 4294901760, %v5597_v36 }
 0x11e   :  { %v5818_v45 = vsub.f32 %v5577_v33, %v7007_v15  ;;  %v7010_v55 = vand.u32 4294901760, %v5608_v21  ;;  %v7011_v9 = vand.u32 4294901760, %v5610_v13  ;;  %v1656_v15 = vld [vmem:[#allocation5 + $0x2d0] sm:$0xff] }
 0x11f   :  { %v5823_v4 = vsub.f32 %v5595_v7, %v7008_v2  ;;  %v5828_v23 = vsub.f32 %v5597_v36, %v7009_v35  ;;  %v5843_v7 = vsub.f32 %v5612_v58, %v7012_v32  ;;  %v7014_v2 = vand.u32 4294901760, %v5617_v63 }
 0x120   :  { %v5833_v40 = vsub.f32 %v5608_v21, %v7010_v55  ;;  %v5838_v33 = vsub.f32 %v5610_v13, %v7011_v9  ;;  %v5851_v35 = vsub.f32 %v5635_v57, %v1728_v6  ;;  %v5854_v21 = vsub.f32 %v5637_v22, %v1732_v1  ;;  %v1659_v55 = vld [vmem:[#allocation5 + $0x2e8] sm:$0xff]  ;;  %v1658_v13 = vld [vmem:[#allocation5 + $0x2e0] sm:$0xff]  ;;  %v1661_v9 = vld [vmem:[#allocation5 + $0x2f8] sm:$0xff] }
 0x121   :  { %7013 = vst [vmem:[#allocation28_spill] sm:$0xff] %v5843_v7  ;;  %v5848_v36 = vsub.f32 %v5617_v63, %v7014_v2  ;;  %v5860_v58 = vsub.f32 %v5650_v19, %v1734_v56  ;;  %v5863_v32 = vsub.f32 %v5652_v39, %v2572_v50  ;;  %v5865_v63 = vsub.f32 %v1655_v43, %v2575_v26 }
 0x122   :  { %7016 = vst [vmem:[#allocation30_spill] sm:$0xff] %v5851_v35  ;;  %7017 = vst [vmem:[#allocation31_spill] sm:$0xff] %v5854_v21  ;;  %v5867_v2 = vpack.c.bf16 %v1740_v62, %v1736_v53  ;;  %v5869_v57 = vsub.f32 %v1657_v51, %v1736_v53  ;;  %v5871_v1 = vsub.f32 %v1660_v59, %v1740_v62  ;;  %v1738_v22 = vand.u32 4294901760, %v1656_v15 }
 0x123   :  { %7015 = vst [vmem:[#allocation29_spill] sm:$0xff] %v5848_v36  ;;  %7019 = vst [vmem:[#allocation34_spill] sm:$0xff] %v5860_v58  ;;  %v1742_v6 = vand.u32 4294901760, %v1659_v55  ;;  %v2578_v21 = vand.u32 4294901760, %v1658_v13  ;;  %v2581_v35 = vand.u32 4294901760, %v1661_v9  ;;  %v6732_v50 = vand.u32 4294901760, %v5666_v52 }
 0x124   :  { %7020 = vst [vmem:[#allocation35_spill] sm:$0xff] %v5863_v32  ;;  %7021 = vst [vmem:[#allocation36_spill] sm:$0xff] %v5865_v63  ;;  %4195 = vmatprep.subr.bf16.mxu0 %v5867_v2  ;;  %v5875_v19 = vsub.f32 %v1656_v15, %v1738_v22  ;;  %v6731_v39 = vand.u32 4294901760, %v5674_v28  ;;  %v6734_v56 = vand.u32 4294901760, %v5679_v61  ;;  %v1791_v59 = vsub.f32 %v5661_v12, %v6733_v34 }
 0x125   :  { %7022 = vst [vmem:[#allocation38_spill] sm:$0xff] %v5867_v2  ;;  %7023 = vst [vmem:[#allocation39_spill] sm:$0xff] %v5869_v57  ;;  %v5880_v51 = vpack.c.bf16 %v1742_v6, %v1738_v22  ;;  %v5882_v62 = vsub.f32 %v1659_v55, %v1742_v6  ;;  %v5884_v26 = vpack.c.bf16 %v2581_v35, %v2578_v21  ;;  %v6743_v55 = vand.u32 4294901760, %v5689_v37 }
 0x126   :  { %7024 = vst [vmem:[#allocation41_spill] sm:$0xff] %v5871_v1  ;;  %7025 = vst [vmem:[#allocation44_spill] sm:$0xff] %v5875_v19  ;;  %v5886_v43 = vsub.f32 %v1658_v13, %v2578_v21  ;;  %v5888_v31 = vsub.f32 %v1661_v9, %v2581_v35  ;;  %v1803_v53 = vsub.f32 %v5666_v52, %v6732_v50  ;;  %v6739_v21 = vand.u32 4294901760, %v5684_v24 }
 0x127   :  { %7026 = vst [vmem:[#allocation49_spill] sm:$0xff] %v5880_v51  ;;  %7027 = vst [vmem:[#allocation33_spill] sm:$0xff] %v5882_v62  ;;  %v1797_v15 = vsub.f32 %v5674_v28, %v6731_v39  ;;  %4197 = vmatpush1.bf16.msra.mxu0 %v5880_v51  ;;  %4381 = vmatpush3.bf16.msra.mxu1 %v5884_v26  ;;  %v1809_v35 = vsub.f32 %v5679_v61, %v6734_v56  ;;  %v6744_v13 = vand.u32 4294901760, %v5700_v60 }
 0x128   :  { %7028 = vst [vmem:[#allocation37_spill] sm:$0xff] %v5884_v26  ;;  %7029 = vst [vmem:[#allocation12_spill] sm:$0xff] %v5886_v43  ;;  %v1792_v9 = vand.u32 4294901760, %v1791_v59  ;;  %v1804_v22 = vand.u32 4294901760, %v1803_v53  ;;  %4382 = vmatprep.subr.bf16.mxu1 %v6839_v44  ;;  %v6745_v39 = vand.u32 4294901760, %v5705_v49  ;;  %v2630_v34 = vsub.f32 %v5684_v24, %v6739_v21 }
 0x129   :  { %7030 = vst [vmem:[#allocation14_spill] sm:$0xff] %v5888_v31  ;;  %v1798_v6 = vand.u32 4294901760, %v1797_v15  ;;  %v1810_v50 = vand.u32 4294901760, %v1809_v35  ;;  %v2637_v56 = vsub.f32 %v5689_v37, %v6743_v55  ;;  %v1815_v26 = vsub.f32 %v5700_v60, %v6744_v13 }
 0x12a   :  { %v4198_v59 = vpack.c.bf16 %v1804_v22, %v1792_v9  ;;  %v1827_v53 = vsub.f32 %v5705_v49, %v6745_v39  ;;  %v6748_v15 = vand.u32 4294901760, %v5710_v47  ;;  %v6746_v35 = vand.u32 4294901760, %v5715_v54 }
 0x12b   :  { %v5923_v51 = vpack.c.bf16 %v1810_v50, %v1798_v6  ;;  %v2631_v21 = vand.u32 4294901760, %v2630_v34  ;;  %v2638_v2 = vand.u32 4294901760, %v2637_v56  ;;  %v1816_v44 = vand.u32 4294901760, %v1815_v26 }
 0x12c   :  { %4199 = vmatprep.subr.bf16.mxu0 %v4198_v59  ;;  %v1828_v55 = vand.u32 4294901760, %v1827_v53  ;;  %v1821_v13 = vsub.f32 %v5710_v47, %v6748_v15  ;;  %v1833_v9 = vsub.f32 %v5715_v54, %v6746_v35  ;;  %v6747_v22 = vand.u32 4294901760, %v5720_v27 }
 0x12d   :  { %7031 = vst [vmem:[#allocation46_spill] sm:$0xff] %v5923_v51  ;;  %v5932_v39 = vpack.c.bf16 %v2638_v2, %v2631_v21  ;;  %v6749_v50 = vand.u32 4294901760, %v5725_v20  ;;  %v6750_v34 = vand.u32 4294901760, %v5730_v11  ;;  %v6751_v56 = vand.u32 4294901760, %v5735_v48 }
 0x12e   :  { %v5937_v26 = vpack.c.bf16 %v1828_v55, %v1816_v44  ;;  %v1822_v6 = vand.u32 4294901760, %v1821_v13  ;;  %v1834_v59 = vand.u32 4294901760, %v1833_v9  ;;  %v2644_v53 = vsub.f32 %v5720_v27, %v6747_v22 }
 0x12f   :  { %7032 = vst [vmem:[#allocation50_spill] sm:$0xff] %v5932_v39  ;;  %v2651_v35 = vsub.f32 %v5725_v20, %v6749_v50  ;;  %v1839_v2 = vsub.f32 %v5730_v11, %v6750_v34  ;;  %v1851_v21 = vsub.f32 %v5735_v48, %v6751_v56  ;;  %v6752_v44 = vand.u32 4294901760, %v5741_v14 }
 0x130   :  { %7033 = vst [vmem:[#allocation51_spill] sm:$0xff] %v5937_v26  ;;  %v5952_v55 = vpack.c.bf16 %v1834_v59, %v1822_v6  ;;  %v2645_v13 = vand.u32 4294901760, %v2644_v53  ;;  %v6753_v9 = vand.u32 4294901760, %v5746_v38  ;;  %v6754_v22 = vand.u32 4294901760, %v5751_v8 }
 0x131   :  { %v2652_v15 = vand.u32 4294901760, %v2651_v35  ;;  %v1840_v26 = vand.u32 4294901760, %v1839_v2  ;;  %v1852_v50 = vand.u32 4294901760, %v1851_v21  ;;  %v1845_v34 = vsub.f32 %v5741_v14, %v6752_v44 }
 0x132   :  { %7034 = vst [vmem:[#allocation52_spill] sm:$0xff] %v5952_v55  ;;  %v1857_v56 = vsub.f32 %v5746_v38, %v6753_v9  ;;  %v2658_v6 = vsub.f32 %v5751_v8, %v6754_v22  ;;  %v6755_v59 = vand.u32 4294901760, %v5756_v42  ;;  %v6756_v53 = vand.u32 4294901760, %v5762_v10 }
 0x133   :  { %v5967_v55 = vpack.c.bf16 %v2652_v15, %v2645_v13  ;;  %v5969_v35 = vpack.c.bf16 %v1852_v50, %v1840_v26  ;;  %v1846_v2 = vand.u32 4294901760, %v1845_v34  ;;  %v6757_v21 = vand.u32 4294901760, %v5767_v41 }
 0x134   :  { %v1858_v44 = vand.u32 4294901760, %v1857_v56  ;;  %v2659_v39 = vand.u32 4294901760, %v2658_v6  ;;  %v2665_v9 = vsub.f32 %v5756_v42, %v6755_v59  ;;  %v1863_v22 = vsub.f32 %v5762_v10, %v6756_v53 }
 0x135   :  { %7035 = vst [vmem:[#allocation53_spill] sm:$0xff] %v5967_v55  ;;  %7036 = vst [vmem:[#allocation54_spill] sm:$0xff] %v5969_v35  ;;  %v1875_v15 = vsub.f32 %v5767_v41, %v6757_v21  ;;  %v6758_v50 = vand.u32 4294901760, %v5772_v16  ;;  %v6759_v34 = vand.u32 4294901760, %v5777_v0  ;;  %v6760_v26 = vand.u32 4294901760, %v5783_v17 }
 0x136   :  { %v5984_v56 = vpack.c.bf16 %v1858_v44, %v1846_v2  ;;  %v2666_v13 = vand.u32 4294901760, %v2665_v9  ;;  %v1864_v6 = vand.u32 4294901760, %v1863_v22  ;;  %v6761_v59 = vand.u32 4294901760, %v5788_v3 }
 0x137   :  { %v1876_v35 = vand.u32 4294901760, %v1875_v15  ;;  %v1869_v53 = vsub.f32 %v5772_v16, %v6758_v50  ;;  %v1881_v21 = vsub.f32 %v5777_v0, %v6759_v34  ;;  %v2672_v55 = vsub.f32 %v5783_v17, %v6760_v26 }
 0x138   :  { %7037 = vst [vmem:[#allocation55_spill] sm:$0xff] %v5984_v56  ;;  %v5996_v51 = vpack.c.bf16 %v2666_v13, %v2659_v39  ;;  %v2679_v22 = vsub.f32 %v5788_v3, %v6761_v59  ;;  %v6764_v44 = vand.u32 4294901760, %v5793_v5  ;;  %v6762_v9 = vand.u32 4294901760, %v5798_v30 }
 0x139   :  { %v6003_v2 = vpack.c.bf16 %v1876_v35, %v1864_v6  ;;  %v1870_v15 = vand.u32 4294901760, %v1869_v53  ;;  %v1882_v50 = vand.u32 4294901760, %v1881_v21  ;;  %v2673_v56 = vand.u32 4294901760, %v2672_v55 }
 0x13a   :  { %7038 = vst [vmem:[#allocation56_spill] sm:$0xff] %v5996_v51  ;;  %v2680_v34 = vand.u32 4294901760, %v2679_v22  ;;  %v1887_v26 = vsub.f32 %v5793_v5, %v6764_v44  ;;  %v1899_v39 = vsub.f32 %v5798_v30, %v6762_v9  ;;  %v6763_v13 = vand.u32 4294901760, %v5803_v18 }
 0x13b   :  { %7039 = vst [vmem:[#allocation57_spill] sm:$0xff] %v6003_v2  ;;  %v6012_v59 = vpack.c.bf16 %v1882_v50, %v1870_v15  ;;  %v6765_v51 = vand.u32 4294901760, %v5808_v25  ;;  %v6766_v35 = vand.u32 4294901760, %v5813_v29  ;;  %v6767_v53 = vand.u32 4294901760, %v5818_v45 }
 0x13c   :  { %v6017_v55 = vpack.c.bf16 %v2680_v34, %v2673_v56  ;;  %v1888_v21 = vand.u32 4294901760, %v1887_v26  ;;  %v1900_v6 = vand.u32 4294901760, %v1899_v39  ;;  %v1893_v22 = vsub.f32 %v5803_v18, %v6763_v13 }
 0x13d   :  { %7040 = vst [vmem:[#allocation58_spill] sm:$0xff] %v6012_v59  ;;  %v1905_v9 = vsub.f32 %v5808_v25, %v6765_v51  ;;  %v2686_v50 = vsub.f32 %v5813_v29, %v6766_v35  ;;  %v2693_v15 = vsub.f32 %v5818_v45, %v6767_v53  ;;  %v6768_v34 = vand.u32 4294901760, %v5823_v4 }
 0x13e   :  { %7041 = vst [vmem:[#allocation59_spill] sm:$0xff] %v6017_v55  ;;  %v6032_v26 = vpack.c.bf16 %v1900_v6, %v1888_v21  ;;  %v1894_v56 = vand.u32 4294901760, %v1893_v22  ;;  %v6769_v39 = vand.u32 4294901760, %v5828_v23  ;;  %v6770_v13 = vand.u32 4294901760, %v5833_v40 }
 0x13f   :  { %v1906_v44 = vand.u32 4294901760, %v1905_v9  ;;  %v2687_v55 = vand.u32 4294901760, %v2686_v50  ;;  %v2694_v51 = vand.u32 4294901760, %v2693_v15  ;;  %v1911_v35 = vsub.f32 %v5823_v4, %v6768_v34 }
 0x140   :  { %7042 = vst [vmem:[#allocation60_spill] sm:$0xff] %v6032_v26  ;;  %v1923_v53 = vsub.f32 %v5828_v23, %v6769_v39  ;;  %v1917_v21 = vsub.f32 %v5833_v40, %v6770_v13  ;;  %v6771_v6 = vand.u32 4294901760, %v5838_v33  ;;  %v6772_v22 = vand.u32 4294901760, %v5843_v7 }
 0x141   :  { %v6047_v26 = vpack.c.bf16 %v1906_v44, %v1894_v56  ;;  %v6049_v9 = vpack.c.bf16 %v2694_v51, %v2687_v55  ;;  %v1912_v50 = vand.u32 4294901760, %v1911_v35  ;;  %v6773_v15 = vand.u32 4294901760, %v5848_v36  ;;  %v7045_v56 = vld [vmem:[#allocation30_spill] sm:$0xff]  ;;  %v7046_v55 = vld [vmem:[#allocation31_spill] sm:$0xff] }
 0x142   :  { %v1924_v34 = vand.u32 4294901760, %v1923_v53  ;;  %v1918_v59 = vand.u32 4294901760, %v1917_v21  ;;  %v1929_v39 = vsub.f32 %v5838_v33, %v6771_v6  ;;  %v2700_v13 = vsub.f32 %v5843_v7, %v6772_v22 }
 0x143   :  { %7043 = vst [vmem:[#allocation61_spill] sm:$0xff] %v6047_v26  ;;  %7044 = vst [vmem:[#allocation62_spill] sm:$0xff] %v6049_v9  ;;  %v2707_v44 = vsub.f32 %v5848_v36, %v6773_v15  ;;  %v6778_v51 = vand.u32 4294901760, %v7045_v56  ;;  %v6779_v35 = vand.u32 4294901760, %v7046_v55  ;;  %v6780_v9 = vand.u32 4294901760, %v5857_v46 }
 0x144   :  { %v6064_v53 = vpack.c.bf16 %v1924_v34, %v1912_v50  ;;  %v1930_v21 = vand.u32 4294901760, %v1929_v39  ;;  %v2701_v26 = vand.u32 4294901760, %v2700_v13  ;;  %v6781_v6 = vand.u32 4294901760, %v5860_v58 }
 0x145   :  { %v2708_v2 = vand.u32 4294901760, %v2707_v44  ;;  %v1935_v22 = vsub.f32 %v7045_v56, %v6778_v51  ;;  %v1947_v15 = vsub.f32 %v7046_v55, %v6779_v35  ;;  %v1941_v36 = vsub.f32 %v5857_v46, %v6780_v9 }
 0x146   :  { %7047 = vst [vmem:[#allocation63_spill] sm:$0xff] %v6064_v53  ;;  %v6076_v7 = vpack.c.bf16 %v1930_v21, %v1918_v59  ;;  %v1953_v13 = vsub.f32 %v5860_v58, %v6781_v6  ;;  %v6784_v34 = vand.u32 4294901760, %v5863_v32  ;;  %v6782_v39 = vand.u32 4294901760, %v5865_v63 }
 0x147   :  { %v6083_v50 = vpack.c.bf16 %v2708_v2, %v2701_v26  ;;  %v1936_v44 = vand.u32 4294901760, %v1935_v22  ;;  %v1948_v51 = vand.u32 4294901760, %v1947_v15  ;;  %v1942_v53 = vand.u32 4294901760, %v1941_v36 }
 0x148   :  { %7048 = vst [vmem:[#allocation64_spill] sm:$0xff] %v6076_v7  ;;  %v1954_v35 = vand.u32 4294901760, %v1953_v13  ;;  %v2714_v9 = vsub.f32 %v5863_v32, %v6784_v34  ;;  %v2721_v59 = vsub.f32 %v5865_v63, %v6782_v39  ;;  %v6783_v21 = vand.u32 4294901760, %v5869_v57 }
 0x149   :  { %v6092_v6 = vpack.c.bf16 %v1948_v51, %v1936_v44  ;;  %v6785_v7 = vand.u32 4294901760, %v5871_v1  ;;  %v6786_v2 = vand.u32 4294901760, %v5875_v19  ;;  %v6787_v26 = vand.u32 4294901760, %v5882_v62 }
 0x14a   :  { %v6097_v36 = vpack.c.bf16 %v1954_v35, %v1942_v53  ;;  %v2715_v22 = vand.u32 4294901760, %v2714_v9  ;;  %v2722_v15 = vand.u32 4294901760, %v2721_v59  ;;  %v1959_v13 = vsub.f32 %v5869_v57, %v6783_v21 }
 0x14b   :  { %v1971_v39 = vsub.f32 %v5871_v1, %v6785_v7  ;;  %v1965_v51 = vsub.f32 %v5875_v19, %v6786_v2  ;;  %v1977_v44 = vsub.f32 %v5882_v62, %v6787_v26  ;;  %v6788_v35 = vand.u32 4294901760, %v5886_v43 }
 0x14c   :  { %7049 = vst [vmem:[#allocation65_spill] sm:$0xff] %v6097_v36  ;;  %v6112_v9 = vpack.c.bf16 %v2722_v15, %v2715_v22  ;;  %v1960_v53 = vand.u32 4294901760, %v1959_v13  ;;  %v6789_v59 = vand.u32 4294901760, %v5888_v31  ;;  %v7050_v22 = vld [vmem:[#allocation28_spill] sm:$0xff] }
 0x14d   :  { %v1972_v34 = vand.u32 4294901760, %v1971_v39  ;;  %v1966_v7 = vand.u32 4294901760, %v1965_v51  ;;  %v1978_v36 = vand.u32 4294901760, %v1977_v44  ;;  %v2728_v2 = vsub.f32 %v5886_v43, %v6788_v35 }
 0x14e   :  { %v2735_v26 = vsub.f32 %v5888_v31, %v6789_v59  ;;  %v7051_v59 = vld [vmem:[#allocation29_spill] sm:$0xff] }
 0x14f   :  { %v6129_v39 = vpack.c.bf16 %v1972_v34, %v1960_v53  ;;  %v6131_v51 = vpack.c.bf16 %v1978_v36, %v1966_v7  ;;  %v2729_v44 = vand.u32 4294901760, %v2728_v2  ;;  %v92_v53 = vlaneseq }
 0x150   :  { %v2736_v21 = vand.u32 4294901760, %v2735_v26 }
 0x151   :  { %v6175_v26 = vshrl.u32 %v92_v53, 7 }
 0x152   :  { %v6149_v36 = vpack.c.bf16 %v2736_v21, %v2729_v44  ;;  %v90_v44 = vld [vmem:[%s6525_s2] sm:$0x7] }
 0x153   :  { %7052 = vst [vmem:[#allocation28_spill] sm:$0xff] %v6175_v26  ;;  %v6810_v21 = vsub.s32 0, %v6175_v26  ;;  %v6813_v15 = vsub.s32 1, %v6175_v26  ;;  %v6814_v35 = vsub.s32 2, %v6175_v26  ;;  %v7119_v26 = vld [vmem:[#allocation15_spill] sm:$0xff] }
 0x155   :  { %v95_v7 = vrot.slane %v90_v44, %v6810_v21  ;;  %v99_v2 = vrot.slane %v90_v44, %v6813_v15  ;;  %v103_v53 = vrot.slane %v90_v44, %v6814_v35  ;;  %v7065_v44 = vld [vmem:[#allocation59_spill] sm:$0xff]  ;;  %v7118_v35 = vld [vmem:[#allocation13_spill] sm:$0xff] }
 0x1ce   :  { %v1599_v34 = vpop.f32.mrb[0].mxu1 }
 0x1cf   :  { %v3619_v13 = vpop.f32.mrb[1].mxu1  ;;  %v4504_v1 = vadd.f32 %v1599_v34, %v103_v53  ;;  %v7061_v34 = vld [vmem:[#allocation55_spill] sm:$0xff]  ;;  %v7066_v53 = vld [vmem:[#allocation60_spill] sm:$0xff] }
 0x1d1   :  { %v957_v43 = vpop.f32.mrb[0].mxu0 }
 0x1d2   :  { %v4502_v31 = vadd.f32 %v957_v43, %v95_v7  ;;  %v959_v19 = vpop.f32.mrb[1].mxu0  ;;  %v7062_v7 = vld [vmem:[#allocation56_spill] sm:$0xff] }
 0x1d3   :  { %v4503_v62 = vadd.f32 %v959_v19, %v99_v2  ;;  %v7063_v2 = vld [vmem:[#allocation57_spill] sm:$0xff] }
 0x1d4   :  { %v3203_v57 = vmul.f32 -1.442695, %v4502_v31  ;;  %v7059_v31 = vld [vmem:[#allocation53_spill] sm:$0xff] }
 0x1d5   :  { %v1609_v32 = vmax.f32 %v4503_v62, 0.0 }
 0x1d6   :  { %4556 = vpow2.f32 %v3203_v57  ;;  %v7057_v57 = vmov 0.0  }
 0x1d7   :  { %v1610_v63 = vsub.f32 %v1609_v32, %v4504_v1  ;;  %v7053_v32 = vld [vmem:[#allocation46_spill] sm:$0xff] }
 0x1e0   :  { %v4557_v46 = vpop.eup %4556 }
 0x1e1   :  { %v1606_v58 = vadd.f32 1.0, %v4557_v46  ;;  %v7054_v46 = vld [vmem:[#allocation50_spill] sm:$0xff] }
 0x1e3   :  { %4558 = vrcp.f32 %v1606_v58  ;;  %v7055_v58 = vld [vmem:[#allocation51_spill] sm:$0xff] }
 0x1ed   :  { %v4559_v21 = vpop.eup %4558 }
 0x1ee   :  { %v1611_v13 = vmul.f32 %v4559_v21, %v1610_v63  ;;  %v7056_v63 = vmov 0.0|0.0   ;;  %v7064_v21 = vld [vmem:[#allocation58_spill] sm:$0xff] }
 0x1f0   :  { %v1612_v56 = vadd.f32 %v4504_v1, %v1611_v13  ;;  %v7058_v1 = vld [vmem:[#allocation52_spill] sm:$0xff]  ;;  %v7067_v13 = vld [vmem:[#allocation61_spill] sm:$0xff] }
 0x1f2   :  { %v6189_v55 = vand.u32 4294901760, %v1612_v56 }
 0x1f4   :  { %v6192_v15 = vsub.f32 %v1612_v56, %v6189_v55  ;;  %v7060_v56 = vld [vmem:[#allocation54_spill] sm:$0xff] }
 0x1f6   :  { %v6195_v43 = vand.u32 4294901760, %v6192_v15 }
 0x1f8   :  { %v1780_v19 = vsub.f32 %v6192_v15, %v6195_v43 }
 0x1fa   :  { %v1781_v62 = vand.u32 4294901760, %v1780_v19  ;;  %v7068_v19 = vld [vmem:[#allocation62_spill] sm:$0xff] }
 0x1fc   :  { %1782 = vmatmul.mubr.f32.vlgmr.msra.gmra.mrb[2].mxu0 %v1781_v62  ;;  %3653 = vmatmul.mubr.f32.vlgmr.msra.gmra.mrb[2].mxu1 %v1781_v62  ;;  %v7069_v62 = vld [vmem:[#allocation63_spill] sm:$0xff] }
 0x1fd   :  { %4201 = vmatpush1.bf16.msra.mxu0 %v7053_v32  ;;  %4384 = vmatpush3.bf16.msra.mxu1 %v7054_v46  ;;  %v7070_v32 = vld [vmem:[#allocation64_spill] sm:$0xff]  ;;  %v7071_v46 = vld [vmem:[#allocation65_spill] sm:$0xff] }
 0x1fe   :  { %4203 = vmatprep.subr.bf16.mxu0 %v7055_v58  ;;  %4385 = vmatprep.subr.bf16.mxu1 %v7056_v63  ;;  %v7072_v58 = vpack.c.bf16 %v5666_v52, %v5661_v12 }
 0x1ff   :  { %2012 = vmatprep.mubr.f32.mxu0 %v7057_v57  ;;  %3687 = vmatprep.mubr.msk.f32.mxu1 %vm4641_vm0, %v7057_v57 }
 0x201   :  { %4205 = vmatpush1.bf16.msra.mxu0 %v7058_v1  ;;  %4387 = vmatpush3.bf16.msra.mxu1 %v7059_v31  ;;  %v7079_v1 = vpack.c.bf16 %v5746_v38, %v5741_v14  ;;  %v7080_v31 = vpack.c.bf16 %v5756_v42, %v5751_v8 }
 0x202   :  { %4207 = vmatprep.subr.bf16.mxu0 %v7060_v56  ;;  %4388 = vmatprep.subr.bf16.mxu1 %v7056_v63  ;;  %v7081_v56 = vpack.c.bf16 %v5767_v41, %v5762_v10 }
 0x205   :  { %4209 = vmatpush1.bf16.msra.mxu0 %v7061_v34  ;;  %4390 = vmatpush3.bf16.msra.mxu1 %v7062_v7  ;;  %v7082_v34 = vpack.c.bf16 %v5777_v0, %v5772_v16  ;;  %v7083_v7 = vpack.c.bf16 %v5788_v3, %v5783_v17 }
 0x206   :  { %4211 = vmatprep.subr.bf16.mxu0 %v7063_v2  ;;  %4391 = vmatprep.subr.bf16.mxu1 %v7056_v63  ;;  %v7084_v2 = vpack.c.bf16 %v5798_v30, %v5793_v5 }
 0x209   :  { %4213 = vmatpush1.bf16.msra.mxu0 %v7064_v21  ;;  %4393 = vmatpush3.bf16.msra.mxu1 %v7065_v44  ;;  %v7085_v21 = vpack.c.bf16 %v5808_v25, %v5803_v18  ;;  %v7086_v44 = vpack.c.bf16 %v5818_v45, %v5813_v29 }
 0x20a   :  { %4215 = vmatprep.subr.bf16.mxu0 %v7066_v53  ;;  %4394 = vmatprep.subr.bf16.mxu1 %v7056_v63  ;;  %v7087_v53 = vpack.c.bf16 %v5828_v23, %v5823_v4 }
 0x20d   :  { %4217 = vmatpush1.bf16.msra.mxu0 %v7067_v13  ;;  %4396 = vmatpush3.bf16.msra.mxu1 %v7068_v19  ;;  %v7088_v13 = vpack.c.bf16 %v5838_v33, %v5833_v40  ;;  %v7089_v19 = vpack.c.bf16 %v7051_v59, %v7050_v22 }
 0x20e   :  { %4219 = vmatprep.subr.bf16.mxu0 %v7069_v62  ;;  %4397 = vmatprep.subr.bf16.mxu1 %v7056_v63  ;;  %v7090_v62 = vld [vmem:[#allocation31_spill] sm:$0xff] }
 0x211   :  { %4221 = vmatpush1.bf16.msra.mxu0 %v7070_v32  ;;  %4399 = vmatpush3.bf16.msra.mxu1 %v6083_v50  ;;  %v7074_v50 = vpack.c.bf16 %v5689_v37, %v5684_v24  ;;  %v7091_v32 = vld [vmem:[#allocation30_spill] sm:$0xff] }
 0x212   :  { %4223 = vmatprep.subr.bf16.mxu0 %v6092_v6  ;;  %4400 = vmatprep.subr.bf16.mxu1 %v7056_v63  ;;  %v7073_v6 = vpack.c.bf16 %v5679_v61, %v5674_v28 }
 0x215   :  { %4225 = vmatpush1.bf16.msra.mxu0 %v7071_v46  ;;  %4402 = vmatpush3.bf16.msra.mxu1 %v6112_v9  ;;  %v7075_v9 = vpack.c.bf16 %v5705_v49, %v5700_v60  ;;  %v7092_v46 = vpack.c.bf16 %v7090_v62, %v7091_v32 }
 0x216   :  { %4227 = vmatprep.subr.bf16.mxu0 %v6129_v39  ;;  %4403 = vmatprep.subr.bf16.mxu1 %v7056_v63  ;;  %v7076_v39 = vpack.c.bf16 %v5715_v54, %v5710_v47 }
 0x219   :  { %4229 = vmatpush1.bf16.msra.mxu0 %v6131_v51  ;;  %4405 = vmatpush3.bf16.msra.mxu1 %v6149_v36  ;;  %v7077_v51 = vpack.c.bf16 %v5725_v20, %v5720_v27  ;;  %v7078_v36 = vpack.c.bf16 %v5735_v48, %v5730_v11 }
 0x21a   :  { %4231 = vmatprep.subr.bf16.mxu0 %v7072_v58  ;;  %4406 = vmatprep.subr.bf16.mxu1 %v7056_v63  ;;  %v7093_v58 = vld [vmem:[#allocation34_spill] sm:$0xff] }
 0x21c   :  { %2014 = vmatmul.mubr.f32.vlgmr.msra.gmra.mrb[2].mxu0 %v6189_v55  ;;  %3688 = vmatmul.mubr.f32.vlgmr.msra.gmra.mrb[2].mxu1 %v6189_v55 }
 0x21d   :  { %4233 = vmatpush1.bf16.msra.mxu0 %v7073_v6  ;;  %4408 = vmatpush3.bf16.msra.mxu1 %v7074_v50  ;;  %v7094_v6 = vld [vmem:[#allocation32_spill] sm:$0xff] }
 0x21e   :  { %4235 = vmatprep.subr.bf16.mxu0 %v7075_v9  ;;  %4409 = vmatprep.subr.bf16.mxu1 %v7056_v63  ;;  %v7095_v50 = vpack.c.bf16 %v7093_v58, %v7094_v6  ;;  %v7096_v9 = vld [vmem:[#allocation36_spill] sm:$0xff] }
 0x21f   :  { %2148 = vmatprep.mubr.f32.mxu0 %v7057_v57  ;;  %3722 = vmatprep.mubr.msk.f32.mxu1 %vm4641_vm0, %v7057_v57 }
 0x221   :  { %4237 = vmatpush1.bf16.msra.mxu0 %v7076_v39  ;;  %4411 = vmatpush3.bf16.msra.mxu1 %v7077_v51  ;;  %v7097_v39 = vld [vmem:[#allocation35_spill] sm:$0xff] }
 0x222   :  { %4239 = vmatprep.subr.bf16.mxu0 %v7078_v36  ;;  %4412 = vmatprep.subr.bf16.mxu1 %v7056_v63  ;;  %v7098_v51 = vpack.c.bf16 %v7096_v9, %v7097_v39  ;;  %v7099_v36 = vld [vmem:[#allocation41_spill] sm:$0xff] }
 0x225   :  { %4241 = vmatpush1.bf16.msra.mxu0 %v7079_v1  ;;  %4414 = vmatpush3.bf16.msra.mxu1 %v7080_v31  ;;  %v7100_v1 = vld [vmem:[#allocation39_spill] sm:$0xff] }
 0x226   :  { %4243 = vmatprep.subr.bf16.mxu0 %v7081_v56  ;;  %4415 = vmatprep.subr.bf16.mxu1 %v7056_v63  ;;  %v7101_v31 = vpack.c.bf16 %v7099_v36, %v7100_v1  ;;  %v7102_v56 = vld [vmem:[#allocation33_spill] sm:$0xff] }
 0x229   :  { %4245 = vmatpush1.bf16.msra.mxu0 %v7082_v34  ;;  %4417 = vmatpush3.bf16.msra.mxu1 %v7083_v7  ;;  %v7103_v34 = vld [vmem:[#allocation44_spill] sm:$0xff] }
 0x22a   :  { %4247 = vmatprep.subr.bf16.mxu0 %v7084_v2  ;;  %4418 = vmatprep.subr.bf16.mxu1 %v7056_v63  ;;  %v7104_v7 = vpack.c.bf16 %v7102_v56, %v7103_v34  ;;  %v7105_v2 = vld [vmem:[#allocation14_spill] sm:$0xff] }
 0x22d   :  { %4249 = vmatpush1.bf16.msra.mxu0 %v7085_v21  ;;  %4420 = vmatpush3.bf16.msra.mxu1 %v7086_v44  ;;  %v7106_v21 = vld [vmem:[#allocation12_spill] sm:$0xff] }
 0x22e   :  { %4251 = vmatprep.subr.bf16.mxu0 %v7087_v53  ;;  %4421 = vmatprep.subr.bf16.mxu1 %v7056_v63  ;;  %v7107_v44 = vpack.c.bf16 %v7105_v2, %v7106_v21  ;;  %v7108_v53 = vld [vmem:[#allocation16_spill] sm:$0xff] }
 0x231   :  { %4253 = vmatpush1.bf16.msra.mxu0 %v7088_v13  ;;  %4423 = vmatpush3.bf16.msra.mxu1 %v7089_v19  ;;  %v7109_v13 = vld [vmem:[#allocation17_spill] sm:$0xff]  ;;  %v7110_v19 = vld [vmem:[#allocation19_spill] sm:$0xff] }
 0x232   :  { %4255 = vmatprep.subr.bf16.mxu0 %v7092_v46  ;;  %4424 = vmatprep.subr.bf16.mxu1 %v7056_v63  ;;  %v7111_v46 = vld [vmem:[#allocation40_spill] sm:$0xff] }
 0x235   :  { %4257 = vmatpush1.bf16.msra.mxu0 %v7095_v50  ;;  %4426 = vmatpush3.bf16.msra.mxu1 %v7098_v51  ;;  %v7112_v50 = vld [vmem:[#allocation42_spill] sm:$0xff]  ;;  %v7113_v51 = vld [vmem:[#allocation43_spill] sm:$0xff] }
 0x236   :  { %4259 = vmatprep.subr.bf16.mxu0 %v7101_v31  ;;  %4427 = vmatprep.subr.bf16.mxu1 %v7056_v63  ;;  %v7114_v31 = vld [vmem:[#allocation45_spill] sm:$0xff] }
 0x239   :  { %4261 = vmatpush1.bf16.msra.mxu0 %v7104_v7  ;;  %4429 = vmatpush3.bf16.msra.mxu1 %v7107_v44  ;;  %v7116_v7 = vld [vmem:[#allocation48_spill] sm:$0xff]  ;;  %v7117_v44 = vld [vmem:[#allocation11_spill] sm:$0xff] }
 0x23a   :  { %4263 = vmatprep.subr.bf16.mxu0 %v7108_v53  ;;  %4430 = vmatprep.subr.bf16.mxu1 %v7056_v63 }
 0x23c   :  { %2151 = vmatmul.mubr.f32.vlgmr.msra.gmra.mrb[2].mxu0 %v6192_v15  ;;  %3723 = vmatmul.mubr.f32.vlgmr.msra.gmra.mrb[2].mxu1 %v6192_v15  ;;  %v7115_v15 = vld [vmem:[#allocation47_spill] sm:$0xff] }
 0x23d   :  { %4265 = vmatpush1.bf16.msra.mxu0 %v7109_v13  ;;  %4432 = vmatpush3.bf16.msra.mxu1 %v7110_v19  ;;  %v7135_v19 = vand.u32 4294901760, %v5679_v61  ;;  %v7141_v61 = vand.u32 4294901760, %v5715_v54  ;;  %v7147_v54 = vand.u32 4294901760, %v5746_v38  ;;  %v7153_v38 = vand.u32 4294901760, %v5777_v0 }
 0x23e   :  { %4267 = vmatprep.subr.bf16.mxu0 %v7111_v46  ;;  %4433 = vmatprep.subr.bf16.mxu1 %v7056_v63  ;;  %v7120_v46 = vld [vmem:[#allocation18_spill] sm:$0xff]  ;;  %v7159_v0 = vand.u32 4294901760, %v5808_v25  ;;  %v7165_v25 = vand.u32 4294901760, %v5838_v33  ;;  %v7171_v33 = vand.u32 4294901760, %v7093_v58  ;;  %v7177_v58 = vand.u32 4294901760, %v7102_v56  ;;  %v7182_v56 = vld [vmem:[#allocation40_spill] sm:$0xff] }
 0x23f   :  { %2253 = vmatprep.mubr.f32.mxu0 %v7057_v57  ;;  %3757 = vmatprep.mubr.msk.f32.mxu1 %vm4641_vm0, %v7057_v57 }
 0x241   :  { %4269 = vmatpush1.bf16.msra.mxu0 %v7112_v50  ;;  %4435 = vmatpush3.bf16.msra.mxu1 %v7113_v51  ;;  %v7121_v51 = vld [vmem:[#allocation20_spill] sm:$0xff]  ;;  %v7123_v50 = vld [vmem:[#allocation22_spill] sm:$0xff] }
 0x242   :  { %4271 = vmatprep.subr.bf16.mxu0 %v7114_v31  ;;  %4436 = vmatprep.subr.bf16.mxu1 %v7056_v63  ;;  %v7122_v31 = vld [vmem:[#allocation21_spill] sm:$0xff] }
 0x245   :  { %4273 = vmatpush1.bf16.msra.mxu0 %v7115_v15  ;;  %4438 = vmatpush3.bf16.msra.mxu1 %v7116_v7  ;;  %v7124_v7 = vld [vmem:[#allocation23_spill] sm:$0xff]  ;;  %v7126_v15 = vld [vmem:[#allocation25_spill] sm:$0xff] }
 0x246   :  { %4275 = vmatprep.subr.bf16.mxu0 %v7117_v44  ;;  %4439 = vmatprep.subr.bf16.mxu1 %v7056_v63  ;;  %v7125_v44 = vld [vmem:[#allocation24_spill] sm:$0xff] }
 0x249   :  { %4277 = vmatpush1.bf16.msra.mxu0 %v7118_v35  ;;  %4441 = vmatpush3.bf16.msra.mxu1 %v7119_v26  ;;  %v7127_v26 = vld [vmem:[#allocation26_spill] sm:$0xff] }
 0x24a   :  { %4279 = vmatprep.subr.bf16.mxu0 %v7120_v46  ;;  %4442 = vmatprep.subr.bf16.mxu1 %v7056_v63  ;;  %v7128_v46 = vld [vmem:[#allocation27_spill] sm:$0xff]  ;;  %v7129_v35 = vld [vmem:[#allocation38_spill] sm:$0xff] }
 0x24d   :  { %4281 = vmatpush1.bf16.msra.mxu0 %v7121_v51  ;;  %4444 = vmatpush3.bf16.msra.mxu1 %v7122_v31  ;;  %v7131_v31 = vand.u32 4294901760, %v5666_v52  ;;  %v7138_v52 = vand.u32 4294901760, %v5700_v60  ;;  %v7144_v60 = vand.u32 4294901760, %v5730_v11 }
 0x24e   :  { %4283 = vmatprep.subr.bf16.mxu0 %v7123_v50  ;;  %4445 = vmatprep.subr.bf16.mxu1 %v7056_v63  ;;  %v7130_v50 = vand.u32 4294901760, %v5661_v12  ;;  %v7139_v12 = vand.u32 4294901760, %v5705_v49  ;;  %v7145_v49 = vand.u32 4294901760, %v5735_v48  ;;  %v7150_v48 = vand.u32 4294901760, %v5762_v10 }
 0x24f   :  { %v7156_v10 = vand.u32 4294901760, %v5793_v5  ;;  %v7162_v5 = vand.u32 4294901760, %v5823_v4  ;;  %v7168_v4 = vand.u32 4294901760, %v7091_v32  ;;  %v7174_v32 = vand.u32 4294901760, %v7100_v1  ;;  %v7181_v1 = vld [vmem:[#allocation19_spill] sm:$0xff] }
 0x250   :  { %v4294_v51 = vpack.c.bf16 %v7131_v31, %v7130_v50  ;;  %v4298_v50 = vpack.c.bf16 %v7139_v12, %v7138_v52 }
 0x251   :  { %4285 = vmatpush1.bf16.msra.mxu0 %v7124_v7  ;;  %4447 = vmatpush3.bf16.msra.mxu1 %v7125_v44  ;;  %v7132_v7 = vld [vmem:[#allocation49_spill] sm:$0xff] }
 0x252   :  { %4287 = vmatprep.subr.bf16.mxu0 %v7126_v15  ;;  %4448 = vmatprep.subr.bf16.mxu1 %v7056_v63  ;;  %v7133_v44 = vld [vmem:[#allocation37_spill] sm:$0xff]  ;;  %v7134_v15 = vand.u32 4294901760, %v5674_v28  ;;  %v7140_v28 = vand.u32 4294901760, %v5710_v47  ;;  %v7146_v47 = vand.u32 4294901760, %v5741_v14  ;;  %v7152_v14 = vand.u32 4294901760, %v5772_v16 }
 0x253   :  { %v7158_v16 = vand.u32 4294901760, %v5803_v18  ;;  %v7164_v18 = vand.u32 4294901760, %v5833_v40  ;;  %v7170_v40 = vand.u32 4294901760, %v7094_v6  ;;  %v7176_v6 = vand.u32 4294901760, %v7103_v34  ;;  %v7183_v34 = vld [vmem:[#allocation42_spill] sm:$0xff] }
 0x255   :  { %4289 = vmatpush1.bf16.msra.mxu0 %v7127_v26  ;;  %4450 = vmatpush3.bf16.msra.mxu1 %v7128_v46  ;;  %v4296_v26 = vpack.c.bf16 %v7135_v19, %v7134_v15  ;;  %v7136_v46 = vand.u32 4294901760, %v5684_v24  ;;  %v7142_v24 = vand.u32 4294901760, %v5720_v27  ;;  %v4304_v27 = vpack.c.bf16 %v7147_v54, %v7146_v47  ;;  %v7188_v47 = vld [vmem:[#allocation11_spill] sm:$0xff]  ;;  %v7189_v54 = vld [vmem:[#allocation13_spill] sm:$0xff] }
 0x256   :  { %4291 = vmatprep.subr.bf16.mxu0 %v7129_v35  ;;  %4451 = vmatprep.subr.bf16.mxu1 %v7056_v63  ;;  %v7137_v35 = vand.u32 4294901760, %v5689_v37  ;;  %v4300_v37 = vpack.c.bf16 %v7141_v61, %v7140_v28  ;;  %v4312_v52 = vpack.c.bf16 %v7159_v0, %v7158_v16  ;;  %v4316_v28 = vpack.c.bf16 %v7165_v25, %v7164_v18 }
 0x258   :  { %v4455_v13 = vpack.c.bf16 %v7137_v35, %v7136_v46  ;;  %v7143_v35 = vand.u32 4294901760, %v5725_v20  ;;  %v7148_v20 = vand.u32 4294901760, %v5751_v8  ;;  %v7154_v8 = vand.u32 4294901760, %v5783_v17 }
 0x259   :  { %4293 = vmatpush1.bf16.msra.mxu0 %v7132_v7  ;;  %4453 = vmatpush3.bf16.msra.mxu1 %v7133_v44  ;;  %v7160_v17 = vand.u32 4294901760, %v5813_v29  ;;  %v7166_v29 = vand.u32 4294901760, %v7050_v22  ;;  %v7172_v22 = vand.u32 4294901760, %v7097_v39  ;;  %v7178_v39 = vand.u32 4294901760, %v7106_v21  ;;  %v7185_v21 = vld [vmem:[#allocation45_spill] sm:$0xff] }
 0x25a   :  { %4295 = vmatprep.subr.bf16.mxu0 %v4294_v51  ;;  %4454 = vmatprep.subr.bf16.mxu1 %v7056_v63  ;;  %v4458_v19 = vpack.c.bf16 %v7143_v35, %v7142_v24  ;;  %v4308_v51 = vpack.c.bf16 %v7153_v38, %v7152_v14  ;;  %v4320_v24 = vpack.c.bf16 %v7171_v33, %v7170_v40  ;;  %v7198_v14 = vld [vmem:[#allocation26_spill] sm:$0xff]  ;;  %v7199_v38 = vld [vmem:[#allocation27_spill] sm:$0xff] }
 0x25c   :  { %2257 = vmatmul.mubr.f32.vlgmr.msra.gmra.mrb[2].mxu0 %v6195_v43  ;;  %3758 = vmatmul.mubr.f32.vlgmr.msra.gmra.mrb[2].mxu1 %v6195_v43  ;;  %v4302_v43 = vpack.c.bf16 %v7145_v49, %v7144_v60  ;;  %v4324_v60 = vpack.c.bf16 %v7177_v58, %v7176_v6 }
 0x25d   :  { %4297 = vmatpush1.bf16.msra.mxu0 %v4296_v26  ;;  %4456 = vmatpush3.bf16.msra.mxu1 %v4455_v13  ;;  %v7149_v26 = vand.u32 4294901760, %v5756_v42  ;;  %v7151_v13 = vand.u32 4294901760, %v5767_v41  ;;  %v7155_v42 = vand.u32 4294901760, %v5788_v3  ;;  %v7157_v41 = vand.u32 4294901760, %v5798_v30 }
 0x25e   :  { %4299 = vmatprep.subr.bf16.mxu0 %v4298_v50  ;;  %4457 = vmatprep.subr.bf16.mxu1 %v7056_v63  ;;  %v7161_v3 = vand.u32 4294901760, %v5818_v45  ;;  %v7163_v30 = vand.u32 4294901760, %v5828_v23  ;;  %v7167_v45 = vand.u32 4294901760, %v7051_v59  ;;  %v7169_v23 = vand.u32 4294901760, %v7090_v62 }
 0x25f   :  { %2423 = vmatprep.mubr.f32.mxu0 %v7057_v57  ;;  %3792 = vmatprep.mubr.msk.f32.mxu1 %vm4641_vm0, %v7057_v57  ;;  %v4461_v11 = vpack.c.bf16 %v7149_v26, %v7148_v20  ;;  %v4306_v46 = vpack.c.bf16 %v7151_v13, %v7150_v48  ;;  %v4464_v31 = vpack.c.bf16 %v7155_v42, %v7154_v8  ;;  %v7173_v59 = vand.u32 4294901760, %v7096_v9  ;;  %v7192_v20 = vld [vmem:[#allocation20_spill] sm:$0xff]  ;;  %v7193_v26 = vld [vmem:[#allocation21_spill] sm:$0xff]  ;;  %v7195_v48 = vld [vmem:[#allocation23_spill] sm:$0xff] }
 0x260   :  { %v4310_v15 = vpack.c.bf16 %v7157_v41, %v7156_v10  ;;  %v4467_v12 = vpack.c.bf16 %v7161_v3, %v7160_v17  ;;  %v4314_v50 = vpack.c.bf16 %v7163_v30, %v7162_v5  ;;  %v4470_v61 = vpack.c.bf16 %v7167_v45, %v7166_v29  ;;  %v7196_v13 = vld [vmem:[#allocation24_spill] sm:$0xff]  ;;  %v3204_v8 = vld [vmem:[%s6525_s2 + $0x3] sm:$0x7]  ;;  %s4643_s2 = smov [#allocation7]  }
 0x261   :  { %4301 = vmatpush1.bf16.msra.mxu0 %v4300_v37  ;;  %4459 = vmatpush3.bf16.msra.mxu1 %v4458_v19  ;;  %v4318_v37 = vpack.c.bf16 %v7169_v23, %v7168_v4  ;;  %v4473_v35 = vpack.c.bf16 %v7173_v59, %v7172_v22  ;;  %v7175_v62 = vand.u32 4294901760, %v7099_v36  ;;  %v7179_v9 = vand.u32 4294901760, %v7105_v2  ;;  %v7180_v36 = vld [vmem:[#allocation17_spill] sm:$0xff]  ;;  %v7184_v2 = vld [vmem:[#allocation43_spill] sm:$0xff]  ;;  %v7201_v42 = vld [vmem:[#allocation28_spill] sm:$0xff]  ;;  %s3193_s13 = sshll.u32 %s4643_s2, 4  ;;  %s3194_s13 = int_to_ptr.vmem [resolvable:$true] %s3193_s13 }
 0x262   :  { %4303 = vmatprep.subr.bf16.mxu0 %v4302_v43  ;;  %4460 = vmatprep.subr.bf16.mxu1 %v7056_v63  ;;  %v7187_v43 = vld [vmem:[#allocation48_spill] sm:$0xff]  ;;  %v7203_v41 = vsub.s32 1, %v7201_v42  ;;  %s4608_s14 = scalar_lea.vmem %s3194_s13, 128  ;;  %p4613_p3 = scmp.lt.s32.totalorder %s3194_s13, %s3194_s13 }
 0x263   :  { %v4322_v19 = vpack.c.bf16 %v7175_v62, %v7174_v32  ;;  %v4476_v49 = vpack.c.bf16 %v7179_v9, %v7178_v39  ;;  %p4609_p2 = scmp.ne.s32.totalorder %s3194_s13, %s4608_s14  ;;  %p4614_p4 = scmp.lt.s32.totalorder %s4608_s14, %s4608_s14 }
 0x265   :  { %4305 = vmatpush1.bf16.msra.mxu0 %v4304_v27  ;;  %4462 = vmatpush3.bf16.msra.mxu1 %v4461_v11  ;;  %v7190_v27 = vld [vmem:[#allocation15_spill] sm:$0xff]  ;;  %v7194_v11 = vld [vmem:[#allocation22_spill] sm:$0xff]  ;;  %p4615_p5 = por %p4614_p4, %p4613_p3 }
 0x266   :  { %4307 = vmatprep.subr.bf16.mxu0 %v4306_v46  ;;  %4463 = vmatprep.subr.bf16.mxu1 %v7056_v63  ;;  %v7197_v46 = vld [vmem:[#allocation25_spill] sm:$0xff] }
 0x267   :  { %p4616_p6 = pnand %p4615_p5, %p4609_p2 }
 0x269   :  { %4309 = vmatpush1.bf16.msra.mxu0 %v4308_v51  ;;  %4465 = vmatpush3.bf16.msra.mxu1 %v4464_v31  ;;  %v7200_v51 = vld [vmem:[#allocation38_spill] sm:$0xff]  ;;  %v7202_v31 = vsub.s32 0, %v7201_v42 }
 0x26a   :  { %4311 = vmatprep.subr.bf16.mxu0 %v4310_v15  ;;  %4466 = vmatprep.subr.bf16.mxu1 %v7056_v63  ;;  %v1672_v15 = vrot.slane %v3204_v8, %v7203_v41 }
 0x26b   :  { %v1668_v10 = vrot.slane %v3204_v8, %v7202_v31 }
 0x26d   :  { %4313 = vmatpush1.bf16.msra.mxu0 %v4312_v52  ;;  %4468 = vmatpush3.bf16.msra.mxu1 %v4467_v12 }
 0x26e   :  { %4315 = vmatprep.subr.bf16.mxu0 %v4314_v50  ;;  %4469 = vmatprep.subr.bf16.mxu1 %v7056_v63 }
 0x271   :  { %4317 = vmatpush1.bf16.msra.mxu0 %v4316_v28  ;;  %4471 = vmatpush3.bf16.msra.mxu1 %v4470_v61 }
 0x272   :  { %4319 = vmatprep.subr.bf16.mxu0 %v4318_v37  ;;  %4472 = vmatprep.subr.bf16.mxu1 %v7056_v63 }
 0x275   :  { %4321 = vmatpush1.bf16.msra.mxu0 %v4320_v24  ;;  %4474 = vmatpush3.bf16.msra.mxu1 %v4473_v35 }
 0x276   :  { %4323 = vmatprep.subr.bf16.mxu0 %v4322_v19  ;;  %4475 = vmatprep.subr.bf16.mxu1 %v7056_v63 }
 0x279   :  { %4325 = vmatpush1.bf16.msra.mxu0 %v4324_v60  ;;  %4477 = vmatpush3.bf16.msra.mxu1 %v4476_v49 }
 0x27a   :  { %4327 = vmatprep.subr.bf16.mxu0 %v7108_v53  ;;  %4478 = vmatprep.subr.bf16.mxu1 %v7056_v63  ;;  %v7186_v53 = vld [vmem:[#allocation47_spill] sm:$0xff] }
 0x27c   :  { %2425 = vmatmul.mubr.f32.vlgmr.msra.gmra.mrb[2].mxu0 %v6189_v55  ;;  %3793 = vmatmul.mubr.f32.vlgmr.msra.gmra.mrb[2].mxu1 %v6189_v55 }
 0x27d   :  { %4329 = vmatpush1.bf16.msra.mxu0 %v7180_v36  ;;  %4480 = vmatpush3.bf16.msra.mxu1 %v7181_v1 }
 0x27e   :  { %4331 = vmatprep.subr.bf16.mxu0 %v7182_v56  ;;  %4481 = vmatprep.subr.bf16.mxu1 %v7056_v63 }
 0x27f   :  { %2527 = vmatprep.mubr.f32.mxu0 %v7057_v57  ;;  %3827 = vmatprep.mubr.msk.f32.mxu1 %vm4641_vm0, %v7057_v57  ;;  %v7191_v57 = vld [vmem:[#allocation18_spill] sm:$0xff] }
 0x281   :  { %4333 = vmatpush1.bf16.msra.mxu0 %v7183_v34  ;;  %4483 = vmatpush3.bf16.msra.mxu1 %v7184_v2 }
 0x282   :  { %4335 = vmatprep.subr.bf16.mxu0 %v7185_v21  ;;  %4484 = vmatprep.subr.bf16.mxu1 %v7056_v63 }
 0x285   :  { %4337 = vmatpush1.bf16.msra.mxu0 %v7186_v53  ;;  %4486 = vmatpush3.bf16.msra.mxu1 %v7187_v43 }
 0x286   :  { %4339 = vmatprep.subr.bf16.mxu0 %v7188_v47  ;;  %4487 = vmatprep.subr.bf16.mxu1 %v7056_v63 }
 0x289   :  { %4341 = vmatpush1.bf16.msra.mxu0 %v7189_v54  ;;  %4489 = vmatpush3.bf16.msra.mxu1 %v7190_v27 }
 0x28a   :  { %4343 = vmatprep.subr.bf16.mxu0 %v7191_v57  ;;  %4490 = vmatprep.subr.bf16.mxu1 %v7056_v63 }
 0x28d   :  { %4345 = vmatpush1.bf16.msra.mxu0 %v7192_v20  ;;  %4492 = vmatpush3.bf16.msra.mxu1 %v7193_v26 }
 0x28e   :  { %4347 = vmatprep.subr.bf16.mxu0 %v7194_v11  ;;  %4493 = vmatprep.subr.bf16.mxu1 %v7056_v63 }
 0x291   :  { %4349 = vmatpush1.bf16.msra.mxu0 %v7195_v48  ;;  %4495 = vmatpush3.bf16.msra.mxu1 %v7196_v13 }
 0x292   :  { %4351 = vmatprep.subr.bf16.mxu0 %v7197_v46  ;;  %4496 = vmatprep.subr.bf16.mxu1 %v7056_v63 }
 0x295   :  { %4353 = vmatpush1.bf16.msra.mxu0 %v7198_v14  ;;  %4498 = vmatpush3.bf16.msra.mxu1 %v7199_v38 }
 0x296   :  { %4355 = vmatprep.subr.bf16.mxu0 %v7200_v51  ;;  %4499 = vmatprep.subr.bf16.mxu1 %v7056_v63  ;;  %v7204_v63 = vsub.s32 2, %v7201_v42 }
 0x299   :  { %4357 = vmatpush1.bf16.msra.mxu0 %v7132_v7  ;;  %4501 = vmatpush3.bf16.msra.mxu1 %v7133_v44  ;;  %v1676_v7 = vrot.slane %v3204_v8, %v7204_v63 }
 0x29c   :  { %2529 = vmatmul.mubr.f32.vlgmr.msra.gmra.mrb[2].mxu0 %v6189_v55  ;;  %3828 = vmatmul.mubr.f32.vlgmr.msra.gmra.mrb[2].mxu1 %v6189_v55 }
 0x36f   :  { %v2530_v16 = vpop.f32.mrb[2].mxu0  ;;  %v3172_v0 = vpop.f32.mrb[2].mxu1 }
 0x370   :  { %v4505_v44 = vadd.f32 %v2530_v16, %v1668_v10  ;;  %v2532_v52 = vpop.f32.mrb[3].mxu0  ;;  %v3829_v17 = vpop.f32.mrb[3].mxu1  ;;  %v4507_v12 = vadd.f32 %v3172_v0, %v1676_v7 }
 0x371   :  { %v4506_v3 = vadd.f32 %v2532_v52, %v1672_v15 }
 0x372   :  { %v3205_v55 = vmul.f32 -1.442695, %v4505_v44 }
 0x373   :  { %v3182_v5 = vmax.f32 %v4506_v3, 0.0 }
 0x374   :  { %4560 = vpow2.f32 %v3205_v55 }
 0x375   :  { %v3183_v30 = vsub.f32 %v3182_v5, %v4507_v12 }
 0x37e   :  { %v4561_v50 = vpop.eup %4560 }
 0x37f   :  { %v3179_v18 = vadd.f32 1.0, %v4561_v50 }
 0x381   :  { %4562 = vrcp.f32 %v3179_v18 }
 0x38b   :  { %v4563_v25 = vpop.eup %4562 }
 0x38c   :  { %v3184_v28 = vmul.f32 %v4563_v25, %v3183_v30 }
 0x38e   :  { %v3185_v29 = vadd.f32 %v4507_v12, %v3184_v28 }
 0x390   :  { %3186 = vst [vmem:[#allocation7] sm:$0xff] %v3185_v29 }
 0x391   :  { %4619 = shalt.err (!%p4616_p6)
}
 0x392   :  { %s4620_s17 = scalar_lea.hbm %s6526_s3, 128 }
 0x393   :  { %p4621_p7 = scmp.ne.s32.totalorder %s6526_s3, %s4620_s17  ;;  %p4624_p8 = scmp.lt.u32.totalorder %s4620_s17, %s6526_s3 }
 0x395   :  { %p4626_p9 = pnand %p4624_p8, %p4621_p7 }
 0x397   :  { %4629 = shalt.err (!%p4626_p9)
}
 0x398   :  { %3196 = dma.vmem_to_hbm [thread:$0]  %s3194_s13, 128, %s6526_s3, [#allocation4]  }
 0x399   :  { %4634 = dma.done.wait [#allocation4], 128  }
 0x39a   :  { %4635 = vsyncadd [#allocation4], 4294967168 }
 0x39b   :  { %3200 = vsyncpa [#allocation3], 1 }
 0x39c   :  { %3201 = vsyncpa [#allocation6], 1 }
 0x39d   :  { %3202 = vsyncpa [#allocation4], 1 }

// kernel: tpu_custom_call.1
= control target key start
LH: loop header
LB: loop body
LE: loop exit
PB: predicated region body
PF: predicated region fallthrough
CT: control target
= control target key end

     0   :  { %8 = vsyncpa [#allocation3], 0  ;;  %s6523_s0 = inlined_call_operand.hbm [shape: f32[8,128], index: 0, kind: input, shape index: {}]   ;;  %s6524_s1 = inlined_call_operand.hbm [shape: f32[2,128,384], index: 1, kind: input, shape index: {}]   ;;  %s6525_s2 = inlined_call_operand.vmem [shape: f32[2,1,384], index: 2, kind: input, shape index: {}]   ;;  %s6526_s3 = inlined_call_operand.hbm [shape: f32[8,128], index: 3, kind: output, shape index: {}]  }
   0x1   :  { %9 = vsyncpa [#allocation6], 0 }
   0x2   :  { %10 = vsyncpa [#allocation4], 0  ;;  %s4636_s12 = smov [#allocation2]   ;;  %s4637_s14 = smov [#allocation5]  }
   0x3   :  { %s17_s13 = sshll.u32 %s4636_s12, 4  ;;  %s26_s15 = sshll.u32 %s4637_s14, 4  ;;  %s18_s13 = int_to_ptr.vmem [resolvable:$true] %s17_s13  ;;  %s4664_s15 = int_to_ptr.vmem [resolvable:$true] %s26_s15 }
   0x4   :  { %s4564_s18 = scalar_lea.hbm %s6523_s0, 128 }
   0x5   :  { %p4565_p0 = scmp.ne.s32.totalorder %s6523_s0, %s4564_s18  ;;  %p4568_p1 = scmp.lt.u32.totalorder %s4564_s18, %s6523_s0 }
   0x7   :  { %p4570_p2 = pnand %p4568_p1, %p4565_p0 }
   0x9   :  { %4573 = shalt.err (!%p4570_p2)
}
   0xa   :  { %s4574_s23 = scalar_lea.vmem %s18_s13, 128  ;;  %p4579_p4 = scmp.lt.s32.totalorder %s18_s13, %s18_s13 }
   0xb   :  { %p4575_p3 = scmp.ne.s32.totalorder %s18_s13, %s4574_s23  ;;  %p4580_p5 = scmp.lt.s32.totalorder %s4574_s23, %s4574_s23 }
   0xd   :  { %p4581_p6 = por %p4580_p5, %p4579_p4 }
   0xf   :  { %p4582_p7 = pnand %p4581_p6, %p4575_p3 }
  0x11   :  { %4585 = shalt.err (!%p4582_p7)
}
  0x12   :  { %20 = dma.hbm_to_vmem [thread:$0]  %s6523_s0, 128, %s18_s13, [#allocation3]  }
  0x13   :  { %s4586_s28 = scalar_lea.hbm %s6524_s1, 12288 }
  0x14   :  { %p4587_p8 = scmp.ne.s32.totalorder %s6524_s1, %s4586_s28  ;;  %p4590_p9 = scmp.lt.u32.totalorder %s4586_s28, %s6524_s1 }
  0x16   :  { %p4592_p10 = pnand %p4590_p9, %p4587_p8 }
  0x18   :  { %4595 = shalt.err (!%p4592_p10)
}
  0x19   :  { %s4596_s6 = scalar_lea.vmem %s4664_s15, 12288  ;;  %p4601_p12 = scmp.lt.s32.totalorder %s4664_s15, %s4664_s15 }
  0x1a   :  { %p4597_p11 = scmp.ne.s32.totalorder %s4664_s15, %s4596_s6  ;;  %p4602_p13 = scmp.lt.s32.totalorder %s4596_s6, %s4596_s6 }
  0x1c   :  { %p4603_p0 = por %p4602_p13, %p4601_p12 }
  0x1e   :  { %p4604_p1 = pnand %p4603_p0, %p4597_p11 }
  0x20   :  { %4607 = shalt.err (!%p4604_p1)
}
  0x21   :  { %s4638_s0 = smov 384   ;;  %s4639_s7 = smov 24  }
  0x22   :  { %32 = dma.hbm_to_vmem [thread:$0]  %s6524_s1, 12288, %s4664_s15, [#allocation6], %s4638_s0, %s4638_s0, %s4639_s7  }
  0x23   :  { %4630 = dma.done.wait [#allocation3], 128  }
  0x24   :  { %4631 = vsyncadd [#allocation3], 4294967168 }
  0x25   :  { %4632 = dma.done.wait [#allocation6], 12288  }
  0x26   :  { %4633 = vsyncadd [#allocation6], 4294955008  ;;  %v6533_v0 = vmov 0.0|0.0   ;;  %vm4641_vm0 = vmmov 0   ;;  %v6527_v1 = vmov 0.0   ;;  %v43_v2 = vld [vmem:[#allocation5 + $0x8] sm:$0xff] }
  0x27   :  { %4022 = vmatprep.subr.bf16.mxu1 %v6533_v0  ;;  %3442 = vmatprep.mubr.msk.f32.mxu1 %vm4641_vm0, %v6527_v1  ;;  %v46_v3 = vld [vmem:[#allocation5 + $0x20] sm:$0xff]  ;;  %v44_v4 = vld [vmem:[#allocation5 + $0x10] sm:$0xff]  ;;  %v107_v5 = vand.u32 4294901760, %v43_v2  ;;  %v47_v7 = vld [vmem:[#allocation5 + $0x28] sm:$0xff] }
  0x28   :  { %203 = vmatprep.mubr.f32.mxu0 %v6527_v1  ;;  %v111_v6 = vand.u32 4294901760, %v46_v3  ;;  %v963_v8 = vand.u32 4294901760, %v44_v4  ;;  %v42_v9 = vld [vmem:[#allocation5] sm:$0xff]  ;;  %v45_v10 = vld [vmem:[#allocation5 + $0x18] sm:$0xff]  ;;  %v966_v11 = vand.u32 4294901760, %v47_v7  ;;  %v52_v15 = vld [vmem:[#allocation5 + $0x50] sm:$0xff] }
  0x29   :  { %v109_v12 = vand.u32 4294901760, %v42_v9  ;;  %v113_v13 = vand.u32 4294901760, %v45_v10  ;;  %v49_v14 = vld [vmem:[#allocation5 + $0x38] sm:$0xff]  ;;  %v50_v16 = vld [vmem:[#allocation5 + $0x40] sm:$0xff]  ;;  %v4701_v18 = vsub.f32 %v43_v2, %v107_v5  ;;  %v48_v22 = vld [vmem:[#allocation5 + $0x30] sm:$0xff]  ;;  %v119_v31 = vand.u32 4294901760, %v52_v15 }
  0x2a   :  { %v4699_v17 = vpack.c.bf16 %v111_v6, %v107_v5  ;;  %v4703_v19 = vsub.f32 %v46_v3, %v111_v6  ;;  %v4705_v20 = vsub.f32 %v44_v4, %v963_v8  ;;  %v53_v21 = vld [vmem:[#allocation5 + $0x58] sm:$0xff]  ;;  %v51_v23 = vld [vmem:[#allocation5 + $0x48] sm:$0xff]  ;;  %v4707_v24 = vpack.c.bf16 %v966_v11, %v963_v8  ;;  %v58_v33 = vld [vmem:[#allocation5 + $0x80] sm:$0xff] }
  0x2b   :  { %v4709_v25 = vsub.f32 %v47_v7, %v966_v11  ;;  %v4711_v26 = vpack.c.bf16 %v113_v13, %v109_v12  ;;  %v4713_v27 = vsub.f32 %v42_v9, %v109_v12  ;;  %v55_v28 = vld [vmem:[#allocation5 + $0x68] sm:$0xff]  ;;  %v4716_v29 = vsub.f32 %v45_v10, %v113_v13  ;;  %v56_v38 = vld [vmem:[#allocation5 + $0x70] sm:$0xff]  ;;  %v54_v44 = vld [vmem:[#allocation5 + $0x60] sm:$0xff] }
  0x2c   :  { %6817 = vst [vmem:[#allocation11_spill] sm:$0xff] %v4699_v17  ;;  %6818 = vst [vmem:[#allocation12_spill] sm:$0xff] %v4705_v20  ;;  %3831 = vmatprep.subr.bf16.mxu0 %v4699_v17  ;;  %v115_v30 = vand.u32 4294901760, %v49_v14  ;;  %v969_v32 = vand.u32 4294901760, %v50_v16  ;;  %4024 = vmatpush3.bf16.msra.mxu1 %v4707_v24  ;;  %v972_v34 = vand.u32 4294901760, %v53_v21  ;;  %v117_v35 = vand.u32 4294901760, %v48_v22 }
  0x2d   :  { %6819 = vst [vmem:[#allocation13_spill] sm:$0xff] %v4707_v24  ;;  %6820 = vst [vmem:[#allocation14_spill] sm:$0xff] %v4709_v25  ;;  %3833 = vmatpush1.bf16.msra.mxu0 %v4711_v26  ;;  %v121_v36 = vand.u32 4294901760, %v51_v23  ;;  %v123_v37 = vand.u32 4294901760, %v55_v28  ;;  %v59_v39 = vld [vmem:[#allocation5 + $0x88] sm:$0xff]  ;;  %4025 = vmatprep.subr.bf16.mxu1 %v6533_v0  ;;  %v4725_v42 = vsub.f32 %v52_v15, %v119_v31  ;;  %v57_v45 = vld [vmem:[#allocation5 + $0x78] sm:$0xff] }
  0x2e   :  { %6821 = vst [vmem:[#allocation15_spill] sm:$0xff] %v4711_v26  ;;  %6822 = vst [vmem:[#allocation16_spill] sm:$0xff] %v4713_v27  ;;  %v4721_v40 = vpack.c.bf16 %v119_v31, %v115_v30  ;;  %v4723_v41 = vsub.f32 %v49_v14, %v115_v30  ;;  %v4727_v43 = vsub.f32 %v50_v16, %v969_v32  ;;  %v61_v46 = vld [vmem:[#allocation5 + $0x98] sm:$0xff]  ;;  %v64_v51 = vld [vmem:[#allocation5 + $0xb0] sm:$0xff]  ;;  %v127_v53 = vand.u32 4294901760, %v58_v33 }
  0x2f   :  { %6823 = vst [vmem:[#allocation17_spill] sm:$0xff] %v4716_v29  ;;  %v4729_v47 = vpack.c.bf16 %v972_v34, %v969_v32  ;;  %v4731_v48 = vsub.f32 %v53_v21, %v972_v34  ;;  %v4733_v49 = vpack.c.bf16 %v121_v36, %v117_v35  ;;  %v4735_v50 = vsub.f32 %v48_v22, %v117_v35  ;;  %v62_v60 = vld [vmem:[#allocation5 + $0xa0] sm:$0xff]  ;;  %v65_v61 = vld [vmem:[#allocation5 + $0xb8] sm:$0xff]  ;;  %v60_v4 = vld [vmem:[#allocation5 + $0x90] sm:$0xff] }
  0x30   :  { %6824 = vst [vmem:[#allocation18_spill] sm:$0xff] %v4721_v40  ;;  %6825 = vst [vmem:[#allocation19_spill] sm:$0xff] %v4723_v41  ;;  %3835 = vmatprep.subr.bf16.mxu0 %v4721_v40  ;;  %v4738_v52 = vsub.f32 %v51_v23, %v121_v36  ;;  %v4740_v54 = vsub.f32 %v55_v28, %v123_v37  ;;  %v975_v55 = vand.u32 4294901760, %v56_v38  ;;  %v978_v56 = vand.u32 4294901760, %v59_v39  ;;  %v63_v5 = vld [vmem:[#allocation5 + $0xa8] sm:$0xff]  ;;  %v70_v11 = vld [vmem:[#allocation5 + $0xe0] sm:$0xff] }
  0x31   :  { %6826 = vst [vmem:[#allocation20_spill] sm:$0xff] %v4729_v47  ;;  %6827 = vst [vmem:[#allocation21_spill] sm:$0xff] %v4733_v49  ;;  %4027 = vmatpush3.bf16.msra.mxu1 %v4729_v47  ;;  %3837 = vmatpush1.bf16.msra.mxu0 %v4733_v49  ;;  %v125_v57 = vand.u32 4294901760, %v54_v44  ;;  %v129_v58 = vand.u32 4294901760, %v57_v45  ;;  %v131_v59 = vand.u32 4294901760, %v61_v46  ;;  %v4745_v62 = vpack.c.bf16 %v127_v53, %v123_v37  ;;  %v67_v6 = vld [vmem:[#allocation5 + $0xc8] sm:$0xff] }
  0x32   :  { %4028 = vmatprep.subr.bf16.mxu1 %v6533_v0  ;;  %v4747_v63 = vsub.f32 %v58_v33, %v127_v53  ;;  %v4749_v2 = vsub.f32 %v56_v38, %v975_v55  ;;  %v135_v3 = vand.u32 4294901760, %v64_v51  ;;  %v4751_v7 = vpack.c.bf16 %v978_v56, %v975_v55  ;;  %v68_v12 = vld [vmem:[#allocation5 + $0xd0] sm:$0xff]  ;;  %v71_v13 = vld [vmem:[#allocation5 + $0xe8] sm:$0xff]  ;;  %v66_v35 = vld [vmem:[#allocation5 + $0xc0] sm:$0xff] }
  0x33   :  { %6828 = vst [vmem:[#allocation22_spill] sm:$0xff] %v4745_v62  ;;  %v4753_v8 = vsub.f32 %v59_v39, %v978_v56  ;;  %v4755_v9 = vpack.c.bf16 %v129_v58, %v125_v57  ;;  %v4757_v10 = vsub.f32 %v54_v44, %v125_v57  ;;  %3839 = vmatprep.subr.bf16.mxu0 %v4745_v62  ;;  %v981_v22 = vand.u32 4294901760, %v62_v60  ;;  %v69_v44 = vld [vmem:[#allocation5 + $0xd8] sm:$0xff]  ;;  %v74_v57 = vld [vmem:[#allocation5 + $0x100] sm:$0xff]  ;;  %v79_v1 = vld [vmem:[#allocation5 + $0x128] sm:$0xff] }
  0x34   :  { %6829 = vst [vmem:[#allocation23_spill] sm:$0xff] %v4751_v7  ;;  %v4760_v14 = vsub.f32 %v57_v45, %v129_v58  ;;  %v4762_v15 = vpack.c.bf16 %v135_v3, %v131_v59  ;;  %v4764_v16 = vsub.f32 %v61_v46, %v131_v59  ;;  %v4766_v21 = vsub.f32 %v64_v51, %v135_v3  ;;  %v73_v45 = vld [vmem:[#allocation5 + $0xf8] sm:$0xff]  ;;  %v76_v46 = vld [vmem:[#allocation5 + $0x110] sm:$0xff] }
  0x35   :  { %6830 = vst [vmem:[#allocation24_spill] sm:$0xff] %v4755_v9  ;;  %4030 = vmatpush3.bf16.msra.mxu1 %v4751_v7  ;;  %3841 = vmatpush1.bf16.msra.mxu0 %v4755_v9  ;;  %v984_v23 = vand.u32 4294901760, %v65_v61  ;;  %v133_v28 = vand.u32 4294901760, %v60_v4  ;;  %v137_v30 = vand.u32 4294901760, %v63_v5  ;;  %v139_v31 = vand.u32 4294901760, %v67_v6  ;;  %v77_v58 = vld [vmem:[#allocation5 + $0x118] sm:$0xff] }
  0x36   :  { %6831 = vst [vmem:[#allocation25_spill] sm:$0xff] %v4762_v15  ;;  %4031 = vmatprep.subr.bf16.mxu1 %v6533_v0  ;;  %3843 = vmatprep.subr.bf16.mxu0 %v4762_v15  ;;  %v143_v32 = vand.u32 4294901760, %v70_v11  ;;  %v987_v33 = vand.u32 4294901760, %v68_v12  ;;  %v990_v34 = vand.u32 4294901760, %v71_v13  ;;  %v4774_v37 = vsub.f32 %v62_v60, %v981_v22  ;;  %v72_v59 = vld [vmem:[#allocation5 + $0xf0] sm:$0xff]  ;;  %v81_v15 = vld [vmem:[#allocation5 + $0x138] sm:$0xff] }
  0x37   :  { %v4772_v36 = vpack.c.bf16 %v984_v23, %v981_v22  ;;  %v4776_v38 = vsub.f32 %v65_v61, %v984_v23  ;;  %v4778_v39 = vpack.c.bf16 %v137_v30, %v133_v28  ;;  %v4780_v51 = vsub.f32 %v60_v4, %v133_v28  ;;  %v75_v28 = vld [vmem:[#allocation5 + $0x108] sm:$0xff]  ;;  %v85_v47 = vld [vmem:[#allocation5 + $0x158] sm:$0xff]  ;;  %v84_v26 = vld [vmem:[#allocation5 + $0x150] sm:$0xff] }
  0x38   :  { %v4782_v53 = vsub.f32 %v63_v5, %v137_v30  ;;  %v4784_v55 = vpack.c.bf16 %v143_v32, %v139_v31  ;;  %v4786_v56 = vsub.f32 %v67_v6, %v139_v31  ;;  %v4790_v60 = vsub.f32 %v70_v11, %v143_v32  ;;  %v89_v40 = vld [vmem:[#allocation5 + $0x178] sm:$0xff] }
  0x39   :  { %6832 = vst [vmem:[#allocation26_spill] sm:$0xff] %v4772_v36  ;;  %6833 = vst [vmem:[#allocation27_spill] sm:$0xff] %v4778_v39  ;;  %4033 = vmatpush3.bf16.msra.mxu1 %v4772_v36  ;;  %3845 = vmatpush1.bf16.msra.mxu0 %v4778_v39  ;;  %v4792_v61 = vpack.c.bf16 %v990_v34, %v987_v33  ;;  %v4794_v3 = vsub.f32 %v68_v12, %v987_v33  ;;  %v141_v4 = vand.u32 4294901760, %v66_v35  ;;  %v82_v39 = vld [vmem:[#allocation5 + $0x140] sm:$0xff]  ;;  %v80_v12 = vld [vmem:[#allocation5 + $0x130] sm:$0xff] }
  0x3a   :  { %6834 = vst [vmem:[#allocation28_spill] sm:$0xff] %v4784_v55  ;;  %4034 = vmatprep.subr.bf16.mxu1 %v6533_v0  ;;  %3847 = vmatprep.subr.bf16.mxu0 %v4784_v55  ;;  %v4798_v5 = vsub.f32 %v71_v13, %v990_v34  ;;  %v145_v6 = vand.u32 4294901760, %v69_v44  ;;  %v147_v22 = vand.u32 4294901760, %v73_v45  ;;  %v151_v23 = vand.u32 4294901760, %v76_v46  ;;  %v83_v34 = vld [vmem:[#allocation5 + $0x148] sm:$0xff]  ;;  %v78_v55 = vld [vmem:[#allocation5 + $0x120] sm:$0xff] }
  0x3b   :  { %6835 = vst [vmem:[#allocation29_spill] sm:$0xff] %v4792_v61  ;;  %v4800_v30 = vsub.f32 %v66_v35, %v141_v4  ;;  %v993_v31 = vand.u32 4294901760, %v74_v57  ;;  %v996_v11 = vand.u32 4294901760, %v77_v58  ;;  %v149_v32 = vand.u32 4294901760, %v72_v59 }
  0x3c   :  { %v4802_v33 = vpack.c.bf16 %v145_v6, %v141_v4  ;;  %v4804_v36 = vsub.f32 %v69_v44, %v145_v6  ;;  %v4806_v0 = vpack.c.bf16 %v151_v23, %v147_v22  ;;  %v4808_v13 = vsub.f32 %v73_v45, %v147_v22 }
  0x3d   :  { %4036 = vmatpush3.bf16.msra.mxu1 %v4792_v61  ;;  %v4811_v35 = vsub.f32 %v76_v46, %v151_v23  ;;  %v4813_v9 = vpack.c.bf16 %v996_v11, %v993_v31  ;;  %v4815_v7 = vsub.f32 %v74_v57, %v993_v31  ;;  %v4817_v62 = vsub.f32 %v77_v58, %v996_v11  ;;  %v88_v57 = vld [vmem:[#allocation5 + $0x170] sm:$0xff] }
  0x3e   :  { %6836 = vst [vmem:[#allocation30_spill] sm:$0xff] %v4802_v33  ;;  %6837 = vst [vmem:[#allocation31_spill] sm:$0xff] %v4806_v0  ;;  %3849 = vmatpush1.bf16.msra.mxu0 %v4802_v33  ;;  %v6839_v44 = vmov 0.0|0.0   ;;  %v153_v4 = vand.u32 4294901760, %v75_v28  ;;  %v4821_v45 = vsub.f32 %v72_v59, %v149_v32  ;;  %v155_v6 = vand.u32 4294901760, %v79_v1  ;;  %v86_v59 = vld [vmem:[#allocation5 + $0x160] sm:$0xff] }
  0x3f   :  { %6838 = vst [vmem:[#allocation32_spill] sm:$0xff] %v4813_v9  ;;  %4037 = vmatprep.subr.bf16.mxu1 %v6839_v44  ;;  %v159_v22 = vand.u32 4294901760, %v82_v39  ;;  %3851 = vmatprep.subr.bf16.mxu0 %v4806_v0  ;;  %v999_v61 = vand.u32 4294901760, %v80_v12  ;;  %v1002_v46 = vand.u32 4294901760, %v83_v34  ;;  %v157_v23 = vand.u32 4294901760, %v78_v55 }
  0x40   :  { %6840 = vst [vmem:[#allocation33_spill] sm:$0xff] %v4821_v45  ;;  %v161_v49 = vand.u32 4294901760, %v81_v15  ;;  %v4824_v31 = vpack.c.bf16 %v153_v4, %v149_v32  ;;  %v4826_v58 = vsub.f32 %v75_v28, %v153_v4  ;;  %v4830_v33 = vsub.f32 %v79_v1, %v155_v6  ;;  %v87_v32 = vld [vmem:[#allocation5 + $0x168] sm:$0xff] }
  0x41   :  { %v4828_v11 = vpack.c.bf16 %v159_v22, %v155_v6  ;;  %4039 = vmatpush3.bf16.msra.mxu1 %v4813_v9  ;;  %v4833_v0 = vsub.f32 %v82_v39, %v159_v22  ;;  %v4835_v24 = vpack.c.bf16 %v1002_v46, %v999_v61  ;;  %v4837_v17 = vsub.f32 %v80_v12, %v999_v61 }
  0x42   :  { %6841 = vst [vmem:[#allocation34_spill] sm:$0xff] %v4824_v31  ;;  %v4839_v45 = vsub.f32 %v83_v34, %v1002_v46  ;;  %3853 = vmatpush1.bf16.msra.mxu0 %v4824_v31  ;;  %4040 = vmatprep.subr.bf16.mxu1 %v6839_v44  ;;  %v4843_v1 = vpack.c.bf16 %v161_v49, %v157_v23  ;;  %v163_v6 = vand.u32 4294901760, %v85_v47  ;;  %v167_v39 = vand.u32 4294901760, %v88_v57  ;;  %v41_v34 = vld [vmem:[#allocation2] sm:$0xff] }
  0x43   :  { %6842 = vst [vmem:[#allocation35_spill] sm:$0xff] %v4828_v11  ;;  %6843 = vst [vmem:[#allocation36_spill] sm:$0xff] %v4835_v24  ;;  %v4845_v28 = vsub.f32 %v78_v55, %v157_v23  ;;  %v4847_v4 = vsub.f32 %v81_v15, %v161_v49  ;;  %3855 = vmatprep.subr.bf16.mxu0 %v4828_v11  ;;  %v1005_v22 = vand.u32 4294901760, %v86_v59  ;;  %v1008_v61 = vand.u32 4294901760, %v89_v40 }
  0x44   :  { %6844 = vst [vmem:[#allocation37_spill] sm:$0xff] %v4839_v45  ;;  %6845 = vst [vmem:[#allocation38_spill] sm:$0xff] %v4843_v1  ;;  %v165_v12 = vand.u32 4294901760, %v84_v26  ;;  %v4850_v46 = vsub.f32 %v85_v47, %v163_v6  ;;  %v169_v9 = vand.u32 4294901760, %v87_v32  ;;  %v4855_v55 = vpack.c.bf16 %v167_v39, %v163_v6 }
  0x45   :  { %4042 = vmatpush3.bf16.msra.mxu1 %v4835_v24  ;;  %v4857_v49 = vsub.f32 %v88_v57, %v167_v39  ;;  %v4859_v15 = vpack.c.bf16 %v1008_v61, %v1005_v22  ;;  %v4861_v23 = vsub.f32 %v86_v59, %v1005_v22  ;;  %v4865_v47 = vsub.f32 %v89_v40, %v1008_v61 }
  0x46   :  { %6846 = vst [vmem:[#allocation39_spill] sm:$0xff] %v4855_v55  ;;  %3857 = vmatpush1.bf16.msra.mxu0 %v4843_v1  ;;  %4043 = vmatprep.subr.bf16.mxu1 %v6839_v44  ;;  %v4867_v11 = vpack.c.bf16 %v169_v9, %v165_v12  ;;  %v4869_v31 = vsub.f32 %v84_v26, %v165_v12  ;;  %v4871_v45 = vand.u32 4294901760, %v41_v34  ;;  %v6855_v6 = vand.u32 4294901760, %v4701_v18 }
  0x47   :  { %6847 = vst [vmem:[#allocation40_spill] sm:$0xff] %v4857_v49  ;;  %6848 = vst [vmem:[#allocation41_spill] sm:$0xff] %v4859_v15  ;;  %3859 = vmatprep.subr.bf16.mxu0 %v4855_v55  ;;  %v4874_v57 = vsub.f32 %v87_v32, %v169_v9  ;;  %v6856_v39 = vand.u32 4294901760, %v4703_v19  ;;  %v6573_v40 = vand.u32 4294901760, %v4705_v20  ;;  %v6584_v26 = vand.u32 4294901760, %v4709_v25 }
  0x48   :  { %6849 = vst [vmem:[#allocation42_spill] sm:$0xff] %v4861_v23  ;;  %6850 = vst [vmem:[#allocation43_spill] sm:$0xff] %v4865_v47  ;;  %v218_v59 = vsub.f32 %v4701_v18, %v6855_v6  ;;  %v4884_v61 = vsub.f32 %v41_v34, %v4871_v45  ;;  %v6589_v12 = vand.u32 4294901760, %v4713_v27  ;;  %v6608_v24 = vand.u32 4294901760, %v4725_v42 }
  0x49   :  { %6851 = vst [vmem:[#allocation44_spill] sm:$0xff] %v4867_v11  ;;  %6852 = vst [vmem:[#allocation45_spill] sm:$0xff] %v4869_v31  ;;  %v230_v22 = vsub.f32 %v4703_v19, %v6856_v39  ;;  %4045 = vmatpush3.bf16.msra.mxu1 %v4859_v15  ;;  %v1057_v6 = vsub.f32 %v4705_v20, %v6573_v40  ;;  %v1064_v9 = vsub.f32 %v4709_v25, %v6584_v26 }
  0x4a   :  { %6853 = vst [vmem:[#allocation46_spill] sm:$0xff] %v4871_v45  ;;  %6854 = vst [vmem:[#allocation47_spill] sm:$0xff] %v4874_v57  ;;  %v219_v32 = vand.u32 4294901760, %v218_v59  ;;  %3861 = vmatpush1.bf16.msra.mxu0 %v4867_v11  ;;  %4046 = vmatprep.subr.bf16.mxu1 %v6839_v44  ;;  %v4897_v34 = vand.u32 4294901760, %v4884_v61  ;;  %v224_v59 = vsub.f32 %v4713_v27, %v6589_v12  ;;  %v6860_v11 = vand.u32 4294901760, %v4723_v41 }
  0x4b   :  { %6857 = vst [vmem:[#allocation48_spill] sm:$0xff] %v4884_v61  ;;  %v231_v55 = vand.u32 4294901760, %v230_v22  ;;  %v6859_v22 = vand.u32 4294901760, %v4716_v29  ;;  %v1058_v15 = vand.u32 4294901760, %v1057_v6  ;;  %v1065_v26 = vand.u32 4294901760, %v1064_v9 }
  0x4c   :  { %6858 = vst [vmem:[#allocation49_spill] sm:$0xff] %v4897_v34  ;;  %v242_v1 = vsub.f32 %v4723_v41, %v6860_v11  ;;  %v207_v45 = vsub.f32 %v4884_v61, %v4897_v34  ;;  %v225_v25 = vand.u32 4294901760, %v224_v59  ;;  %v6599_v9 = vand.u32 4294901760, %v4738_v52 }
  0x4d   :  { %v236_v40 = vsub.f32 %v4716_v29, %v6859_v22  ;;  %v3862_v39 = vpack.c.bf16 %v231_v55, %v219_v32  ;;  %v254_v22 = vsub.f32 %v4725_v42, %v6608_v24  ;;  %v6601_v55 = vand.u32 4294901760, %v4727_v43 }
  0x4e   :  { %v243_v12 = vand.u32 4294901760, %v242_v1  ;;  %v6597_v32 = vand.u32 4294901760, %v4731_v48  ;;  %v208_v6 = vand.u32 4294901760, %v207_v45  ;;  %v4047_v11 = vpack.c.bf16 %v1065_v26, %v1058_v15 }
  0x4f   :  { %v237_v20 = vand.u32 4294901760, %v236_v40  ;;  %3863 = vmatprep.subr.bf16.mxu0 %v3862_v39  ;;  %v6596_v29 = vand.u32 4294901760, %v4735_v50  ;;  %v255_v27 = vand.u32 4294901760, %v254_v22  ;;  %v1071_v40 = vsub.f32 %v4727_v43, %v6601_v55 }
  0x50   :  { %v1078_v1 = vsub.f32 %v4731_v48, %v6597_v32  ;;  %3443 = vmatmul.mubr.f32.vlgmr.msra.gmra.mrb[0].mxu1 %v208_v6  ;;  %209 = vmatmul.mubr.f32.vlgmr.msra.gmra.mrb[0].mxu0 %v208_v6  ;;  %v6602_v15 = vand.u32 4294901760, %v4749_v2  ;;  %v260_v22 = vsub.f32 %v4738_v52, %v6599_v9 }
  0x51   :  { %v3864_v41 = vpack.c.bf16 %v237_v20, %v225_v25  ;;  %v248_v45 = vsub.f32 %v4735_v50, %v6596_v29  ;;  %v6598_v20 = vand.u32 4294901760, %v4740_v54  ;;  %v6600_v25 = vand.u32 4294901760, %v4747_v63  ;;  %4048 = vmatpush3.bf16.msra.mxu1 %v4047_v11 }
  0x52   :  { %v3866_v26 = vpack.c.bf16 %v255_v27, %v243_v12  ;;  %v1072_v39 = vand.u32 4294901760, %v1071_v40  ;;  %v1079_v59 = vand.u32 4294901760, %v1078_v1  ;;  %4049 = vmatprep.subr.bf16.mxu1 %v6839_v44  ;;  %v1085_v27 = vsub.f32 %v4749_v2, %v6602_v15 }
  0x53   :  { %3865 = vmatpush1.bf16.msra.mxu0 %v3864_v41  ;;  %v249_v6 = vand.u32 4294901760, %v248_v45  ;;  %v266_v29 = vsub.f32 %v4740_v54, %v6598_v20  ;;  %v278_v32 = vsub.f32 %v4747_v63, %v6600_v25  ;;  %v6861_v41 = vmov 0.0  }
  0x54   :  { %3477 = vmatprep.mubr.msk.f32.mxu1 %vm4641_vm0, %v6861_v41  ;;  %3867 = vmatprep.subr.bf16.mxu0 %v3866_v26  ;;  %v4050_v12 = vpack.c.bf16 %v1079_v59, %v1072_v39  ;;  %v261_v11 = vand.u32 4294901760, %v260_v22  ;;  %v6606_v40 = vand.u32 4294901760, %v4753_v8  ;;  %v6603_v1 = vand.u32 4294901760, %v4757_v10 }
  0x55   :  { %439 = vmatprep.mubr.f32.mxu0 %v6861_v41  ;;  %v267_v45 = vand.u32 4294901760, %v266_v29  ;;  %v279_v20 = vand.u32 4294901760, %v278_v32  ;;  %v1086_v9 = vand.u32 4294901760, %v1085_v27  ;;  %v6605_v25 = vand.u32 4294901760, %v4760_v14 }
  0x56   :  { %4051 = vmatpush3.bf16.msra.mxu1 %v4050_v12  ;;  %v3868_v55 = vpack.c.bf16 %v261_v11, %v249_v6  ;;  %v1092_v15 = vsub.f32 %v4753_v8, %v6606_v40  ;;  %v272_v26 = vsub.f32 %v4757_v10, %v6603_v1  ;;  %v6604_v39 = vand.u32 4294901760, %v4764_v16 }
  0x57   :  { %4052 = vmatprep.subr.bf16.mxu1 %v6839_v44  ;;  %v3870_v59 = vpack.c.bf16 %v279_v20, %v267_v45  ;;  %v284_v29 = vsub.f32 %v4760_v14, %v6605_v25  ;;  %v6607_v32 = vand.u32 4294901760, %v4766_v21  ;;  %v6623_v22 = vand.u32 4294901760, %v4774_v37 }
  0x58   :  { %3869 = vmatpush1.bf16.msra.mxu0 %v3868_v55  ;;  %v1093_v6 = vand.u32 4294901760, %v1092_v15  ;;  %v273_v27 = vand.u32 4294901760, %v272_v26  ;;  %v290_v12 = vsub.f32 %v4764_v16, %v6604_v39  ;;  %v6615_v11 = vand.u32 4294901760, %v4776_v38 }
  0x59   :  { %3871 = vmatprep.subr.bf16.mxu0 %v3870_v59  ;;  %v285_v1 = vand.u32 4294901760, %v284_v29  ;;  %v302_v20 = vsub.f32 %v4766_v21, %v6607_v32  ;;  %v1099_v45 = vsub.f32 %v4774_v37, %v6623_v22  ;;  %v6609_v55 = vand.u32 4294901760, %v4780_v51 }
  0x5a   :  { %v4053_v15 = vpack.c.bf16 %v1093_v6, %v1086_v9  ;;  %v291_v26 = vand.u32 4294901760, %v290_v12  ;;  %v1106_v39 = vsub.f32 %v4776_v38, %v6615_v11  ;;  %v6610_v25 = vand.u32 4294901760, %v4782_v53 }
  0x5b   :  { %v3872_v59 = vpack.c.bf16 %v285_v1, %v273_v27  ;;  %v303_v29 = vand.u32 4294901760, %v302_v20  ;;  %v1100_v40 = vand.u32 4294901760, %v1099_v45  ;;  %v296_v32 = vsub.f32 %v4780_v51, %v6609_v55 }
  0x5c   :  { %4054 = vmatpush3.bf16.msra.mxu1 %v4053_v15  ;;  %v1107_v24 = vand.u32 4294901760, %v1106_v39  ;;  %v308_v9 = vsub.f32 %v4782_v53, %v6610_v25  ;;  %v6611_v6 = vand.u32 4294901760, %v4786_v56  ;;  %v6612_v12 = vand.u32 4294901760, %v4790_v60 }
  0x5d   :  { %3873 = vmatpush1.bf16.msra.mxu0 %v3872_v59  ;;  %4055 = vmatprep.subr.bf16.mxu1 %v6839_v44  ;;  %v3874_v1 = vpack.c.bf16 %v303_v29, %v291_v26  ;;  %v297_v27 = vand.u32 4294901760, %v296_v32  ;;  %v6613_v20 = vand.u32 4294901760, %v4794_v3  ;;  %v6614_v45 = vand.u32 4294901760, %v4798_v5 }
  0x5e   :  { %v4056_v55 = vpack.c.bf16 %v1107_v24, %v1100_v40  ;;  %v309_v15 = vand.u32 4294901760, %v308_v9  ;;  %v314_v39 = vsub.f32 %v4786_v56, %v6611_v6  ;;  %v326_v25 = vsub.f32 %v4790_v60, %v6612_v12 }
  0x5f   :  { %3875 = vmatprep.subr.bf16.mxu0 %v3874_v1  ;;  %v1113_v26 = vsub.f32 %v4794_v3, %v6613_v20  ;;  %v1120_v32 = vsub.f32 %v4798_v5, %v6614_v45  ;;  %v6616_v24 = vand.u32 4294901760, %v4800_v30  ;;  %v6618_v40 = vand.u32 4294901760, %v4804_v36 }
  0x60   :  { %4057 = vmatpush3.bf16.msra.mxu1 %v4056_v55  ;;  %v3876_v59 = vpack.c.bf16 %v309_v15, %v297_v27  ;;  %v315_v29 = vand.u32 4294901760, %v314_v39  ;;  %v327_v9 = vand.u32 4294901760, %v326_v25  ;;  %v6617_v6 = vand.u32 4294901760, %v4808_v13 }
  0x61   :  { %4058 = vmatprep.subr.bf16.mxu1 %v6839_v44  ;;  %v1114_v1 = vand.u32 4294901760, %v1113_v26  ;;  %v1121_v12 = vand.u32 4294901760, %v1120_v32  ;;  %v320_v20 = vsub.f32 %v4800_v30, %v6616_v24  ;;  %v332_v45 = vsub.f32 %v4804_v36, %v6618_v40 }
  0x62   :  { %3877 = vmatpush1.bf16.msra.mxu0 %v3876_v59  ;;  %v3878_v11 = vpack.c.bf16 %v327_v9, %v315_v29  ;;  %v338_v25 = vsub.f32 %v4808_v13, %v6617_v6  ;;  %v6622_v55 = vand.u32 4294901760, %v4811_v35  ;;  %v6619_v27 = vand.u32 4294901760, %v4815_v7  ;;  %v6862_v9 = vld [vmem:[#allocation33_spill] sm:$0xff] }
  0x63   :  { %v4059_v15 = vpack.c.bf16 %v1121_v12, %v1114_v1  ;;  %v321_v39 = vand.u32 4294901760, %v320_v20  ;;  %v333_v26 = vand.u32 4294901760, %v332_v45  ;;  %v6620_v32 = vand.u32 4294901760, %v4817_v62 }
  0x64   :  { %3879 = vmatprep.subr.bf16.mxu0 %v3878_v11  ;;  %v339_v24 = vand.u32 4294901760, %v338_v25  ;;  %v350_v59 = vsub.f32 %v4811_v35, %v6622_v55  ;;  %v1127_v29 = vsub.f32 %v4815_v7, %v6619_v27  ;;  %v6621_v6 = vand.u32 4294901760, %v6862_v9  ;;  %v6863_v55 = vld [vmem:[#allocation37_spill] sm:$0xff] }
  0x65   :  { %4060 = vmatpush3.bf16.msra.mxu1 %v4059_v15  ;;  %v3880_v40 = vpack.c.bf16 %v333_v26, %v321_v39  ;;  %v1134_v12 = vsub.f32 %v4817_v62, %v6620_v32  ;;  %v6626_v20 = vand.u32 4294901760, %v4826_v58  ;;  %v6630_v11 = vand.u32 4294901760, %v4830_v33 }
  0x66   :  { %4061 = vmatprep.subr.bf16.mxu1 %v6839_v44  ;;  %v351_v45 = vand.u32 4294901760, %v350_v59  ;;  %v1128_v1 = vand.u32 4294901760, %v1127_v29  ;;  %v344_v25 = vsub.f32 %v6862_v9, %v6621_v6  ;;  %v6629_v27 = vand.u32 4294901760, %v4833_v0 }
  0x67   :  { %3881 = vmatpush1.bf16.msra.mxu0 %v3880_v40  ;;  %v1135_v15 = vand.u32 4294901760, %v1134_v12  ;;  %v356_v39 = vsub.f32 %v4826_v58, %v6626_v20  ;;  %v362_v26 = vsub.f32 %v4830_v33, %v6630_v11  ;;  %v6639_v32 = vand.u32 4294901760, %v4837_v17 }
  0x68   :  { %v3882_v59 = vpack.c.bf16 %v351_v45, %v339_v24  ;;  %v345_v29 = vand.u32 4294901760, %v344_v25  ;;  %v374_v6 = vsub.f32 %v4833_v0, %v6629_v27  ;;  %v6635_v22 = vand.u32 4294901760, %v6863_v55 }
  0x69   :  { %v4062_v40 = vpack.c.bf16 %v1135_v15, %v1128_v1  ;;  %v357_v12 = vand.u32 4294901760, %v356_v39  ;;  %v363_v34 = vand.u32 4294901760, %v362_v26  ;;  %v1141_v20 = vsub.f32 %v4837_v17, %v6639_v32 }
  0x6a   :  { %3883 = vmatprep.subr.bf16.mxu0 %v3882_v59  ;;  %v375_v61 = vand.u32 4294901760, %v374_v6  ;;  %v1148_v24 = vsub.f32 %v6863_v55, %v6635_v22  ;;  %v6631_v45 = vand.u32 4294901760, %v4845_v28  ;;  %v6632_v25 = vand.u32 4294901760, %v4847_v4 }
  0x6b   :  { %4063 = vmatpush3.bf16.msra.mxu1 %v4062_v40  ;;  %v3884_v27 = vpack.c.bf16 %v357_v12, %v345_v29  ;;  %v1142_v11 = vand.u32 4294901760, %v1141_v20  ;;  %v6633_v1 = vand.u32 4294901760, %v4850_v46  ;;  %v6634_v15 = vand.u32 4294901760, %v4857_v49 }
  0x6c   :  { %4064 = vmatprep.subr.bf16.mxu1 %v6839_v44  ;;  %v3886_v39 = vpack.c.bf16 %v375_v61, %v363_v34  ;;  %v1149_v26 = vand.u32 4294901760, %v1148_v24  ;;  %v368_v6 = vsub.f32 %v4845_v28, %v6631_v45  ;;  %v380_v59 = vsub.f32 %v4847_v4, %v6632_v25 }
  0x6d   :  { %3885 = vmatpush1.bf16.msra.mxu0 %v3884_v27  ;;  %v386_v20 = vsub.f32 %v4850_v46, %v6633_v1  ;;  %v398_v29 = vsub.f32 %v4857_v49, %v6634_v15  ;;  %v6636_v61 = vand.u32 4294901760, %v4861_v23  ;;  %v6637_v34 = vand.u32 4294901760, %v4865_v47 }
  0x6e   :  { %3887 = vmatprep.subr.bf16.mxu0 %v3886_v39  ;;  %v4065_v40 = vpack.c.bf16 %v1149_v26, %v1142_v11  ;;  %v369_v12 = vand.u32 4294901760, %v368_v6  ;;  %v381_v24 = vand.u32 4294901760, %v380_v59  ;;  %v6638_v45 = vand.u32 4294901760, %v4869_v31 }
  0x6f   :  { %v387_v25 = vand.u32 4294901760, %v386_v20  ;;  %v399_v27 = vand.u32 4294901760, %v398_v29  ;;  %v1155_v1 = vsub.f32 %v4861_v23, %v6636_v61  ;;  %v1162_v15 = vsub.f32 %v4865_v47, %v6637_v34 }
  0x70   :  { %4066 = vmatpush3.bf16.msra.mxu1 %v4065_v40  ;;  %v3888_v22 = vpack.c.bf16 %v381_v24, %v369_v12  ;;  %v392_v11 = vsub.f32 %v4869_v31, %v6638_v45  ;;  %v403_v39 = vand.u32 4294901760, %v4874_v57  ;;  %v3894_v40 = vpack.c.bf16 %v4703_v19, %v4701_v18  ;;  %v6864_v12 = vld [vmem:[#allocation12_spill] sm:$0xff]  ;;  %v6865_v24 = vld [vmem:[#allocation14_spill] sm:$0xff] }
  0x71   :  { %4067 = vmatprep.subr.bf16.mxu1 %v6839_v44  ;;  %v3890_v26 = vpack.c.bf16 %v399_v27, %v387_v25  ;;  %v1156_v6 = vand.u32 4294901760, %v1155_v1  ;;  %v1163_v59 = vand.u32 4294901760, %v1162_v15  ;;  %v4071_v45 = vpack.c.bf16 %v6865_v24, %v6864_v12  ;;  %v6866_v25 = vld [vmem:[#allocation16_spill] sm:$0xff]  ;;  %v6867_v1 = vld [vmem:[#allocation17_spill] sm:$0xff] }
  0x72   :  { %3889 = vmatpush1.bf16.msra.mxu0 %v3888_v22  ;;  %v393_v20 = vand.u32 4294901760, %v392_v11  ;;  %v404_v29 = vsub.f32 %v4874_v57, %v403_v39  ;;  %v3896_v15 = vpack.c.bf16 %v6867_v1, %v6866_v25  ;;  %v6868_v22 = vld [vmem:[#allocation19_spill] sm:$0xff]  ;;  %v4074_v11 = vpack.c.bf16 %v4731_v48, %v4727_v43 }
  0x73   :  { %3891 = vmatprep.subr.bf16.mxu0 %v3890_v26  ;;  %v4068_v61 = vpack.c.bf16 %v1163_v59, %v1156_v6  ;;  %v3898_v27 = vpack.c.bf16 %v4725_v42, %v6868_v22  ;;  %v3900_v26 = vpack.c.bf16 %v4738_v52, %v4735_v50  ;;  %v4077_v6 = vpack.c.bf16 %v4753_v8, %v4749_v2 }
  0x74   :  { %v405_v34 = vand.u32 4294901760, %v404_v29  ;;  %v6870_v59 = vand.u32 4294901760, %v4701_v18  ;;  %v6873_v57 = vand.u32 4294901760, %v6865_v24  ;;  %v6874_v47 = vand.u32 4294901760, %v6866_v25 }
  0x75   :  { %4069 = vmatpush3.bf16.msra.mxu1 %v4068_v61  ;;  %v6869_v61 = vld [vmem:[#allocation46_spill] sm:$0xff]  ;;  %v6875_v23 = vand.u32 4294901760, %v6867_v1  ;;  %v6876_v18 = vand.u32 4294901760, %v6868_v22  ;;  %v6882_v25 = vand.u32 4294901760, %v4740_v54 }
  0x76   :  { %v3892_v32 = vpack.c.bf16 %v405_v34, %v393_v20  ;;  %4070 = vmatprep.subr.bf16.mxu1 %v6839_v44  ;;  %v3902_v34 = vpack.c.bf16 %v4747_v63, %v4740_v54  ;;  %v6871_v20 = vand.u32 4294901760, %v4703_v19  ;;  %v6877_v19 = vand.u32 4294901760, %v4725_v42 }
  0x77   :  { %v5119_v49 = vpack.c.bf16 %v6875_v23, %v6874_v47  ;;  %v6880_v23 = vand.u32 4294901760, %v4735_v50  ;;  %v6881_v47 = vand.u32 4294901760, %v4738_v52  ;;  %v6883_v42 = vand.u32 4294901760, %v4747_v63 }
  0x78   :  { %3893 = vmatpush1.bf16.msra.mxu0 %v3892_v32  ;;  %3478 = vmatmul.mubr.f32.vlgmr.msra.gmra.mrb[0].mxu1 %v6869_v61  ;;  %v5107_v29 = vpack.c.bf16 %v6871_v20, %v6870_v59  ;;  %v6872_v32 = vand.u32 4294901760, %v6864_v12  ;;  %v6886_v50 = vand.u32 4294901760, %v4757_v10  ;;  %v6887_v52 = vand.u32 4294901760, %v4760_v14 }
  0x79   :  { %3895 = vmatprep.subr.bf16.mxu0 %v3894_v40  ;;  %4072 = vmatpush3.bf16.msra.mxu1 %v4071_v45  ;;  %v5128_v45 = vpack.c.bf16 %v6877_v19, %v6876_v18  ;;  %v6879_v40 = vand.u32 4294901760, %v4731_v48  ;;  %v5140_v24 = vpack.c.bf16 %v6881_v47, %v6880_v23  ;;  %v5147_v1 = vpack.c.bf16 %v6883_v42, %v6882_v25 }
  0x7a   :  { %v5113_v31 = vpack.c.bf16 %v6873_v57, %v6872_v32  ;;  %4073 = vmatprep.subr.bf16.mxu1 %v6839_v44  ;;  %3512 = vmatprep.mubr.msk.f32.mxu1 %vm4641_vm0, %v6861_v41  ;;  %v6878_v57 = vand.u32 4294901760, %v4727_v43  ;;  %v6884_v43 = vand.u32 4294901760, %v4749_v2  ;;  %v6885_v48 = vand.u32 4294901760, %v4753_v8 }
  0x7b   :  { %441 = vmatmul.mubr.f32.vlgmr.msra.gmra.mrb[0].mxu0 %v6869_v61  ;;  %v5159_v59 = vpack.c.bf16 %v6887_v52, %v6886_v50  ;;  %v6888_v20 = vand.u32 4294901760, %v4764_v16  ;;  %v6889_v54 = vand.u32 4294901760, %v4766_v21  ;;  %v6890_v63 = vand.u32 4294901760, %v4774_v37 }
  0x7c   :  { %v5134_v12 = vpack.c.bf16 %v6879_v40, %v6878_v57  ;;  %v5153_v22 = vpack.c.bf16 %v6885_v48, %v6884_v43  ;;  %3897 = vmatpush1.bf16.msra.mxu0 %v3896_v15  ;;  %575 = vmatprep.mubr.f32.mxu0 %v6861_v41  ;;  %v6891_v2 = vand.u32 4294901760, %v4776_v38  ;;  %v6892_v18 = vand.u32 4294901760, %v4780_v51 }
  0x7d   :  { %v5165_v32 = vpack.c.bf16 %v6889_v54, %v6888_v20  ;;  %v6893_v19 = vand.u32 4294901760, %v4782_v53  ;;  %v6894_v40 = vand.u32 4294901760, %v4786_v56  ;;  %v6895_v23 = vand.u32 4294901760, %v4790_v60  ;;  %3899 = vmatprep.subr.bf16.mxu0 %v3898_v27  ;;  %4075 = vmatpush3.bf16.msra.mxu1 %v4074_v11 }
  0x7e   :  { %v5172_v8 = vpack.c.bf16 %v6891_v2, %v6890_v63  ;;  %v6896_v15 = vand.u32 4294901760, %v4794_v3  ;;  %v6897_v25 = vand.u32 4294901760, %v4798_v5  ;;  %v6898_v43 = vand.u32 4294901760, %v4800_v30  ;;  %4076 = vmatprep.subr.bf16.mxu1 %v6839_v44 }
  0x7f   :  { %v5178_v57 = vpack.c.bf16 %v6893_v19, %v6892_v18  ;;  %v5184_v47 = vpack.c.bf16 %v6895_v23, %v6894_v40  ;;  %v6899_v48 = vand.u32 4294901760, %v4804_v36  ;;  %v6900_v52 = vand.u32 4294901760, %v4808_v13 }
  0x80   :  { %v5190_v42 = vpack.c.bf16 %v6897_v25, %v6896_v15  ;;  %v6901_v20 = vand.u32 4294901760, %v4811_v35  ;;  %v6902_v27 = vand.u32 4294901760, %v4815_v7  ;;  %v6903_v11 = vand.u32 4294901760, %v4817_v62  ;;  %3901 = vmatpush1.bf16.msra.mxu0 %v3900_v26  ;;  %v6941_v26 = vld [vmem:[#allocation30_spill] sm:$0xff] }
  0x81   :  { %v5196_v50 = vpack.c.bf16 %v6899_v48, %v6898_v43  ;;  %v6905_v2 = vand.u32 4294901760, %v6862_v9  ;;  %v6906_v18 = vand.u32 4294901760, %v4826_v58  ;;  %v6908_v40 = vand.u32 4294901760, %v4830_v33  ;;  %3903 = vmatprep.subr.bf16.mxu0 %v3902_v34  ;;  %4078 = vmatpush3.bf16.msra.mxu1 %v4077_v6  ;;  %v6942_v34 = vld [vmem:[#allocation31_spill] sm:$0xff]  ;;  %v6943_v6 = vld [vmem:[#allocation32_spill] sm:$0xff] }
  0x82   :  { %v5202_v54 = vpack.c.bf16 %v6901_v20, %v6900_v52  ;;  %v5209_v63 = vpack.c.bf16 %v6903_v11, %v6902_v27  ;;  %v6909_v23 = vand.u32 4294901760, %v4833_v0  ;;  %v6911_v25 = vand.u32 4294901760, %v4837_v17  ;;  %4079 = vmatprep.subr.bf16.mxu1 %v6839_v44 }
  0x83   :  { %v5215_v19 = vpack.c.bf16 %v6906_v18, %v6905_v2  ;;  %v6912_v43 = vand.u32 4294901760, %v6863_v55  ;;  %v6914_v52 = vand.u32 4294901760, %v4845_v28  ;;  %v6915_v20 = vand.u32 4294901760, %v4847_v4  ;;  %v6917_v2 = vld [vmem:[#allocation40_spill] sm:$0xff] }
  0x84   :  { %6904 = vst [vmem:[#allocation33_spill] sm:$0xff] %v5209_v63  ;;  %v5221_v15 = vpack.c.bf16 %v6909_v23, %v6908_v40  ;;  %v6916_v11 = vand.u32 4294901760, %v4850_v46  ;;  %v6918_v18 = vand.u32 4294901760, %v6917_v2  ;;  %v6919_v40 = vld [vmem:[#allocation42_spill] sm:$0xff] }
  0x85   :  { %6907 = vst [vmem:[#allocation37_spill] sm:$0xff] %v5215_v19  ;;  %v5227_v48 = vpack.c.bf16 %v6912_v43, %v6911_v25  ;;  %v5233_v27 = vpack.c.bf16 %v6915_v20, %v6914_v52  ;;  %v6920_v23 = vand.u32 4294901760, %v6919_v40  ;;  %v6923_v25 = vld [vmem:[#allocation45_spill] sm:$0xff]  ;;  %v3904_v52 = vpack.c.bf16 %v4760_v14, %v4757_v10 }
  0x86   :  { %6910 = vst [vmem:[#allocation12_spill] sm:$0xff] %v5221_v15  ;;  %v5239_v61 = vpack.c.bf16 %v6918_v18, %v6916_v11  ;;  %v6921_v15 = vld [vmem:[#allocation43_spill] sm:$0xff]  ;;  %v6924_v43 = vand.u32 4294901760, %v6923_v25  ;;  %v3906_v20 = vpack.c.bf16 %v4766_v21, %v4764_v16  ;;  %v4080_v11 = vpack.c.bf16 %v4776_v38, %v4774_v37  ;;  %v6946_v18 = vld [vmem:[#allocation36_spill] sm:$0xff] }
  0x87   :  { %6913 = vst [vmem:[#allocation14_spill] sm:$0xff] %v5227_v48  ;;  %v6922_v19 = vand.u32 4294901760, %v6921_v15  ;;  %3905 = vmatpush1.bf16.msra.mxu0 %v3904_v52  ;;  %v4083_v10 = vpack.c.bf16 %v4798_v5, %v4794_v3  ;;  %v3912_v14 = vpack.c.bf16 %v4804_v36, %v4800_v30  ;;  %v3914_v16 = vpack.c.bf16 %v4811_v35, %v4808_v13  ;;  %v6929_v3 = vld [vmem:[#allocation15_spill] sm:$0xff]  ;;  %v6930_v5 = vld [vmem:[#allocation18_spill] sm:$0xff]  ;;  %v6931_v30 = vld [vmem:[#allocation20_spill] sm:$0xff] }
  0x88   :  { %v5249_v48 = vpack.c.bf16 %v403_v39, %v6924_v43  ;;  %3907 = vmatprep.subr.bf16.mxu0 %v3906_v20  ;;  %4081 = vmatpush3.bf16.msra.mxu1 %v4080_v11  ;;  %v3910_v39 = vpack.c.bf16 %v4790_v60, %v4786_v56  ;;  %v4086_v21 = vpack.c.bf16 %v4817_v62, %v4815_v7  ;;  %v6927_v56 = vld [vmem:[#allocation11_spill] sm:$0xff]  ;;  %v6928_v60 = vld [vmem:[#allocation13_spill] sm:$0xff]  ;;  %v6933_v13 = vld [vmem:[#allocation22_spill] sm:$0xff] }
  0x89   :  { %v5245_v63 = vpack.c.bf16 %v6922_v19, %v6920_v23  ;;  %v3908_v19 = vpack.c.bf16 %v4782_v53, %v4780_v51  ;;  %4082 = vmatprep.subr.bf16.mxu1 %v6839_v44  ;;  %v3916_v37 = vpack.c.bf16 %v4826_v58, %v6862_v9  ;;  %v3918_v38 = vpack.c.bf16 %v4833_v0, %v4830_v33  ;;  %v6925_v0 = vld [vmem:[#allocation47_spill] sm:$0xff]  ;;  %v6926_v53 = vld [vmem:[#allocation48_spill] sm:$0xff]  ;;  %v6932_v33 = vld [vmem:[#allocation21_spill] sm:$0xff] }
  0x8a   :  { %v4089_v36 = vpack.c.bf16 %v6863_v55, %v4837_v17  ;;  %v3920_v62 = vpack.c.bf16 %v4847_v4, %v4845_v28  ;;  %v3922_v7 = vpack.c.bf16 %v6917_v2, %v4850_v46  ;;  %v4092_v51 = vpack.c.bf16 %v6921_v15, %v6919_v40  ;;  %v6934_v35 = vld [vmem:[#allocation23_spill] sm:$0xff]  ;;  %v6935_v58 = vld [vmem:[#allocation24_spill] sm:$0xff]  ;;  %v6936_v28 = vld [vmem:[#allocation25_spill] sm:$0xff] }
  0x8b   :  { %3909 = vmatpush1.bf16.msra.mxu0 %v3908_v19  ;;  %v3924_v17 = vpack.c.bf16 %v6925_v0, %v6923_v25  ;;  %v6937_v4 = vld [vmem:[#allocation26_spill] sm:$0xff]  ;;  %v6938_v46 = vld [vmem:[#allocation27_spill] sm:$0xff]  ;;  %v6939_v55 = vld [vmem:[#allocation28_spill] sm:$0xff] }
  0x8c   :  { %3911 = vmatprep.subr.bf16.mxu0 %v3910_v39  ;;  %4084 = vmatpush3.bf16.msra.mxu1 %v4083_v10  ;;  %v6940_v9 = vld [vmem:[#allocation29_spill] sm:$0xff]  ;;  %v6944_v15 = vld [vmem:[#allocation34_spill] sm:$0xff]  ;;  %v6945_v2 = vld [vmem:[#allocation35_spill] sm:$0xff] }
  0x8d   :  { %4085 = vmatprep.subr.bf16.mxu1 %v6839_v44  ;;  %v6947_v40 = vld [vmem:[#allocation38_spill] sm:$0xff]  ;;  %v6948_v23 = vld [vmem:[#allocation39_spill] sm:$0xff]  ;;  %v6949_v25 = vld [vmem:[#allocation41_spill] sm:$0xff] }
  0x8e   :  { %v6950_v43 = vld [vmem:[#allocation44_spill] sm:$0xff]  ;;  %v6951_v52 = vld [vmem:[#allocation49_spill] sm:$0xff]  ;;  %v5475_v0 = vld [vmem:[#allocation5 + $0x1e8] sm:$0xff] }
  0x8f   :  { %3913 = vmatpush1.bf16.msra.mxu0 %v3912_v14  ;;  %v5437_v20 = vld [vmem:[#allocation5 + $0x1d0] sm:$0xff]  ;;  %v5450_v14 = vld [vmem:[#allocation5 + $0x1c8] sm:$0xff] }
  0x90   :  { %3915 = vmatprep.subr.bf16.mxu0 %v3914_v16  ;;  %4087 = vmatpush3.bf16.msra.mxu1 %v4086_v21  ;;  %v6670_v39 = vand.u32 4294901760, %v5437_v20  ;;  %v5448_v10 = vld [vmem:[#allocation5 + $0x1b0] sm:$0xff]  ;;  %v5452_v16 = vld [vmem:[#allocation5 + $0x1c0] sm:$0xff] }
  0x91   :  { %4088 = vmatprep.subr.bf16.mxu1 %v6839_v44  ;;  %v6667_v21 = vand.u32 4294901760, %v5448_v10 }
  0x93   :  { %3917 = vmatpush1.bf16.msra.mxu0 %v3916_v37  ;;  %v6666_v37 = vand.u32 4294901760, %v5450_v14 }
  0x94   :  { %3919 = vmatprep.subr.bf16.mxu0 %v3918_v38  ;;  %4090 = vmatpush3.bf16.msra.mxu1 %v4089_v36  ;;  %v5457_v38 = vld [vmem:[#allocation5 + $0x1d8] sm:$0xff]  ;;  %v6663_v36 = vand.u32 4294901760, %v5452_v16 }
  0x95   :  { %4091 = vmatprep.subr.bf16.mxu1 %v6839_v44 }
  0x97   :  { %3921 = vmatpush1.bf16.msra.mxu0 %v3920_v62 }
  0x98   :  { %3923 = vmatprep.subr.bf16.mxu0 %v3922_v7  ;;  %4093 = vmatpush3.bf16.msra.mxu1 %v4092_v51  ;;  %v6662_v7 = vand.u32 4294901760, %v5457_v38  ;;  %v5473_v51 = vpack.c.bf16 %v6666_v37, %v6667_v21  ;;  %v5608_v21 = vld [vmem:[#allocation5 + $0x270] sm:$0xff] }
  0x99   :  { %4094 = vmatprep.subr.bf16.mxu1 %v6839_v44 }
  0x9a   :  { %6961 = vst [vmem:[#allocation42_spill] sm:$0xff] %v5473_v51 }
  0x9b   :  { %3925 = vmatpush1.bf16.msra.mxu0 %v3924_v17  ;;  %3513 = vmatmul.mubr.f32.vlgmr.msra.gmra.mrb[0].mxu1 %v6926_v53  ;;  %v5477_v17 = vld [vmem:[#allocation5 + $0x200] sm:$0xff] }
  0x9c   :  { %3927 = vmatprep.subr.bf16.mxu0 %v6927_v56  ;;  %4096 = vmatpush3.bf16.msra.mxu1 %v6928_v60 }
  0x9d   :  { %4097 = vmatprep.subr.bf16.mxu1 %v6839_v44  ;;  %3547 = vmatprep.mubr.msk.f32.mxu1 %vm4641_vm0, %v6861_v41 }
  0x9e   :  { %578 = vmatmul.mubr.f32.vlgmr.msra.gmra.mrb[0].mxu0 %v6926_v53  ;;  %v5484_v53 = vpack.c.bf16 %v6662_v7, %v6663_v36  ;;  %v5595_v7 = vld [vmem:[#allocation5 + $0x278] sm:$0xff]  ;;  %v5597_v36 = vld [vmem:[#allocation5 + $0x290] sm:$0xff] }
  0x9f   :  { %3929 = vmatpush1.bf16.msra.mxu0 %v6929_v3  ;;  %680 = vmatprep.mubr.f32.mxu0 %v6861_v41  ;;  %v6679_v37 = vand.u32 4294901760, %v5597_v36 }
  0xa0   :  { %3931 = vmatprep.subr.bf16.mxu0 %v6930_v5  ;;  %4099 = vmatpush3.bf16.msra.mxu1 %v6931_v30  ;;  %6962 = vst [vmem:[#allocation43_spill] sm:$0xff] %v5484_v53 }
  0xa1   :  { %4100 = vmatprep.subr.bf16.mxu1 %v6839_v44 }
  0xa3   :  { %3933 = vmatpush1.bf16.msra.mxu0 %v6932_v33 }
  0xa4   :  { %3935 = vmatprep.subr.bf16.mxu0 %v6933_v13  ;;  %4102 = vmatpush3.bf16.msra.mxu1 %v6934_v35 }
  0xa5   :  { %4103 = vmatprep.subr.bf16.mxu1 %v6839_v44 }
  0xa7   :  { %3937 = vmatpush1.bf16.msra.mxu0 %v6935_v58 }
  0xa8   :  { %3939 = vmatprep.subr.bf16.mxu0 %v6936_v28  ;;  %4105 = vmatpush3.bf16.msra.mxu1 %v6937_v4 }
  0xa9   :  { %4106 = vmatprep.subr.bf16.mxu1 %v6839_v44 }
  0xab   :  { %3941 = vmatpush1.bf16.msra.mxu0 %v6938_v46 }
  0xac   :  { %3943 = vmatprep.subr.bf16.mxu0 %v6939_v55  ;;  %4108 = vmatpush3.bf16.msra.mxu1 %v6940_v9 }
  0xad   :  { %4109 = vmatprep.subr.bf16.mxu1 %v6839_v44 }
  0xaf   :  { %3945 = vmatpush1.bf16.msra.mxu0 %v6941_v26 }
  0xb0   :  { %3947 = vmatprep.subr.bf16.mxu0 %v6942_v34  ;;  %4111 = vmatpush3.bf16.msra.mxu1 %v6943_v6 }
  0xb1   :  { %4112 = vmatprep.subr.bf16.mxu1 %v6839_v44 }
  0xb3   :  { %3949 = vmatpush1.bf16.msra.mxu0 %v6944_v15 }
  0xb4   :  { %3951 = vmatprep.subr.bf16.mxu0 %v6945_v2  ;;  %4114 = vmatpush3.bf16.msra.mxu1 %v6946_v18 }
  0xb5   :  { %4115 = vmatprep.subr.bf16.mxu1 %v6839_v44 }
  0xb7   :  { %3953 = vmatpush1.bf16.msra.mxu0 %v6947_v40 }
  0xb8   :  { %3955 = vmatprep.subr.bf16.mxu0 %v6948_v23  ;;  %4117 = vmatpush3.bf16.msra.mxu1 %v6949_v25 }
  0xb9   :  { %4118 = vmatprep.subr.bf16.mxu1 %v6839_v44 }
  0xbb   :  { %3957 = vmatpush1.bf16.msra.mxu0 %v6950_v43  ;;  %3548 = vmatmul.mubr.f32.vlgmr.msra.gmra.mrb[0].mxu1 %v6951_v52 }
  0xbc   :  { %3959 = vmatprep.subr.bf16.mxu0 %v5107_v29  ;;  %4120 = vmatpush3.bf16.msra.mxu1 %v5113_v31  ;;  %v6952_v31 = vld [vmem:[#allocation33_spill] sm:$0xff]  ;;  %v6954_v29 = vld [vmem:[#allocation12_spill] sm:$0xff] }
  0xbd   :  { %4121 = vmatprep.subr.bf16.mxu1 %v6839_v44  ;;  %3582 = vmatprep.mubr.msk.f32.mxu1 %vm4641_vm0, %v6861_v41 }
  0xbe   :  { %684 = vmatmul.mubr.f32.vlgmr.msra.gmra.mrb[0].mxu0 %v6951_v52 }
  0xbf   :  { %3961 = vmatpush1.bf16.msra.mxu0 %v5119_v49  ;;  %850 = vmatprep.mubr.f32.mxu0 %v6861_v41  ;;  %v6953_v49 = vld [vmem:[#allocation37_spill] sm:$0xff] }
  0xc0   :  { %3963 = vmatprep.subr.bf16.mxu0 %v5128_v45  ;;  %4123 = vmatpush3.bf16.msra.mxu1 %v5134_v12  ;;  %v6955_v45 = vld [vmem:[#allocation14_spill] sm:$0xff] }
  0xc1   :  { %4124 = vmatprep.subr.bf16.mxu1 %v6839_v44  ;;  %v6956_v12 = vld [vmem:[#allocation46_spill] sm:$0xff] }
  0xc3   :  { %3965 = vmatpush1.bf16.msra.mxu0 %v5140_v24  ;;  %v5407_v24 = vld [vmem:[#allocation5 + $0x1a0] sm:$0xff] }
  0xc4   :  { %3967 = vmatprep.subr.bf16.mxu0 %v5147_v1  ;;  %4126 = vmatpush3.bf16.msra.mxu1 %v5153_v22  ;;  %v6678_v22 = vand.u32 4294901760, %v5407_v24 }
  0xc5   :  { %4127 = vmatprep.subr.bf16.mxu1 %v6839_v44 }
  0xc7   :  { %3969 = vmatpush1.bf16.msra.mxu0 %v5159_v59  ;;  %v5411_v59 = vld [vmem:[#allocation5 + $0x180] sm:$0xff] }
  0xc8   :  { %3971 = vmatprep.subr.bf16.mxu0 %v5165_v32  ;;  %4129 = vmatpush3.bf16.msra.mxu1 %v5172_v8  ;;  %v5413_v32 = vld [vmem:[#allocation5 + $0x198] sm:$0xff]  ;;  %v5415_v8 = vld [vmem:[#allocation5 + $0x190] sm:$0xff] }
  0xc9   :  { %4130 = vmatprep.subr.bf16.mxu1 %v6839_v44 }
  0xcb   :  { %3973 = vmatpush1.bf16.msra.mxu0 %v5178_v57  ;;  %v6677_v57 = vand.u32 4294901760, %v5411_v59 }
  0xcc   :  { %3975 = vmatprep.subr.bf16.mxu0 %v5184_v47  ;;  %4132 = vmatpush3.bf16.msra.mxu1 %v5190_v42  ;;  %v6676_v47 = vand.u32 4294901760, %v5413_v32  ;;  %v5419_v42 = vld [vmem:[#allocation5 + $0x1a8] sm:$0xff] }
  0xcd   :  { %4133 = vmatprep.subr.bf16.mxu1 %v6839_v44 }
  0xcf   :  { %3977 = vmatpush1.bf16.msra.mxu0 %v5196_v50  ;;  %v6675_v50 = vand.u32 4294901760, %v5415_v8 }
  0xd0   :  { %3979 = vmatprep.subr.bf16.mxu0 %v5202_v54  ;;  %4135 = vmatpush3.bf16.msra.mxu1 %v6952_v31 }
  0xd1   :  { %4136 = vmatprep.subr.bf16.mxu1 %v6839_v44 }
  0xd3   :  { %3981 = vmatpush1.bf16.msra.mxu0 %v6953_v49 }
  0xd4   :  { %3983 = vmatprep.subr.bf16.mxu0 %v6954_v29  ;;  %4138 = vmatpush3.bf16.msra.mxu1 %v6955_v45  ;;  %v5555_v29 = vld [vmem:[#allocation5 + $0x248] sm:$0xff]  ;;  %v5557_v45 = vld [vmem:[#allocation5 + $0x260] sm:$0xff] }
  0xd5   :  { %4139 = vmatprep.subr.bf16.mxu1 %v6839_v44 }
  0xd7   :  { %3985 = vmatpush1.bf16.msra.mxu0 %v5233_v27  ;;  %v5435_v27 = vld [vmem:[#allocation5 + $0x1b8] sm:$0xff] }
  0xd8   :  { %3987 = vmatprep.subr.bf16.mxu0 %v5239_v61  ;;  %4141 = vmatpush3.bf16.msra.mxu1 %v5245_v63  ;;  %v5405_v61 = vld [vmem:[#allocation5 + $0x188] sm:$0xff]  ;;  %v6672_v63 = vand.u32 4294901760, %v5419_v42  ;;  %v6671_v19 = vand.u32 4294901760, %v5435_v27 }
  0xd9   :  { %4142 = vmatprep.subr.bf16.mxu1 %v6839_v44  ;;  %v6681_v1 = vand.u32 4294901760, %v5405_v61 }
  0xda   :  { %v5444_v11 = vpack.c.bf16 %v6672_v63, %v6675_v50  ;;  %v5465_v62 = vpack.c.bf16 %v6670_v39, %v6671_v19  ;;  %v6685_v39 = vand.u32 4294901760, %v5608_v21  ;;  %v5617_v63 = vld [vmem:[#allocation5 + $0x298] sm:$0xff] }
  0xdb   :  { %3989 = vmatpush1.bf16.msra.mxu0 %v5249_v48  ;;  %3583 = vmatmul.mubr.f32.vlgmr.msra.gmra.mrb[0].mxu1 %v6956_v12  ;;  %v5426_v54 = vpack.c.bf16 %v6678_v22, %v6681_v1  ;;  %v5433_v48 = vpack.c.bf16 %v6676_v47, %v6677_v57  ;;  %v6692_v50 = vand.u32 4294901760, %v5617_v63  ;;  %v5635_v57 = vld [vmem:[#allocation5 + $0x2a8] sm:$0xff]  ;;  %v5637_v22 = vld [vmem:[#allocation5 + $0x2c0] sm:$0xff] }
  0xdc   :  { %3991 = vmatprep.subr.bf16.mxu0 %v6927_v56  ;;  %4144 = vmatpush3.bf16.msra.mxu1 %v6928_v60  ;;  %6959 = vst [vmem:[#allocation19_spill] sm:$0xff] %v5444_v11  ;;  %6960 = vst [vmem:[#allocation40_spill] sm:$0xff] %v5465_v62  ;;  %v6661_v56 = vand.u32 4294901760, %v5475_v0  ;;  %v6660_v60 = vand.u32 4294901760, %v5477_v17  ;;  %v1732_v1 = vand.u32 4294901760, %v5637_v22 }
  0xdd   :  { %4145 = vmatprep.subr.bf16.mxu1 %v6839_v44  ;;  %3617 = vmatprep.mubr.msk.f32.mxu1 %vm4641_vm0, %v6861_v41  ;;  %6957 = vst [vmem:[#allocation16_spill] sm:$0xff] %v5426_v54  ;;  %6958 = vst [vmem:[#allocation17_spill] sm:$0xff] %v5433_v48 }
  0xde   :  { %852 = vmatmul.mubr.f32.vlgmr.msra.gmra.mrb[0].mxu0 %v6956_v12 }
  0xdf   :  { %3993 = vmatpush1.bf16.msra.mxu0 %v6929_v3  ;;  %954 = vmatprep.mubr.f32.mxu0 %v6861_v41  ;;  %v5488_v3 = vld [vmem:[#allocation5 + $0x1e0] sm:$0xff] }
  0xe0   :  { %3995 = vmatprep.subr.bf16.mxu0 %v6930_v5  ;;  %4147 = vmatpush3.bf16.msra.mxu1 %v6931_v30  ;;  %v5490_v5 = vld [vmem:[#allocation5 + $0x1f8] sm:$0xff]  ;;  %v5492_v30 = vld [vmem:[#allocation5 + $0x1f0] sm:$0xff] }
  0xe1   :  { %4148 = vmatprep.subr.bf16.mxu1 %v6839_v44 }
  0xe3   :  { %3997 = vmatpush1.bf16.msra.mxu0 %v6932_v33  ;;  %v6657_v33 = vand.u32 4294901760, %v5488_v3 }
  0xe4   :  { %3999 = vmatprep.subr.bf16.mxu0 %v6933_v13  ;;  %4150 = vmatpush3.bf16.msra.mxu1 %v6934_v35  ;;  %v6656_v13 = vand.u32 4294901760, %v5490_v5  ;;  %v5497_v35 = vld [vmem:[#allocation5 + $0x208] sm:$0xff] }
  0xe5   :  { %4151 = vmatprep.subr.bf16.mxu1 %v6839_v44 }
  0xe7   :  { %4001 = vmatpush1.bf16.msra.mxu0 %v6935_v58  ;;  %v6655_v58 = vand.u32 4294901760, %v5492_v30 }
  0xe8   :  { %4003 = vmatprep.subr.bf16.mxu0 %v6936_v28  ;;  %4153 = vmatpush3.bf16.msra.mxu1 %v6937_v4  ;;  %v5505_v28 = vpack.c.bf16 %v6660_v60, %v6661_v56  ;;  %v6652_v4 = vand.u32 4294901760, %v5497_v35 }
  0xe9   :  { %4154 = vmatprep.subr.bf16.mxu1 %v6839_v44 }
  0xea   :  { %6963 = vst [vmem:[#allocation45_spill] sm:$0xff] %v5505_v28 }
  0xeb   :  { %4005 = vmatpush1.bf16.msra.mxu0 %v6938_v46  ;;  %v5513_v46 = vpack.c.bf16 %v6656_v13, %v6657_v33  ;;  %v5577_v33 = vld [vmem:[#allocation5 + $0x268] sm:$0xff] }
  0xec   :  { %4007 = vmatprep.subr.bf16.mxu0 %v6939_v55  ;;  %4156 = vmatpush3.bf16.msra.mxu1 %v6940_v9  ;;  %v5515_v55 = vld [vmem:[#allocation5 + $0x218] sm:$0xff]  ;;  %v5517_v9 = vld [vmem:[#allocation5 + $0x230] sm:$0xff]  ;;  %v6673_v60 = vand.u32 4294901760, %v5577_v33 }
  0xed   :  { %4157 = vmatprep.subr.bf16.mxu1 %v6839_v44  ;;  %6964 = vst [vmem:[#allocation47_spill] sm:$0xff] %v5513_v46 }
  0xef   :  { %4009 = vmatpush1.bf16.msra.mxu0 %v6941_v26  ;;  %v5524_v26 = vpack.c.bf16 %v6652_v4, %v6655_v58  ;;  %v5568_v4 = vld [vmem:[#allocation5 + $0x240] sm:$0xff] }
  0xf0   :  { %4011 = vmatprep.subr.bf16.mxu0 %v6942_v34  ;;  %4159 = vmatpush3.bf16.msra.mxu1 %v6943_v6  ;;  %v6651_v34 = vand.u32 4294901760, %v5515_v55  ;;  %v6650_v6 = vand.u32 4294901760, %v5517_v9  ;;  %v6669_v58 = vand.u32 4294901760, %v5568_v4 }
  0xf1   :  { %4160 = vmatprep.subr.bf16.mxu1 %v6839_v44  ;;  %6965 = vst [vmem:[#allocation48_spill] sm:$0xff] %v5524_v26 }
  0xf2   :  { %v5545_v52 = vpack.c.bf16 %v6650_v6, %v6651_v34  ;;  %v6665_v6 = vand.u32 4294901760, %v5555_v29  ;;  %v6664_v34 = vand.u32 4294901760, %v5557_v45 }
  0xf3   :  { %4013 = vmatpush1.bf16.msra.mxu0 %v6944_v15  ;;  %v5528_v15 = vld [vmem:[#allocation5 + $0x210] sm:$0xff] }
  0xf4   :  { %4015 = vmatprep.subr.bf16.mxu0 %v6945_v2  ;;  %4162 = vmatpush3.bf16.msra.mxu1 %v6946_v18  ;;  %v5530_v2 = vld [vmem:[#allocation5 + $0x228] sm:$0xff]  ;;  %v5532_v18 = vld [vmem:[#allocation5 + $0x220] sm:$0xff]  ;;  %6966 = vst [vmem:[#allocation11_spill] sm:$0xff] %v5545_v52 }
  0xf5   :  { %4163 = vmatprep.subr.bf16.mxu1 %v6839_v44 }
  0xf7   :  { %4017 = vmatpush1.bf16.msra.mxu0 %v6947_v40  ;;  %v6654_v40 = vand.u32 4294901760, %v5528_v15 }
  0xf8   :  { %4019 = vmatprep.subr.bf16.mxu0 %v6948_v23  ;;  %4165 = vmatpush3.bf16.msra.mxu1 %v6949_v25  ;;  %v6653_v23 = vand.u32 4294901760, %v5530_v2  ;;  %v5537_v25 = vld [vmem:[#allocation5 + $0x238] sm:$0xff] }
  0xf9   :  { %4358 = vmatprep.subr.bf16.mxu1 %v6839_v44  ;;  %v6658_v31 = vand.u32 4294901760, %v5537_v25 }
  0xfa   :  { %v5553_v49 = vpack.c.bf16 %v6653_v23, %v6654_v40  ;;  %v5570_v23 = vld [vmem:[#allocation5 + $0x258] sm:$0xff]  ;;  %v5572_v40 = vld [vmem:[#allocation5 + $0x250] sm:$0xff] }
  0xfb   :  { %4021 = vmatpush1.bf16.msra.mxu0 %v6950_v43  ;;  %3618 = vmatmul.mubr.f32.vlgmr.msra.gmra.mrb[0].mxu1 %v6956_v12  ;;  %v6659_v43 = vand.u32 4294901760, %v5532_v18  ;;  %v6668_v13 = vand.u32 4294901760, %v5570_v23 }
  0xfc   :  { %3652 = vmatprep.mubr.msk.f32.mxu1 %vm4641_vm0, %v6861_v41  ;;  %4167 = vmatprep.subr.bf16.mxu0 %v5426_v54  ;;  %6967 = vst [vmem:[#allocation13_spill] sm:$0xff] %v5553_v49 }
  0xfd   :  { %4360 = vmatpush3.bf16.msra.mxu1 %v5444_v11  ;;  %v5593_v56 = vpack.c.bf16 %v6668_v13, %v6669_v58  ;;  %v5610_v13 = vld [vmem:[#allocation5 + $0x288] sm:$0xff]  ;;  %v5612_v58 = vld [vmem:[#allocation5 + $0x280] sm:$0xff]  ;;  %v6986_v11 = vand.u32 4294901760, %v5448_v10 }
  0xfe   :  { %956 = vmatmul.mubr.f32.vlgmr.msra.gmra.mrb[0].mxu0 %v6956_v12  ;;  %4361 = vmatprep.subr.bf16.mxu1 %v6839_v44  ;;  %v5564_v12 = vpack.c.bf16 %v6658_v31, %v6659_v43  ;;  %v6674_v31 = vand.u32 4294901760, %v5572_v40  ;;  %v5585_v43 = vpack.c.bf16 %v6664_v34, %v6665_v6  ;;  %v6680_v6 = vand.u32 4294901760, %v5595_v7 }
  0xff   :  { %1776 = vmatprep.mubr.f32.mxu0 %v6861_v41  ;;  %4169 = vmatpush1.bf16.msra.mxu0 %v5433_v48  ;;  %6970 = vst [vmem:[#allocation20_spill] sm:$0xff] %v5593_v56  ;;  %v6684_v19 = vand.u32 4294901760, %v5610_v13  ;;  %v6987_v48 = vand.u32 4294901760, %v5450_v14  ;;  %v6988_v41 = vand.u32 4294901760, %v5452_v16 }
 0x100   :  { %4171 = vmatprep.subr.bf16.mxu0 %v5465_v62  ;;  %6968 = vst [vmem:[#allocation15_spill] sm:$0xff] %v5564_v12  ;;  %6969 = vst [vmem:[#allocation18_spill] sm:$0xff] %v5585_v43  ;;  %v5604_v34 = vpack.c.bf16 %v6673_v60, %v6674_v31  ;;  %v6693_v60 = vand.u32 4294901760, %v5612_v58  ;;  %v5625_v31 = vpack.c.bf16 %v6679_v37, %v6680_v6  ;;  %v1728_v6 = vand.u32 4294901760, %v5635_v57 }
 0x101   :  { %4363 = vmatpush3.bf16.msra.mxu1 %v5484_v53  ;;  %v5633_v47 = vpack.c.bf16 %v6684_v19, %v6685_v39  ;;  %v5650_v19 = vld [vmem:[#allocation5 + $0x2b8] sm:$0xff]  ;;  %v5652_v39 = vld [vmem:[#allocation5 + $0x2b0] sm:$0xff]  ;;  %v6979_v53 = vand.u32 4294901760, %v5413_v32  ;;  %v5715_v54 = vsub.f32 %v5450_v14, %v6987_v48 }
 0x102   :  { %4364 = vmatprep.subr.bf16.mxu1 %v6839_v44  ;;  %6971 = vst [vmem:[#allocation21_spill] sm:$0xff] %v5604_v34  ;;  %6972 = vst [vmem:[#allocation22_spill] sm:$0xff] %v5625_v31  ;;  %v5644_v37 = vpack.c.bf16 %v6692_v50, %v6693_v60  ;;  %v2572_v50 = vand.u32 4294901760, %v5652_v39  ;;  %v6975_v60 = vand.u32 4294901760, %v5405_v61 }
 0x103   :  { %4173 = vmatpush1.bf16.msra.mxu0 %v5473_v51  ;;  %6973 = vst [vmem:[#allocation23_spill] sm:$0xff] %v5633_v47  ;;  %v1657_v51 = vld [vmem:[#allocation5 + $0x2d8] sm:$0xff] }
 0x104   :  { %4175 = vmatprep.subr.bf16.mxu0 %v5505_v28  ;;  %6974 = vst [vmem:[#allocation24_spill] sm:$0xff] %v5644_v37 }
 0x105   :  { %4366 = vmatpush3.bf16.msra.mxu1 %v5524_v26 }
 0x106   :  { %4367 = vmatprep.subr.bf16.mxu1 %v6839_v44 }
 0x107   :  { %4177 = vmatpush1.bf16.msra.mxu0 %v5513_v46  ;;  %v6978_v46 = vand.u32 4294901760, %v5411_v59 }
 0x108   :  { %4179 = vmatprep.subr.bf16.mxu0 %v5545_v52 }
 0x109   :  { %4369 = vmatpush3.bf16.msra.mxu1 %v5564_v12  ;;  %v5661_v12 = vsub.f32 %v5405_v61, %v6975_v60  ;;  %v5674_v28 = vsub.f32 %v5411_v59, %v6978_v46  ;;  %v5679_v61 = vsub.f32 %v5413_v32, %v6979_v53  ;;  %v6980_v60 = vand.u32 4294901760, %v5415_v8  ;;  %v1660_v59 = vld [vmem:[#allocation5 + $0x2f0] sm:$0xff] }
 0x10a   :  { %4370 = vmatprep.subr.bf16.mxu1 %v6839_v44  ;;  %v1736_v53 = vand.u32 4294901760, %v1657_v51  ;;  %v1740_v62 = vand.u32 4294901760, %v1660_v59 }
 0x10b   :  { %4181 = vmatpush1.bf16.msra.mxu0 %v5553_v49  ;;  %v6976_v49 = vand.u32 4294901760, %v5407_v24 }
 0x10c   :  { %4183 = vmatprep.subr.bf16.mxu0 %v5585_v43  ;;  %v1655_v43 = vld [vmem:[#allocation5 + $0x2c8] sm:$0xff] }
 0x10d   :  { %4372 = vmatpush3.bf16.msra.mxu1 %v5604_v34  ;;  %v5648_v34 = vld [vmem:[#allocation5 + $0x2a0] sm:$0xff]  ;;  %v5666_v52 = vsub.f32 %v5407_v24, %v6976_v49  ;;  %v2575_v26 = vand.u32 4294901760, %v1655_v43  ;;  %v5684_v24 = vsub.f32 %v5415_v8, %v6980_v60  ;;  %v6981_v49 = vand.u32 4294901760, %v5419_v42 }
 0x10e   :  { %4373 = vmatprep.subr.bf16.mxu1 %v6839_v44  ;;  %v6984_v8 = vand.u32 4294901760, %v5435_v27 }
 0x10f   :  { %4185 = vmatpush1.bf16.msra.mxu0 %v5593_v56  ;;  %v1734_v56 = vand.u32 4294901760, %v5650_v19  ;;  %v5695_v32 = vpack.c.bf16 %v2575_v26, %v2572_v50 }
 0x110   :  { %4187 = vmatprep.subr.bf16.mxu0 %v5625_v31  ;;  %v1730_v31 = vand.u32 4294901760, %v5648_v34  ;;  %v5700_v60 = vsub.f32 %v5435_v27, %v6984_v8  ;;  %v5720_v27 = vsub.f32 %v5452_v16, %v6988_v41  ;;  %v6989_v8 = vand.u32 4294901760, %v5457_v38 }
 0x111   :  { %4375 = vmatpush3.bf16.msra.mxu1 %v5644_v37  ;;  %v5689_v37 = vsub.f32 %v5419_v42, %v6981_v49  ;;  %6983 = vst [vmem:[#allocation27_spill] sm:$0xff] %v5695_v32  ;;  %v6985_v42 = vand.u32 4294901760, %v5437_v20  ;;  %v6992_v41 = vand.u32 4294901760, %v5488_v3  ;;  %v6993_v16 = vand.u32 4294901760, %v5490_v5 }
 0x112   :  { %4376 = vmatprep.subr.bf16.mxu1 %v6839_v44  ;;  %v5693_v46 = vpack.c.bf16 %v1734_v56, %v1730_v31 }
 0x113   :  { %4189 = vmatpush1.bf16.msra.mxu0 %v5633_v47  ;;  %v5669_v47 = vpack.c.bf16 %v1732_v1, %v1728_v6  ;;  %v5705_v49 = vsub.f32 %v5437_v20, %v6985_v42  ;;  %v5725_v20 = vsub.f32 %v5457_v38, %v6989_v8  ;;  %v6990_v42 = vand.u32 4294901760, %v5475_v0 }
 0x114   :  { %6982 = vst [vmem:[#allocation26_spill] sm:$0xff] %v5693_v46  ;;  %v5741_v14 = vsub.f32 %v5488_v3, %v6992_v41  ;;  %v5746_v38 = vsub.f32 %v5490_v5, %v6993_v16  ;;  %v6996_v3 = vand.u32 4294901760, %v5515_v55  ;;  %v6997_v5 = vand.u32 4294901760, %v5517_v9 }
 0x115   :  { %6977 = vst [vmem:[#allocation25_spill] sm:$0xff] %v5669_v47  ;;  %4191 = vmatprep.subr.bf16.mxu0 %v5669_v47  ;;  %v5710_v47 = vsub.f32 %v5448_v10, %v6986_v11  ;;  %v5730_v11 = vsub.f32 %v5475_v0, %v6990_v42  ;;  %v6991_v10 = vand.u32 4294901760, %v5477_v17  ;;  %v6994_v0 = vand.u32 4294901760, %v5492_v30  ;;  %4378 = vmatpush3.bf16.msra.mxu1 %v5695_v32 }
 0x116   :  { %v5767_v41 = vsub.f32 %v5517_v9, %v6997_v5  ;;  %4379 = vmatprep.subr.bf16.mxu1 %v6839_v44  ;;  %v7001_v9 = vand.u32 4294901760, %v5537_v25  ;;  %v7012_v32 = vand.u32 4294901760, %v5612_v58 }
 0x117   :  { %v5735_v48 = vsub.f32 %v5477_v17, %v6991_v10  ;;  %4193 = vmatpush1.bf16.msra.mxu0 %v5693_v46  ;;  %v5751_v8 = vsub.f32 %v5492_v30, %v6994_v0  ;;  %v6995_v17 = vand.u32 4294901760, %v5497_v35  ;;  %v5762_v10 = vsub.f32 %v5515_v55, %v6996_v3 }
 0x118   :  { %v6998_v30 = vand.u32 4294901760, %v5528_v15  ;;  %v7000_v55 = vand.u32 4294901760, %v5532_v18  ;;  %v5788_v3 = vsub.f32 %v5537_v25, %v7001_v9  ;;  %v7006_v9 = vand.u32 4294901760, %v5572_v40 }
 0x119   :  { %v5756_v42 = vsub.f32 %v5497_v35, %v6995_v17  ;;  %v6999_v35 = vand.u32 4294901760, %v5530_v2  ;;  %v5857_v46 = vsub.f32 %v5648_v34, %v1730_v31  ;;  %v6733_v34 = vand.u32 4294901760, %v5661_v12 }
 0x11a   :  { %v5772_v16 = vsub.f32 %v5528_v15, %v6998_v30  ;;  %v5783_v17 = vsub.f32 %v5532_v18, %v7000_v55  ;;  %v7002_v15 = vand.u32 4294901760, %v5555_v29  ;;  %v7005_v55 = vand.u32 4294901760, %v5570_v23 }
 0x11b   :  { %v5777_v0 = vsub.f32 %v5530_v2, %v6999_v35  ;;  %v7003_v2 = vand.u32 4294901760, %v5557_v45  ;;  %v7004_v35 = vand.u32 4294901760, %v5568_v4  ;;  %7018 = vst [vmem:[#allocation32_spill] sm:$0xff] %v5857_v46 }
 0x11c   :  { %v5793_v5 = vsub.f32 %v5555_v29, %v7002_v15  ;;  %v5808_v25 = vsub.f32 %v5570_v23, %v7005_v55  ;;  %v5813_v29 = vsub.f32 %v5572_v40, %v7006_v9  ;;  %v7007_v15 = vand.u32 4294901760, %v5577_v33 }
 0x11d   :  { %v5798_v30 = vsub.f32 %v5557_v45, %v7003_v2  ;;  %v5803_v18 = vsub.f32 %v5568_v4, %v7004_v35  ;;  %v7008_v2 = vand.u32 4294901760, %v5595_v7  ;;  %v7009_v35 = vand.u32 4294901760, %v5597_v36 }
 0x11e   :  { %v5818_v45 = vsub.f32 %v5577_v33, %v7007_v15  ;;  %v7010_v55 = vand.u32 4294901760, %v5608_v21  ;;  %v7011_v9 = vand.u32 4294901760, %v5610_v13  ;;  %v1656_v15 = vld [vmem:[#allocation5 + $0x2d0] sm:$0xff] }
 0x11f   :  { %v5823_v4 = vsub.f32 %v5595_v7, %v7008_v2  ;;  %v5828_v23 = vsub.f32 %v5597_v36, %v7009_v35  ;;  %v5843_v7 = vsub.f32 %v5612_v58, %v7012_v32  ;;  %v7014_v2 = vand.u32 4294901760, %v5617_v63 }
 0x120   :  { %v5833_v40 = vsub.f32 %v5608_v21, %v7010_v55  ;;  %v5838_v33 = vsub.f32 %v5610_v13, %v7011_v9  ;;  %v5851_v35 = vsub.f32 %v5635_v57, %v1728_v6  ;;  %v5854_v21 = vsub.f32 %v5637_v22, %v1732_v1  ;;  %v1659_v55 = vld [vmem:[#allocation5 + $0x2e8] sm:$0xff]  ;;  %v1658_v13 = vld [vmem:[#allocation5 + $0x2e0] sm:$0xff]  ;;  %v1661_v9 = vld [vmem:[#allocation5 + $0x2f8] sm:$0xff] }
 0x121   :  { %7013 = vst [vmem:[#allocation28_spill] sm:$0xff] %v5843_v7  ;;  %v5848_v36 = vsub.f32 %v5617_v63, %v7014_v2  ;;  %v5860_v58 = vsub.f32 %v5650_v19, %v1734_v56  ;;  %v5863_v32 = vsub.f32 %v5652_v39, %v2572_v50  ;;  %v5865_v63 = vsub.f32 %v1655_v43, %v2575_v26 }
 0x122   :  { %7016 = vst [vmem:[#allocation30_spill] sm:$0xff] %v5851_v35  ;;  %7017 = vst [vmem:[#allocation31_spill] sm:$0xff] %v5854_v21  ;;  %v5867_v2 = vpack.c.bf16 %v1740_v62, %v1736_v53  ;;  %v5869_v57 = vsub.f32 %v1657_v51, %v1736_v53  ;;  %v5871_v1 = vsub.f32 %v1660_v59, %v1740_v62  ;;  %v1738_v22 = vand.u32 4294901760, %v1656_v15 }
 0x123   :  { %7015 = vst [vmem:[#allocation29_spill] sm:$0xff] %v5848_v36  ;;  %7019 = vst [vmem:[#allocation34_spill] sm:$0xff] %v5860_v58  ;;  %v1742_v6 = vand.u32 4294901760, %v1659_v55  ;;  %v2578_v21 = vand.u32 4294901760, %v1658_v13  ;;  %v2581_v35 = vand.u32 4294901760, %v1661_v9  ;;  %v6732_v50 = vand.u32 4294901760, %v5666_v52 }
 0x124   :  { %7020 = vst [vmem:[#allocation35_spill] sm:$0xff] %v5863_v32  ;;  %7021 = vst [vmem:[#allocation36_spill] sm:$0xff] %v5865_v63  ;;  %4195 = vmatprep.subr.bf16.mxu0 %v5867_v2  ;;  %v5875_v19 = vsub.f32 %v1656_v15, %v1738_v22  ;;  %v6731_v39 = vand.u32 4294901760, %v5674_v28  ;;  %v6734_v56 = vand.u32 4294901760, %v5679_v61  ;;  %v1791_v59 = vsub.f32 %v5661_v12, %v6733_v34 }
 0x125   :  { %7022 = vst [vmem:[#allocation38_spill] sm:$0xff] %v5867_v2  ;;  %7023 = vst [vmem:[#allocation39_spill] sm:$0xff] %v5869_v57  ;;  %v5880_v51 = vpack.c.bf16 %v1742_v6, %v1738_v22  ;;  %v5882_v62 = vsub.f32 %v1659_v55, %v1742_v6  ;;  %v5884_v26 = vpack.c.bf16 %v2581_v35, %v2578_v21  ;;  %v6743_v55 = vand.u32 4294901760, %v5689_v37 }
 0x126   :  { %7024 = vst [vmem:[#allocation41_spill] sm:$0xff] %v5871_v1  ;;  %7025 = vst [vmem:[#allocation44_spill] sm:$0xff] %v5875_v19  ;;  %v5886_v43 = vsub.f32 %v1658_v13, %v2578_v21  ;;  %v5888_v31 = vsub.f32 %v1661_v9, %v2581_v35  ;;  %v1803_v53 = vsub.f32 %v5666_v52, %v6732_v50  ;;  %v6739_v21 = vand.u32 4294901760, %v5684_v24 }
 0x127   :  { %7026 = vst [vmem:[#allocation49_spill] sm:$0xff] %v5880_v51  ;;  %7027 = vst [vmem:[#allocation33_spill] sm:$0xff] %v5882_v62  ;;  %v1797_v15 = vsub.f32 %v5674_v28, %v6731_v39  ;;  %4197 = vmatpush1.bf16.msra.mxu0 %v5880_v51  ;;  %4381 = vmatpush3.bf16.msra.mxu1 %v5884_v26  ;;  %v1809_v35 = vsub.f32 %v5679_v61, %v6734_v56  ;;  %v6744_v13 = vand.u32 4294901760, %v5700_v60 }
 0x128   :  { %7028 = vst [vmem:[#allocation37_spill] sm:$0xff] %v5884_v26  ;;  %7029 = vst [vmem:[#allocation12_spill] sm:$0xff] %v5886_v43  ;;  %v1792_v9 = vand.u32 4294901760, %v1791_v59  ;;  %v1804_v22 = vand.u32 4294901760, %v1803_v53  ;;  %4382 = vmatprep.subr.bf16.mxu1 %v6839_v44  ;;  %v6745_v39 = vand.u32 4294901760, %v5705_v49  ;;  %v2630_v34 = vsub.f32 %v5684_v24, %v6739_v21 }
 0x129   :  { %7030 = vst [vmem:[#allocation14_spill] sm:$0xff] %v5888_v31  ;;  %v1798_v6 = vand.u32 4294901760, %v1797_v15  ;;  %v1810_v50 = vand.u32 4294901760, %v1809_v35  ;;  %v2637_v56 = vsub.f32 %v5689_v37, %v6743_v55  ;;  %v1815_v26 = vsub.f32 %v5700_v60, %v6744_v13 }
 0x12a   :  { %v4198_v59 = vpack.c.bf16 %v1804_v22, %v1792_v9  ;;  %v1827_v53 = vsub.f32 %v5705_v49, %v6745_v39  ;;  %v6748_v15 = vand.u32 4294901760, %v5710_v47  ;;  %v6746_v35 = vand.u32 4294901760, %v5715_v54 }
 0x12b   :  { %v5923_v51 = vpack.c.bf16 %v1810_v50, %v1798_v6  ;;  %v2631_v21 = vand.u32 4294901760, %v2630_v34  ;;  %v2638_v2 = vand.u32 4294901760, %v2637_v56  ;;  %v1816_v44 = vand.u32 4294901760, %v1815_v26 }
 0x12c   :  { %4199 = vmatprep.subr.bf16.mxu0 %v4198_v59  ;;  %v1828_v55 = vand.u32 4294901760, %v1827_v53  ;;  %v1821_v13 = vsub.f32 %v5710_v47, %v6748_v15  ;;  %v1833_v9 = vsub.f32 %v5715_v54, %v6746_v35  ;;  %v6747_v22 = vand.u32 4294901760, %v5720_v27 }
 0x12d   :  { %7031 = vst [vmem:[#allocation46_spill] sm:$0xff] %v5923_v51  ;;  %v5932_v39 = vpack.c.bf16 %v2638_v2, %v2631_v21  ;;  %v6749_v50 = vand.u32 4294901760, %v5725_v20  ;;  %v6750_v34 = vand.u32 4294901760, %v5730_v11  ;;  %v6751_v56 = vand.u32 4294901760, %v5735_v48 }
 0x12e   :  { %v5937_v26 = vpack.c.bf16 %v1828_v55, %v1816_v44  ;;  %v1822_v6 = vand.u32 4294901760, %v1821_v13  ;;  %v1834_v59 = vand.u32 4294901760, %v1833_v9  ;;  %v2644_v53 = vsub.f32 %v5720_v27, %v6747_v22 }
 0x12f   :  { %7032 = vst [vmem:[#allocation50_spill] sm:$0xff] %v5932_v39  ;;  %v2651_v35 = vsub.f32 %v5725_v20, %v6749_v50  ;;  %v1839_v2 = vsub.f32 %v5730_v11, %v6750_v34  ;;  %v1851_v21 = vsub.f32 %v5735_v48, %v6751_v56  ;;  %v6752_v44 = vand.u32 4294901760, %v5741_v14 }
 0x130   :  { %7033 = vst [vmem:[#allocation51_spill] sm:$0xff] %v5937_v26  ;;  %v5952_v55 = vpack.c.bf16 %v1834_v59, %v1822_v6  ;;  %v2645_v13 = vand.u32 4294901760, %v2644_v53  ;;  %v6753_v9 = vand.u32 4294901760, %v5746_v38  ;;  %v6754_v22 = vand.u32 4294901760, %v5751_v8 }
 0x131   :  { %v2652_v15 = vand.u32 4294901760, %v2651_v35  ;;  %v1840_v26 = vand.u32 4294901760, %v1839_v2  ;;  %v1852_v50 = vand.u32 4294901760, %v1851_v21  ;;  %v1845_v34 = vsub.f32 %v5741_v14, %v6752_v44 }
 0x132   :  { %7034 = vst [vmem:[#allocation52_spill] sm:$0xff] %v5952_v55  ;;  %v1857_v56 = vsub.f32 %v5746_v38, %v6753_v9  ;;  %v2658_v6 = vsub.f32 %v5751_v8, %v6754_v22  ;;  %v6755_v59 = vand.u32 4294901760, %v5756_v42  ;;  %v6756_v53 = vand.u32 4294901760, %v5762_v10 }
 0x133   :  { %v5967_v55 = vpack.c.bf16 %v2652_v15, %v2645_v13  ;;  %v5969_v35 = vpack.c.bf16 %v1852_v50, %v1840_v26  ;;  %v1846_v2 = vand.u32 4294901760, %v1845_v34  ;;  %v6757_v21 = vand.u32 4294901760, %v5767_v41 }
 0x134   :  { %v1858_v44 = vand.u32 4294901760, %v1857_v56  ;;  %v2659_v39 = vand.u32 4294901760, %v2658_v6  ;;  %v2665_v9 = vsub.f32 %v5756_v42, %v6755_v59  ;;  %v1863_v22 = vsub.f32 %v5762_v10, %v6756_v53 }
 0x135   :  { %7035 = vst [vmem:[#allocation53_spill] sm:$0xff] %v5967_v55  ;;  %7036 = vst [vmem:[#allocation54_spill] sm:$0xff] %v5969_v35  ;;  %v1875_v15 = vsub.f32 %v5767_v41, %v6757_v21  ;;  %v6758_v50 = vand.u32 4294901760, %v5772_v16  ;;  %v6759_v34 = vand.u32 4294901760, %v5777_v0  ;;  %v6760_v26 = vand.u32 4294901760, %v5783_v17 }
 0x136   :  { %v5984_v56 = vpack.c.bf16 %v1858_v44, %v1846_v2  ;;  %v2666_v13 = vand.u32 4294901760, %v2665_v9  ;;  %v1864_v6 = vand.u32 4294901760, %v1863_v22  ;;  %v6761_v59 = vand.u32 4294901760, %v5788_v3 }
 0x137   :  { %v1876_v35 = vand.u32 4294901760, %v1875_v15  ;;  %v1869_v53 = vsub.f32 %v5772_v16, %v6758_v50  ;;  %v1881_v21 = vsub.f32 %v5777_v0, %v6759_v34  ;;  %v2672_v55 = vsub.f32 %v5783_v17, %v6760_v26 }
 0x138   :  { %7037 = vst [vmem:[#allocation55_spill] sm:$0xff] %v5984_v56  ;;  %v5996_v51 = vpack.c.bf16 %v2666_v13, %v2659_v39  ;;  %v2679_v22 = vsub.f32 %v5788_v3, %v6761_v59  ;;  %v6764_v44 = vand.u32 4294901760, %v5793_v5  ;;  %v6762_v9 = vand.u32 4294901760, %v5798_v30 }
 0x139   :  { %v6003_v2 = vpack.c.bf16 %v1876_v35, %v1864_v6  ;;  %v1870_v15 = vand.u32 4294901760, %v1869_v53  ;;  %v1882_v50 = vand.u32 4294901760, %v1881_v21  ;;  %v2673_v56 = vand.u32 4294901760, %v2672_v55 }
 0x13a   :  { %7038 = vst [vmem:[#allocation56_spill] sm:$0xff] %v5996_v51  ;;  %v2680_v34 = vand.u32 4294901760, %v2679_v22  ;;  %v1887_v26 = vsub.f32 %v5793_v5, %v6764_v44  ;;  %v1899_v39 = vsub.f32 %v5798_v30, %v6762_v9  ;;  %v6763_v13 = vand.u32 4294901760, %v5803_v18 }
 0x13b   :  { %7039 = vst [vmem:[#allocation57_spill] sm:$0xff] %v6003_v2  ;;  %v6012_v59 = vpack.c.bf16 %v1882_v50, %v1870_v15  ;;  %v6765_v51 = vand.u32 4294901760, %v5808_v25  ;;  %v6766_v35 = vand.u32 4294901760, %v5813_v29  ;;  %v6767_v53 = vand.u32 4294901760, %v5818_v45 }
 0x13c   :  { %v6017_v55 = vpack.c.bf16 %v2680_v34, %v2673_v56  ;;  %v1888_v21 = vand.u32 4294901760, %v1887_v26  ;;  %v1900_v6 = vand.u32 4294901760, %v1899_v39  ;;  %v1893_v22 = vsub.f32 %v5803_v18, %v6763_v13 }
 0x13d   :  { %7040 = vst [vmem:[#allocation58_spill] sm:$0xff] %v6012_v59  ;;  %v1905_v9 = vsub.f32 %v5808_v25, %v6765_v51  ;;  %v2686_v50 = vsub.f32 %v5813_v29, %v6766_v35  ;;  %v2693_v15 = vsub.f32 %v5818_v45, %v6767_v53  ;;  %v6768_v34 = vand.u32 4294901760, %v5823_v4 }
 0x13e   :  { %7041 = vst [vmem:[#allocation59_spill] sm:$0xff] %v6017_v55  ;;  %v6032_v26 = vpack.c.bf16 %v1900_v6, %v1888_v21  ;;  %v1894_v56 = vand.u32 4294901760, %v1893_v22  ;;  %v6769_v39 = vand.u32 4294901760, %v5828_v23  ;;  %v6770_v13 = vand.u32 4294901760, %v5833_v40 }
 0x13f   :  { %v1906_v44 = vand.u32 4294901760, %v1905_v9  ;;  %v2687_v55 = vand.u32 4294901760, %v2686_v50  ;;  %v2694_v51 = vand.u32 4294901760, %v2693_v15  ;;  %v1911_v35 = vsub.f32 %v5823_v4, %v6768_v34 }
 0x140   :  { %7042 = vst [vmem:[#allocation60_spill] sm:$0xff] %v6032_v26  ;;  %v1923_v53 = vsub.f32 %v5828_v23, %v6769_v39  ;;  %v1917_v21 = vsub.f32 %v5833_v40, %v6770_v13  ;;  %v6771_v6 = vand.u32 4294901760, %v5838_v33  ;;  %v6772_v22 = vand.u32 4294901760, %v5843_v7 }
 0x141   :  { %v6047_v26 = vpack.c.bf16 %v1906_v44, %v1894_v56  ;;  %v6049_v9 = vpack.c.bf16 %v2694_v51, %v2687_v55  ;;  %v1912_v50 = vand.u32 4294901760, %v1911_v35  ;;  %v6773_v15 = vand.u32 4294901760, %v5848_v36  ;;  %v7045_v56 = vld [vmem:[#allocation30_spill] sm:$0xff]  ;;  %v7046_v55 = vld [vmem:[#allocation31_spill] sm:$0xff] }
 0x142   :  { %v1924_v34 = vand.u32 4294901760, %v1923_v53  ;;  %v1918_v59 = vand.u32 4294901760, %v1917_v21  ;;  %v1929_v39 = vsub.f32 %v5838_v33, %v6771_v6  ;;  %v2700_v13 = vsub.f32 %v5843_v7, %v6772_v22 }
 0x143   :  { %7043 = vst [vmem:[#allocation61_spill] sm:$0xff] %v6047_v26  ;;  %7044 = vst [vmem:[#allocation62_spill] sm:$0xff] %v6049_v9  ;;  %v2707_v44 = vsub.f32 %v5848_v36, %v6773_v15  ;;  %v6778_v51 = vand.u32 4294901760, %v7045_v56  ;;  %v6779_v35 = vand.u32 4294901760, %v7046_v55  ;;  %v6780_v9 = vand.u32 4294901760, %v5857_v46 }
 0x144   :  { %v6064_v53 = vpack.c.bf16 %v1924_v34, %v1912_v50  ;;  %v1930_v21 = vand.u32 4294901760, %v1929_v39  ;;  %v2701_v26 = vand.u32 4294901760, %v2700_v13  ;;  %v6781_v6 = vand.u32 4294901760, %v5860_v58 }
 0x145   :  { %v2708_v2 = vand.u32 4294901760, %v2707_v44  ;;  %v1935_v22 = vsub.f32 %v7045_v56, %v6778_v51  ;;  %v1947_v15 = vsub.f32 %v7046_v55, %v6779_v35  ;;  %v1941_v36 = vsub.f32 %v5857_v46, %v6780_v9 }
 0x146   :  { %7047 = vst [vmem:[#allocation63_spill] sm:$0xff] %v6064_v53  ;;  %v6076_v7 = vpack.c.bf16 %v1930_v21, %v1918_v59  ;;  %v1953_v13 = vsub.f32 %v5860_v58, %v6781_v6  ;;  %v6784_v34 = vand.u32 4294901760, %v5863_v32  ;;  %v6782_v39 = vand.u32 4294901760, %v5865_v63 }
 0x147   :  { %v6083_v50 = vpack.c.bf16 %v2708_v2, %v2701_v26  ;;  %v1936_v44 = vand.u32 4294901760, %v1935_v22  ;;  %v1948_v51 = vand.u32 4294901760, %v1947_v15  ;;  %v1942_v53 = vand.u32 4294901760, %v1941_v36 }
 0x148   :  { %7048 = vst [vmem:[#allocation64_spill] sm:$0xff] %v6076_v7  ;;  %v1954_v35 = vand.u32 4294901760, %v1953_v13  ;;  %v2714_v9 = vsub.f32 %v5863_v32, %v6784_v34  ;;  %v2721_v59 = vsub.f32 %v5865_v63, %v6782_v39  ;;  %v6783_v21 = vand.u32 4294901760, %v5869_v57 }
 0x149   :  { %v6092_v6 = vpack.c.bf16 %v1948_v51, %v1936_v44  ;;  %v6785_v7 = vand.u32 4294901760, %v5871_v1  ;;  %v6786_v2 = vand.u32 4294901760, %v5875_v19  ;;  %v6787_v26 = vand.u32 4294901760, %v5882_v62 }
 0x14a   :  { %v6097_v36 = vpack.c.bf16 %v1954_v35, %v1942_v53  ;;  %v2715_v22 = vand.u32 4294901760, %v2714_v9  ;;  %v2722_v15 = vand.u32 4294901760, %v2721_v59  ;;  %v1959_v13 = vsub.f32 %v5869_v57, %v6783_v21 }
 0x14b   :  { %v1971_v39 = vsub.f32 %v5871_v1, %v6785_v7  ;;  %v1965_v51 = vsub.f32 %v5875_v19, %v6786_v2  ;;  %v1977_v44 = vsub.f32 %v5882_v62, %v6787_v26  ;;  %v6788_v35 = vand.u32 4294901760, %v5886_v43 }
 0x14c   :  { %7049 = vst [vmem:[#allocation65_spill] sm:$0xff] %v6097_v36  ;;  %v6112_v9 = vpack.c.bf16 %v2722_v15, %v2715_v22  ;;  %v1960_v53 = vand.u32 4294901760, %v1959_v13  ;;  %v6789_v59 = vand.u32 4294901760, %v5888_v31  ;;  %v7050_v22 = vld [vmem:[#allocation28_spill] sm:$0xff] }
 0x14d   :  { %v1972_v34 = vand.u32 4294901760, %v1971_v39  ;;  %v1966_v7 = vand.u32 4294901760, %v1965_v51  ;;  %v1978_v36 = vand.u32 4294901760, %v1977_v44  ;;  %v2728_v2 = vsub.f32 %v5886_v43, %v6788_v35 }
 0x14e   :  { %v2735_v26 = vsub.f32 %v5888_v31, %v6789_v59  ;;  %v7051_v59 = vld [vmem:[#allocation29_spill] sm:$0xff] }
 0x14f   :  { %v6129_v39 = vpack.c.bf16 %v1972_v34, %v1960_v53  ;;  %v6131_v51 = vpack.c.bf16 %v1978_v36, %v1966_v7  ;;  %v2729_v44 = vand.u32 4294901760, %v2728_v2  ;;  %v92_v53 = vlaneseq }
 0x150   :  { %v2736_v21 = vand.u32 4294901760, %v2735_v26 }
 0x151   :  { %v6175_v26 = vshrl.u32 %v92_v53, 7 }
 0x152   :  { %v6149_v36 = vpack.c.bf16 %v2736_v21, %v2729_v44  ;;  %v90_v44 = vld [vmem:[%s6525_s2] sm:$0x7] }
 0x153   :  { %7052 = vst [vmem:[#allocation28_spill] sm:$0xff] %v6175_v26  ;;  %v6810_v21 = vsub.s32 0, %v6175_v26  ;;  %v6813_v15 = vsub.s32 1, %v6175_v26  ;;  %v6814_v35 = vsub.s32 2, %v6175_v26  ;;  %v7119_v26 = vld [vmem:[#allocation15_spill] sm:$0xff] }
 0x155   :  { %v95_v7 = vrot.slane %v90_v44, %v6810_v21  ;;  %v99_v2 = vrot.slane %v90_v44, %v6813_v15  ;;  %v103_v53 = vrot.slane %v90_v44, %v6814_v35  ;;  %v7065_v44 = vld [vmem:[#allocation59_spill] sm:$0xff]  ;;  %v7118_v35 = vld [vmem:[#allocation13_spill] sm:$0xff] }
 0x1ce   :  { %v1599_v34 = vpop.f32.mrb[0].mxu1 }
 0x1cf   :  { %v3619_v13 = vpop.f32.mrb[1].mxu1  ;;  %v4504_v1 = vadd.f32 %v1599_v34, %v103_v53  ;;  %v7061_v34 = vld [vmem:[#allocation55_spill] sm:$0xff]  ;;  %v7066_v53 = vld [vmem:[#allocation60_spill] sm:$0xff] }
 0x1d1   :  { %v957_v43 = vpop.f32.mrb[0].mxu0 }
 0x1d2   :  { %v4502_v31 = vadd.f32 %v957_v43, %v95_v7  ;;  %v959_v19 = vpop.f32.mrb[1].mxu0  ;;  %v7062_v7 = vld [vmem:[#allocation56_spill] sm:$0xff] }
 0x1d3   :  { %v4503_v62 = vadd.f32 %v959_v19, %v99_v2  ;;  %v7063_v2 = vld [vmem:[#allocation57_spill] sm:$0xff] }
 0x1d4   :  { %v3203_v57 = vmul.f32 -1.442695, %v4502_v31  ;;  %v7059_v31 = vld [vmem:[#allocation53_spill] sm:$0xff] }
 0x1d5   :  { %v1609_v32 = vmax.f32 %v4503_v62, 0.0 }
 0x1d6   :  { %4556 = vpow2.f32 %v3203_v57  ;;  %v7057_v57 = vmov 0.0  }
 0x1d7   :  { %v1610_v63 = vsub.f32 %v1609_v32, %v4504_v1  ;;  %v7053_v32 = vld [vmem:[#allocation46_spill] sm:$0xff] }
 0x1e0   :  { %v4557_v46 = vpop.eup %4556 }
 0x1e1   :  { %v1606_v58 = vadd.f32 1.0, %v4557_v46  ;;  %v7054_v46 = vld [vmem:[#allocation50_spill] sm:$0xff] }
 0x1e3   :  { %4558 = vrcp.f32 %v1606_v58  ;;  %v7055_v58 = vld [vmem:[#allocation51_spill] sm:$0xff] }
 0x1ed   :  { %v4559_v21 = vpop.eup %4558 }
 0x1ee   :  { %v1611_v13 = vmul.f32 %v4559_v21, %v1610_v63  ;;  %v7056_v63 = vmov 0.0|0.0   ;;  %v7064_v21 = vld [vmem:[#allocation58_spill] sm:$0xff] }
 0x1f0   :  { %v1612_v56 = vadd.f32 %v4504_v1, %v1611_v13  ;;  %v7058_v1 = vld [vmem:[#allocation52_spill] sm:$0xff]  ;;  %v7067_v13 = vld [vmem:[#allocation61_spill] sm:$0xff] }
 0x1f2   :  { %v6189_v55 = vand.u32 4294901760, %v1612_v56 }
 0x1f4   :  { %v6192_v15 = vsub.f32 %v1612_v56, %v6189_v55  ;;  %v7060_v56 = vld [vmem:[#allocation54_spill] sm:$0xff] }
 0x1f6   :  { %v6195_v43 = vand.u32 4294901760, %v6192_v15 }
 0x1f8   :  { %v1780_v19 = vsub.f32 %v6192_v15, %v6195_v43 }
 0x1fa   :  { %v1781_v62 = vand.u32 4294901760, %v1780_v19  ;;  %v7068_v19 = vld [vmem:[#allocation62_spill] sm:$0xff] }
 0x1fc   :  { %1782 = vmatmul.mubr.f32.vlgmr.msra.gmra.mrb[2].mxu0 %v1781_v62  ;;  %3653 = vmatmul.mubr.f32.vlgmr.msra.gmra.mrb[2].mxu1 %v1781_v62  ;;  %v7069_v62 = vld [vmem:[#allocation63_spill] sm:$0xff] }
 0x1fd   :  { %4201 = vmatpush1.bf16.msra.mxu0 %v7053_v32  ;;  %4384 = vmatpush3.bf16.msra.mxu1 %v7054_v46  ;;  %v7070_v32 = vld [vmem:[#allocation64_spill] sm:$0xff]  ;;  %v7071_v46 = vld [vmem:[#allocation65_spill] sm:$0xff] }
 0x1fe   :  { %4203 = vmatprep.subr.bf16.mxu0 %v7055_v58  ;;  %4385 = vmatprep.subr.bf16.mxu1 %v7056_v63  ;;  %v7072_v58 = vpack.c.bf16 %v5666_v52, %v5661_v12 }
 0x1ff   :  { %2012 = vmatprep.mubr.f32.mxu0 %v7057_v57  ;;  %3687 = vmatprep.mubr.msk.f32.mxu1 %vm4641_vm0, %v7057_v57 }
 0x201   :  { %4205 = vmatpush1.bf16.msra.mxu0 %v7058_v1  ;;  %4387 = vmatpush3.bf16.msra.mxu1 %v7059_v31  ;;  %v7079_v1 = vpack.c.bf16 %v5746_v38, %v5741_v14  ;;  %v7080_v31 = vpack.c.bf16 %v5756_v42, %v5751_v8 }
 0x202   :  { %4207 = vmatprep.subr.bf16.mxu0 %v7060_v56  ;;  %4388 = vmatprep.subr.bf16.mxu1 %v7056_v63  ;;  %v7081_v56 = vpack.c.bf16 %v5767_v41, %v5762_v10 }
 0x205   :  { %4209 = vmatpush1.bf16.msra.mxu0 %v7061_v34  ;;  %4390 = vmatpush3.bf16.msra.mxu1 %v7062_v7  ;;  %v7082_v34 = vpack.c.bf16 %v5777_v0, %v5772_v16  ;;  %v7083_v7 = vpack.c.bf16 %v5788_v3, %v5783_v17 }
 0x206   :  { %4211 = vmatprep.subr.bf16.mxu0 %v7063_v2  ;;  %4391 = vmatprep.subr.bf16.mxu1 %v7056_v63  ;;  %v7084_v2 = vpack.c.bf16 %v5798_v30, %v5793_v5 }
 0x209   :  { %4213 = vmatpush1.bf16.msra.mxu0 %v7064_v21  ;;  %4393 = vmatpush3.bf16.msra.mxu1 %v7065_v44  ;;  %v7085_v21 = vpack.c.bf16 %v5808_v25, %v5803_v18  ;;  %v7086_v44 = vpack.c.bf16 %v5818_v45, %v5813_v29 }
 0x20a   :  { %4215 = vmatprep.subr.bf16.mxu0 %v7066_v53  ;;  %4394 = vmatprep.subr.bf16.mxu1 %v7056_v63  ;;  %v7087_v53 = vpack.c.bf16 %v5828_v23, %v5823_v4 }
 0x20d   :  { %4217 = vmatpush1.bf16.msra.mxu0 %v7067_v13  ;;  %4396 = vmatpush3.bf16.msra.mxu1 %v7068_v19  ;;  %v7088_v13 = vpack.c.bf16 %v5838_v33, %v5833_v40  ;;  %v7089_v19 = vpack.c.bf16 %v7051_v59, %v7050_v22 }
 0x20e   :  { %4219 = vmatprep.subr.bf16.mxu0 %v7069_v62  ;;  %4397 = vmatprep.subr.bf16.mxu1 %v7056_v63  ;;  %v7090_v62 = vld [vmem:[#allocation31_spill] sm:$0xff] }
 0x211   :  { %4221 = vmatpush1.bf16.msra.mxu0 %v7070_v32  ;;  %4399 = vmatpush3.bf16.msra.mxu1 %v6083_v50  ;;  %v7074_v50 = vpack.c.bf16 %v5689_v37, %v5684_v24  ;;  %v7091_v32 = vld [vmem:[#allocation30_spill] sm:$0xff] }
 0x212   :  { %4223 = vmatprep.subr.bf16.mxu0 %v6092_v6  ;;  %4400 = vmatprep.subr.bf16.mxu1 %v7056_v63  ;;  %v7073_v6 = vpack.c.bf16 %v5679_v61, %v5674_v28 }
 0x215   :  { %4225 = vmatpush1.bf16.msra.mxu0 %v7071_v46  ;;  %4402 = vmatpush3.bf16.msra.mxu1 %v6112_v9  ;;  %v7075_v9 = vpack.c.bf16 %v5705_v49, %v5700_v60  ;;  %v7092_v46 = vpack.c.bf16 %v7090_v62, %v7091_v32 }
 0x216   :  { %4227 = vmatprep.subr.bf16.mxu0 %v6129_v39  ;;  %4403 = vmatprep.subr.bf16.mxu1 %v7056_v63  ;;  %v7076_v39 = vpack.c.bf16 %v5715_v54, %v5710_v47 }
 0x219   :  { %4229 = vmatpush1.bf16.msra.mxu0 %v6131_v51  ;;  %4405 = vmatpush3.bf16.msra.mxu1 %v6149_v36  ;;  %v7077_v51 = vpack.c.bf16 %v5725_v20, %v5720_v27  ;;  %v7078_v36 = vpack.c.bf16 %v5735_v48, %v5730_v11 }
 0x21a   :  { %4231 = vmatprep.subr.bf16.mxu0 %v7072_v58  ;;  %4406 = vmatprep.subr.bf16.mxu1 %v7056_v63  ;;  %v7093_v58 = vld [vmem:[#allocation34_spill] sm:$0xff] }
 0x21c   :  { %2014 = vmatmul.mubr.f32.vlgmr.msra.gmra.mrb[2].mxu0 %v6189_v55  ;;  %3688 = vmatmul.mubr.f32.vlgmr.msra.gmra.mrb[2].mxu1 %v6189_v55 }
 0x21d   :  { %4233 = vmatpush1.bf16.msra.mxu0 %v7073_v6  ;;  %4408 = vmatpush3.bf16.msra.mxu1 %v7074_v50  ;;  %v7094_v6 = vld [vmem:[#allocation32_spill] sm:$0xff] }
 0x21e   :  { %4235 = vmatprep.subr.bf16.mxu0 %v7075_v9  ;;  %4409 = vmatprep.subr.bf16.mxu1 %v7056_v63  ;;  %v7095_v50 = vpack.c.bf16 %v7093_v58, %v7094_v6  ;;  %v7096_v9 = vld [vmem:[#allocation36_spill] sm:$0xff] }
 0x21f   :  { %2148 = vmatprep.mubr.f32.mxu0 %v7057_v57  ;;  %3722 = vmatprep.mubr.msk.f32.mxu1 %vm4641_vm0, %v7057_v57 }
 0x221   :  { %4237 = vmatpush1.bf16.msra.mxu0 %v7076_v39  ;;  %4411 = vmatpush3.bf16.msra.mxu1 %v7077_v51  ;;  %v7097_v39 = vld [vmem:[#allocation35_spill] sm:$0xff] }
 0x222   :  { %4239 = vmatprep.subr.bf16.mxu0 %v7078_v36  ;;  %4412 = vmatprep.subr.bf16.mxu1 %v7056_v63  ;;  %v7098_v51 = vpack.c.bf16 %v7096_v9, %v7097_v39  ;;  %v7099_v36 = vld [vmem:[#allocation41_spill] sm:$0xff] }
 0x225   :  { %4241 = vmatpush1.bf16.msra.mxu0 %v7079_v1  ;;  %4414 = vmatpush3.bf16.msra.mxu1 %v7080_v31  ;;  %v7100_v1 = vld [vmem:[#allocation39_spill] sm:$0xff] }
 0x226   :  { %4243 = vmatprep.subr.bf16.mxu0 %v7081_v56  ;;  %4415 = vmatprep.subr.bf16.mxu1 %v7056_v63  ;;  %v7101_v31 = vpack.c.bf16 %v7099_v36, %v7100_v1  ;;  %v7102_v56 = vld [vmem:[#allocation33_spill] sm:$0xff] }
 0x229   :  { %4245 = vmatpush1.bf16.msra.mxu0 %v7082_v34  ;;  %4417 = vmatpush3.bf16.msra.mxu1 %v7083_v7  ;;  %v7103_v34 = vld [vmem:[#allocation44_spill] sm:$0xff] }
 0x22a   :  { %4247 = vmatprep.subr.bf16.mxu0 %v7084_v2  ;;  %4418 = vmatprep.subr.bf16.mxu1 %v7056_v63  ;;  %v7104_v7 = vpack.c.bf16 %v7102_v56, %v7103_v34  ;;  %v7105_v2 = vld [vmem:[#allocation14_spill] sm:$0xff] }
 0x22d   :  { %4249 = vmatpush1.bf16.msra.mxu0 %v7085_v21  ;;  %4420 = vmatpush3.bf16.msra.mxu1 %v7086_v44  ;;  %v7106_v21 = vld [vmem:[#allocation12_spill] sm:$0xff] }
 0x22e   :  { %4251 = vmatprep.subr.bf16.mxu0 %v7087_v53  ;;  %4421 = vmatprep.subr.bf16.mxu1 %v7056_v63  ;;  %v7107_v44 = vpack.c.bf16 %v7105_v2, %v7106_v21  ;;  %v7108_v53 = vld [vmem:[#allocation16_spill] sm:$0xff] }
 0x231   :  { %4253 = vmatpush1.bf16.msra.mxu0 %v7088_v13  ;;  %4423 = vmatpush3.bf16.msra.mxu1 %v7089_v19  ;;  %v7109_v13 = vld [vmem:[#allocation17_spill] sm:$0xff]  ;;  %v7110_v19 = vld [vmem:[#allocation19_spill] sm:$0xff] }
 0x232   :  { %4255 = vmatprep.subr.bf16.mxu0 %v7092_v46  ;;  %4424 = vmatprep.subr.bf16.mxu1 %v7056_v63  ;;  %v7111_v46 = vld [vmem:[#allocation40_spill] sm:$0xff] }
 0x235   :  { %4257 = vmatpush1.bf16.msra.mxu0 %v7095_v50  ;;  %4426 = vmatpush3.bf16.msra.mxu1 %v7098_v51  ;;  %v7112_v50 = vld [vmem:[#allocation42_spill] sm:$0xff]  ;;  %v7113_v51 = vld [vmem:[#allocation43_spill] sm:$0xff] }
 0x236   :  { %4259 = vmatprep.subr.bf16.mxu0 %v7101_v31  ;;  %4427 = vmatprep.subr.bf16.mxu1 %v7056_v63  ;;  %v7114_v31 = vld [vmem:[#allocation45_spill] sm:$0xff] }
 0x239   :  { %4261 = vmatpush1.bf16.msra.mxu0 %v7104_v7  ;;  %4429 = vmatpush3.bf16.msra.mxu1 %v7107_v44  ;;  %v7116_v7 = vld [vmem:[#allocation48_spill] sm:$0xff]  ;;  %v7117_v44 = vld [vmem:[#allocation11_spill] sm:$0xff] }
 0x23a   :  { %4263 = vmatprep.subr.bf16.mxu0 %v7108_v53  ;;  %4430 = vmatprep.subr.bf16.mxu1 %v7056_v63 }
 0x23c   :  { %2151 = vmatmul.mubr.f32.vlgmr.msra.gmra.mrb[2].mxu0 %v6192_v15  ;;  %3723 = vmatmul.mubr.f32.vlgmr.msra.gmra.mrb[2].mxu1 %v6192_v15  ;;  %v7115_v15 = vld [vmem:[#allocation47_spill] sm:$0xff] }
 0x23d   :  { %4265 = vmatpush1.bf16.msra.mxu0 %v7109_v13  ;;  %4432 = vmatpush3.bf16.msra.mxu1 %v7110_v19  ;;  %v7135_v19 = vand.u32 4294901760, %v5679_v61  ;;  %v7141_v61 = vand.u32 4294901760, %v5715_v54  ;;  %v7147_v54 = vand.u32 4294901760, %v5746_v38  ;;  %v7153_v38 = vand.u32 4294901760, %v5777_v0 }
 0x23e   :  { %4267 = vmatprep.subr.bf16.mxu0 %v7111_v46  ;;  %4433 = vmatprep.subr.bf16.mxu1 %v7056_v63  ;;  %v7120_v46 = vld [vmem:[#allocation18_spill] sm:$0xff]  ;;  %v7159_v0 = vand.u32 4294901760, %v5808_v25  ;;  %v7165_v25 = vand.u32 4294901760, %v5838_v33  ;;  %v7171_v33 = vand.u32 4294901760, %v7093_v58  ;;  %v7177_v58 = vand.u32 4294901760, %v7102_v56  ;;  %v7182_v56 = vld [vmem:[#allocation40_spill] sm:$0xff] }
 0x23f   :  { %2253 = vmatprep.mubr.f32.mxu0 %v7057_v57  ;;  %3757 = vmatprep.mubr.msk.f32.mxu1 %vm4641_vm0, %v7057_v57 }
 0x241   :  { %4269 = vmatpush1.bf16.msra.mxu0 %v7112_v50  ;;  %4435 = vmatpush3.bf16.msra.mxu1 %v7113_v51  ;;  %v7121_v51 = vld [vmem:[#allocation20_spill] sm:$0xff]  ;;  %v7123_v50 = vld [vmem:[#allocation22_spill] sm:$0xff] }
 0x242   :  { %4271 = vmatprep.subr.bf16.mxu0 %v7114_v31  ;;  %4436 = vmatprep.subr.bf16.mxu1 %v7056_v63  ;;  %v7122_v31 = vld [vmem:[#allocation21_spill] sm:$0xff] }
 0x245   :  { %4273 = vmatpush1.bf16.msra.mxu0 %v7115_v15  ;;  %4438 = vmatpush3.bf16.msra.mxu1 %v7116_v7  ;;  %v7124_v7 = vld [vmem:[#allocation23_spill] sm:$0xff]  ;;  %v7126_v15 = vld [vmem:[#allocation25_spill] sm:$0xff] }
 0x246   :  { %4275 = vmatprep.subr.bf16.mxu0 %v7117_v44  ;;  %4439 = vmatprep.subr.bf16.mxu1 %v7056_v63  ;;  %v7125_v44 = vld [vmem:[#allocation24_spill] sm:$0xff] }
 0x249   :  { %4277 = vmatpush1.bf16.msra.mxu0 %v7118_v35  ;;  %4441 = vmatpush3.bf16.msra.mxu1 %v7119_v26  ;;  %v7127_v26 = vld [vmem:[#allocation26_spill] sm:$0xff] }
 0x24a   :  { %4279 = vmatprep.subr.bf16.mxu0 %v7120_v46  ;;  %4442 = vmatprep.subr.bf16.mxu1 %v7056_v63  ;;  %v7128_v46 = vld [vmem:[#allocation27_spill] sm:$0xff]  ;;  %v7129_v35 = vld [vmem:[#allocation38_spill] sm:$0xff] }
 0x24d   :  { %4281 = vmatpush1.bf16.msra.mxu0 %v7121_v51  ;;  %4444 = vmatpush3.bf16.msra.mxu1 %v7122_v31  ;;  %v7131_v31 = vand.u32 4294901760, %v5666_v52  ;;  %v7138_v52 = vand.u32 4294901760, %v5700_v60  ;;  %v7144_v60 = vand.u32 4294901760, %v5730_v11 }
 0x24e   :  { %4283 = vmatprep.subr.bf16.mxu0 %v7123_v50  ;;  %4445 = vmatprep.subr.bf16.mxu1 %v7056_v63  ;;  %v7130_v50 = vand.u32 4294901760, %v5661_v12  ;;  %v7139_v12 = vand.u32 4294901760, %v5705_v49  ;;  %v7145_v49 = vand.u32 4294901760, %v5735_v48  ;;  %v7150_v48 = vand.u32 4294901760, %v5762_v10 }
 0x24f   :  { %v7156_v10 = vand.u32 4294901760, %v5793_v5  ;;  %v7162_v5 = vand.u32 4294901760, %v5823_v4  ;;  %v7168_v4 = vand.u32 4294901760, %v7091_v32  ;;  %v7174_v32 = vand.u32 4294901760, %v7100_v1  ;;  %v7181_v1 = vld [vmem:[#allocation19_spill] sm:$0xff] }
 0x250   :  { %v4294_v51 = vpack.c.bf16 %v7131_v31, %v7130_v50  ;;  %v4298_v50 = vpack.c.bf16 %v7139_v12, %v7138_v52 }
 0x251   :  { %4285 = vmatpush1.bf16.msra.mxu0 %v7124_v7  ;;  %4447 = vmatpush3.bf16.msra.mxu1 %v7125_v44  ;;  %v7132_v7 = vld [vmem:[#allocation49_spill] sm:$0xff] }
 0x252   :  { %4287 = vmatprep.subr.bf16.mxu0 %v7126_v15  ;;  %4448 = vmatprep.subr.bf16.mxu1 %v7056_v63  ;;  %v7133_v44 = vld [vmem:[#allocation37_spill] sm:$0xff]  ;;  %v7134_v15 = vand.u32 4294901760, %v5674_v28  ;;  %v7140_v28 = vand.u32 4294901760, %v5710_v47  ;;  %v7146_v47 = vand.u32 4294901760, %v5741_v14  ;;  %v7152_v14 = vand.u32 4294901760, %v5772_v16 }
 0x253   :  { %v7158_v16 = vand.u32 4294901760, %v5803_v18  ;;  %v7164_v18 = vand.u32 4294901760, %v5833_v40  ;;  %v7170_v40 = vand.u32 4294901760, %v7094_v6  ;;  %v7176_v6 = vand.u32 4294901760, %v7103_v34  ;;  %v7183_v34 = vld [vmem:[#allocation42_spill] sm:$0xff] }
 0x255   :  { %4289 = vmatpush1.bf16.msra.mxu0 %v7127_v26  ;;  %4450 = vmatpush3.bf16.msra.mxu1 %v7128_v46  ;;  %v4296_v26 = vpack.c.bf16 %v7135_v19, %v7134_v15  ;;  %v7136_v46 = vand.u32 4294901760, %v5684_v24  ;;  %v7142_v24 = vand.u32 4294901760, %v5720_v27  ;;  %v4304_v27 = vpack.c.bf16 %v7147_v54, %v7146_v47  ;;  %v7188_v47 = vld [vmem:[#allocation11_spill] sm:$0xff]  ;;  %v7189_v54 = vld [vmem:[#allocation13_spill] sm:$0xff] }
 0x256   :  { %4291 = vmatprep.subr.bf16.mxu0 %v7129_v35  ;;  %4451 = vmatprep.subr.bf16.mxu1 %v7056_v63  ;;  %v7137_v35 = vand.u32 4294901760, %v5689_v37  ;;  %v4300_v37 = vpack.c.bf16 %v7141_v61, %v7140_v28  ;;  %v4312_v52 = vpack.c.bf16 %v7159_v0, %v7158_v16  ;;  %v4316_v28 = vpack.c.bf16 %v7165_v25, %v7164_v18 }
 0x258   :  { %v4455_v13 = vpack.c.bf16 %v7137_v35, %v7136_v46  ;;  %v7143_v35 = vand.u32 4294901760, %v5725_v20  ;;  %v7148_v20 = vand.u32 4294901760, %v5751_v8  ;;  %v7154_v8 = vand.u32 4294901760, %v5783_v17 }
 0x259   :  { %4293 = vmatpush1.bf16.msra.mxu0 %v7132_v7  ;;  %4453 = vmatpush3.bf16.msra.mxu1 %v7133_v44  ;;  %v7160_v17 = vand.u32 4294901760, %v5813_v29  ;;  %v7166_v29 = vand.u32 4294901760, %v7050_v22  ;;  %v7172_v22 = vand.u32 4294901760, %v7097_v39  ;;  %v7178_v39 = vand.u32 4294901760, %v7106_v21  ;;  %v7185_v21 = vld [vmem:[#allocation45_spill] sm:$0xff] }
 0x25a   :  { %4295 = vmatprep.subr.bf16.mxu0 %v4294_v51  ;;  %4454 = vmatprep.subr.bf16.mxu1 %v7056_v63  ;;  %v4458_v19 = vpack.c.bf16 %v7143_v35, %v7142_v24  ;;  %v4308_v51 = vpack.c.bf16 %v7153_v38, %v7152_v14  ;;  %v4320_v24 = vpack.c.bf16 %v7171_v33, %v7170_v40  ;;  %v7198_v14 = vld [vmem:[#allocation26_spill] sm:$0xff]  ;;  %v7199_v38 = vld [vmem:[#allocation27_spill] sm:$0xff] }
 0x25c   :  { %2257 = vmatmul.mubr.f32.vlgmr.msra.gmra.mrb[2].mxu0 %v6195_v43  ;;  %3758 = vmatmul.mubr.f32.vlgmr.msra.gmra.mrb[2].mxu1 %v6195_v43  ;;  %v4302_v43 = vpack.c.bf16 %v7145_v49, %v7144_v60  ;;  %v4324_v60 = vpack.c.bf16 %v7177_v58, %v7176_v6 }
 0x25d   :  { %4297 = vmatpush1.bf16.msra.mxu0 %v4296_v26  ;;  %4456 = vmatpush3.bf16.msra.mxu1 %v4455_v13  ;;  %v7149_v26 = vand.u32 4294901760, %v5756_v42  ;;  %v7151_v13 = vand.u32 4294901760, %v5767_v41  ;;  %v7155_v42 = vand.u32 4294901760, %v5788_v3  ;;  %v7157_v41 = vand.u32 4294901760, %v5798_v30 }
 0x25e   :  { %4299 = vmatprep.subr.bf16.mxu0 %v4298_v50  ;;  %4457 = vmatprep.subr.bf16.mxu1 %v7056_v63  ;;  %v7161_v3 = vand.u32 4294901760, %v5818_v45  ;;  %v7163_v30 = vand.u32 4294901760, %v5828_v23  ;;  %v7167_v45 = vand.u32 4294901760, %v7051_v59  ;;  %v7169_v23 = vand.u32 4294901760, %v7090_v62 }
 0x25f   :  { %2423 = vmatprep.mubr.f32.mxu0 %v7057_v57  ;;  %3792 = vmatprep.mubr.msk.f32.mxu1 %vm4641_vm0, %v7057_v57  ;;  %v4461_v11 = vpack.c.bf16 %v7149_v26, %v7148_v20  ;;  %v4306_v46 = vpack.c.bf16 %v7151_v13, %v7150_v48  ;;  %v4464_v31 = vpack.c.bf16 %v7155_v42, %v7154_v8  ;;  %v7173_v59 = vand.u32 4294901760, %v7096_v9  ;;  %v7192_v20 = vld [vmem:[#allocation20_spill] sm:$0xff]  ;;  %v7193_v26 = vld [vmem:[#allocation21_spill] sm:$0xff]  ;;  %v7195_v48 = vld [vmem:[#allocation23_spill] sm:$0xff] }
 0x260   :  { %v4310_v15 = vpack.c.bf16 %v7157_v41, %v7156_v10  ;;  %v4467_v12 = vpack.c.bf16 %v7161_v3, %v7160_v17  ;;  %v4314_v50 = vpack.c.bf16 %v7163_v30, %v7162_v5  ;;  %v4470_v61 = vpack.c.bf16 %v7167_v45, %v7166_v29  ;;  %v7196_v13 = vld [vmem:[#allocation24_spill] sm:$0xff]  ;;  %v3204_v8 = vld [vmem:[%s6525_s2 + $0x3] sm:$0x7]  ;;  %s4643_s2 = smov [#allocation7]  }
 0x261   :  { %4301 = vmatpush1.bf16.msra.mxu0 %v4300_v37  ;;  %4459 = vmatpush3.bf16.msra.mxu1 %v4458_v19  ;;  %v4318_v37 = vpack.c.bf16 %v7169_v23, %v7168_v4  ;;  %v4473_v35 = vpack.c.bf16 %v7173_v59, %v7172_v22  ;;  %v7175_v62 = vand.u32 4294901760, %v7099_v36  ;;  %v7179_v9 = vand.u32 4294901760, %v7105_v2  ;;  %v7180_v36 = vld [vmem:[#allocation17_spill] sm:$0xff]  ;;  %v7184_v2 = vld [vmem:[#allocation43_spill] sm:$0xff]  ;;  %v7201_v42 = vld [vmem:[#allocation28_spill] sm:$0xff]  ;;  %s3193_s13 = sshll.u32 %s4643_s2, 4  ;;  %s3194_s13 = int_to_ptr.vmem [resolvable:$true] %s3193_s13 }
 0x262   :  { %4303 = vmatprep.subr.bf16.mxu0 %v4302_v43  ;;  %4460 = vmatprep.subr.bf16.mxu1 %v7056_v63  ;;  %v7187_v43 = vld [vmem:[#allocation48_spill] sm:$0xff]  ;;  %v7203_v41 = vsub.s32 1, %v7201_v42  ;;  %s4608_s14 = scalar_lea.vmem %s3194_s13, 128  ;;  %p4613_p3 = scmp.lt.s32.totalorder %s3194_s13, %s3194_s13 }
 0x263   :  { %v4322_v19 = vpack.c.bf16 %v7175_v62, %v7174_v32  ;;  %v4476_v49 = vpack.c.bf16 %v7179_v9, %v7178_v39  ;;  %p4609_p2 = scmp.ne.s32.totalorder %s3194_s13, %s4608_s14  ;;  %p4614_p4 = scmp.lt.s32.totalorder %s4608_s14, %s4608_s14 }
 0x265   :  { %4305 = vmatpush1.bf16.msra.mxu0 %v4304_v27  ;;  %4462 = vmatpush3.bf16.msra.mxu1 %v4461_v11  ;;  %v7190_v27 = vld [vmem:[#allocation15_spill] sm:$0xff]  ;;  %v7194_v11 = vld [vmem:[#allocation22_spill] sm:$0xff]  ;;  %p4615_p5 = por %p4614_p4, %p4613_p3 }
 0x266   :  { %4307 = vmatprep.subr.bf16.mxu0 %v4306_v46  ;;  %4463 = vmatprep.subr.bf16.mxu1 %v7056_v63  ;;  %v7197_v46 = vld [vmem:[#allocation25_spill] sm:$0xff] }
 0x267   :  { %p4616_p6 = pnand %p4615_p5, %p4609_p2 }
 0x269   :  { %4309 = vmatpush1.bf16.msra.mxu0 %v4308_v51  ;;  %4465 = vmatpush3.bf16.msra.mxu1 %v4464_v31  ;;  %v7200_v51 = vld [vmem:[#allocation38_spill] sm:$0xff]  ;;  %v7202_v31 = vsub.s32 0, %v7201_v42 }
 0x26a   :  { %4311 = vmatprep.subr.bf16.mxu0 %v4310_v15  ;;  %4466 = vmatprep.subr.bf16.mxu1 %v7056_v63  ;;  %v1672_v15 = vrot.slane %v3204_v8, %v7203_v41 }
 0x26b   :  { %v1668_v10 = vrot.slane %v3204_v8, %v7202_v31 }
 0x26d   :  { %4313 = vmatpush1.bf16.msra.mxu0 %v4312_v52  ;;  %4468 = vmatpush3.bf16.msra.mxu1 %v4467_v12 }
 0x26e   :  { %4315 = vmatprep.subr.bf16.mxu0 %v4314_v50  ;;  %4469 = vmatprep.subr.bf16.mxu1 %v7056_v63 }
 0x271   :  { %4317 = vmatpush1.bf16.msra.mxu0 %v4316_v28  ;;  %4471 = vmatpush3.bf16.msra.mxu1 %v4470_v61 }
 0x272   :  { %4319 = vmatprep.subr.bf16.mxu0 %v4318_v37  ;;  %4472 = vmatprep.subr.bf16.mxu1 %v7056_v63 }
 0x275   :  { %4321 = vmatpush1.bf16.msra.mxu0 %v4320_v24  ;;  %4474 = vmatpush3.bf16.msra.mxu1 %v4473_v35 }
 0x276   :  { %4323 = vmatprep.subr.bf16.mxu0 %v4322_v19  ;;  %4475 = vmatprep.subr.bf16.mxu1 %v7056_v63 }
 0x279   :  { %4325 = vmatpush1.bf16.msra.mxu0 %v4324_v60  ;;  %4477 = vmatpush3.bf16.msra.mxu1 %v4476_v49 }
 0x27a   :  { %4327 = vmatprep.subr.bf16.mxu0 %v7108_v53  ;;  %4478 = vmatprep.subr.bf16.mxu1 %v7056_v63  ;;  %v7186_v53 = vld [vmem:[#allocation47_spill] sm:$0xff] }
 0x27c   :  { %2425 = vmatmul.mubr.f32.vlgmr.msra.gmra.mrb[2].mxu0 %v6189_v55  ;;  %3793 = vmatmul.mubr.f32.vlgmr.msra.gmra.mrb[2].mxu1 %v6189_v55 }
 0x27d   :  { %4329 = vmatpush1.bf16.msra.mxu0 %v7180_v36  ;;  %4480 = vmatpush3.bf16.msra.mxu1 %v7181_v1 }
 0x27e   :  { %4331 = vmatprep.subr.bf16.mxu0 %v7182_v56  ;;  %4481 = vmatprep.subr.bf16.mxu1 %v7056_v63 }
 0x27f   :  { %2527 = vmatprep.mubr.f32.mxu0 %v7057_v57  ;;  %3827 = vmatprep.mubr.msk.f32.mxu1 %vm4641_vm0, %v7057_v57  ;;  %v7191_v57 = vld [vmem:[#allocation18_spill] sm:$0xff] }
 0x281   :  { %4333 = vmatpush1.bf16.msra.mxu0 %v7183_v34  ;;  %4483 = vmatpush3.bf16.msra.mxu1 %v7184_v2 }
 0x282   :  { %4335 = vmatprep.subr.bf16.mxu0 %v7185_v21  ;;  %4484 = vmatprep.subr.bf16.mxu1 %v7056_v63 }
 0x285   :  { %4337 = vmatpush1.bf16.msra.mxu0 %v7186_v53  ;;  %4486 = vmatpush3.bf16.msra.mxu1 %v7187_v43 }
 0x286   :  { %4339 = vmatprep.subr.bf16.mxu0 %v7188_v47  ;;  %4487 = vmatprep.subr.bf16.mxu1 %v7056_v63 }
 0x289   :  { %4341 = vmatpush1.bf16.msra.mxu0 %v7189_v54  ;;  %4489 = vmatpush3.bf16.msra.mxu1 %v7190_v27 }
 0x28a   :  { %4343 = vmatprep.subr.bf16.mxu0 %v7191_v57  ;;  %4490 = vmatprep.subr.bf16.mxu1 %v7056_v63 }
 0x28d   :  { %4345 = vmatpush1.bf16.msra.mxu0 %v7192_v20  ;;  %4492 = vmatpush3.bf16.msra.mxu1 %v7193_v26 }
 0x28e   :  { %4347 = vmatprep.subr.bf16.mxu0 %v7194_v11  ;;  %4493 = vmatprep.subr.bf16.mxu1 %v7056_v63 }
 0x291   :  { %4349 = vmatpush1.bf16.msra.mxu0 %v7195_v48  ;;  %4495 = vmatpush3.bf16.msra.mxu1 %v7196_v13 }
 0x292   :  { %4351 = vmatprep.subr.bf16.mxu0 %v7197_v46  ;;  %4496 = vmatprep.subr.bf16.mxu1 %v7056_v63 }
 0x295   :  { %4353 = vmatpush1.bf16.msra.mxu0 %v7198_v14  ;;  %4498 = vmatpush3.bf16.msra.mxu1 %v7199_v38 }
 0x296   :  { %4355 = vmatprep.subr.bf16.mxu0 %v7200_v51  ;;  %4499 = vmatprep.subr.bf16.mxu1 %v7056_v63  ;;  %v7204_v63 = vsub.s32 2, %v7201_v42 }
 0x299   :  { %4357 = vmatpush1.bf16.msra.mxu0 %v7132_v7  ;;  %4501 = vmatpush3.bf16.msra.mxu1 %v7133_v44  ;;  %v1676_v7 = vrot.slane %v3204_v8, %v7204_v63 }
 0x29c   :  { %2529 = vmatmul.mubr.f32.vlgmr.msra.gmra.mrb[2].mxu0 %v6189_v55  ;;  %3828 = vmatmul.mubr.f32.vlgmr.msra.gmra.mrb[2].mxu1 %v6189_v55 }
 0x36f   :  { %v2530_v16 = vpop.f32.mrb[2].mxu0  ;;  %v3172_v0 = vpop.f32.mrb[2].mxu1 }
 0x370   :  { %v4505_v44 = vadd.f32 %v2530_v16, %v1668_v10  ;;  %v2532_v52 = vpop.f32.mrb[3].mxu0  ;;  %v3829_v17 = vpop.f32.mrb[3].mxu1  ;;  %v4507_v12 = vadd.f32 %v3172_v0, %v1676_v7 }
 0x371   :  { %v4506_v3 = vadd.f32 %v2532_v52, %v1672_v15 }
 0x372   :  { %v3205_v55 = vmul.f32 -1.442695, %v4505_v44 }
 0x373   :  { %v3182_v5 = vmax.f32 %v4506_v3, 0.0 }
 0x374   :  { %4560 = vpow2.f32 %v3205_v55 }
 0x375   :  { %v3183_v30 = vsub.f32 %v3182_v5, %v4507_v12 }
 0x37e   :  { %v4561_v50 = vpop.eup %4560 }
 0x37f   :  { %v3179_v18 = vadd.f32 1.0, %v4561_v50 }
 0x381   :  { %4562 = vrcp.f32 %v3179_v18 }
 0x38b   :  { %v4563_v25 = vpop.eup %4562 }
 0x38c   :  { %v3184_v28 = vmul.f32 %v4563_v25, %v3183_v30 }
 0x38e   :  { %v3185_v29 = vadd.f32 %v4507_v12, %v3184_v28 }
 0x390   :  { %3186 = vst [vmem:[#allocation7] sm:$0xff] %v3185_v29 }
 0x391   :  { %4619 = shalt.err (!%p4616_p6)
}
 0x392   :  { %s4620_s17 = scalar_lea.hbm %s6526_s3, 128 }
 0x393   :  { %p4621_p7 = scmp.ne.s32.totalorder %s6526_s3, %s4620_s17  ;;  %p4624_p8 = scmp.lt.u32.totalorder %s4620_s17, %s6526_s3 }
 0x395   :  { %p4626_p9 = pnand %p4624_p8, %p4621_p7 }
 0x397   :  { %4629 = shalt.err (!%p4626_p9)
}
 0x398   :  { %3196 = dma.vmem_to_hbm [thread:$0]  %s3194_s13, 128, %s6526_s3, [#allocation4]  }
 0x399   :  { %4634 = dma.done.wait [#allocation4], 128  }
 0x39a   :  { %4635 = vsyncadd [#allocation4], 4294967168 }
 0x39b   :  { %3200 = vsyncpa [#allocation3], 1 }
 0x39c   :  { %3201 = vsyncpa [#allocation6], 1 }
 0x39d   :  { %3202 = vsyncpa [#allocation4], 1 }

</bundles_post_ra>
